<compile_context>
chip_gen: v7x
topology: tpu7x:2x2x1
jax: 0.10.0
libtpu: 0.0.40
codegen_flags: <defaults>
</compile_context>

<pallas_src>
import jax
import jax.numpy as jnp
import numpy as np
from jax.experimental import pallas as pl
from jax.experimental.pallas import tpu as pltpu

LANE = 128  # per-tap lane padding for the fused gather matmuls


# ------------------------------- in-kernel helpers ------------------------------- #

def _leaky(v):
    return jnp.where(v > 0, v, 0.2 * v)


def _gn_per_row(x, gamma, beta, eps=1e-5):
    """GroupNorm with one channel per group == per-row normalization.  x: (C, L)."""
    inv = 1.0 / x.shape[1]
    mean = jnp.sum(x, axis=1, keepdims=True) * inv
    d = x - mean
    var = jnp.sum(d * d, axis=1, keepdims=True) * inv     # two-pass, biased (PyTorch GN)
    return d * jax.lax.rsqrt(var + eps) * gamma + beta


def _gn_pairs(x, gamma, beta, eps=1e-5):
    """GroupNorm with 2 channels per group.  Channels are pre-permuted so the group
    partner of row r is row r +/- 64.  x: (128, L); stats reduce over 2*L elements."""
    inv = 1.0 / (2.0 * x.shape[1])
    rs = jnp.sum(x, axis=1, keepdims=True)                 # (128, 1)
    gs = rs[:64] + rs[64:]
    mean = jnp.concatenate([gs, gs], axis=0) * inv
    d = x - mean
    ss = jnp.sum(d * d, axis=1, keepdims=True)
    gss = ss[:64] + ss[64:]
    var = jnp.concatenate([gss, gss], axis=0) * inv
    return d * jax.lax.rsqrt(var + eps) * gamma + beta


# ----------------------------------- the kernel ----------------------------------- #

def _disc_kernel(p1_ref, w1_ref, s2_ref, w2_ref, g2_ref, b2_ref,
                 s3_ref, w3_ref, g3_ref, b3_ref, w4_ref, o_ref,
                 gat2_ref, gat3_ref):
    """One sample per grid step; all parameters are grid-step invariant VMEM residents."""
    # Layer 1: Conv2d(1, 32, 4, 2, 1) + LeakyReLU(0.2)                     -> (32, 196)
    x1 = _leaky(jnp.dot(w1_ref[...], p1_ref[0], preferred_element_type=jnp.float32))

    # Layer 2: Conv2d(32, 64, 4, 2, 1) + GroupNorm(64, 64) + LeakyReLU     -> (64, 49)
    # one fused lane-dense gather matmul (taps concatenated along lanes, 128-padded) ...
    r2 = jnp.dot(x1, s2_ref[...], preferred_element_type=jnp.float32)      # (32, 16*128)
    # ... then 16 aligned block copies into the (16*32, 128) scratch the weight matmul reads
    for t in range(16):
        gat2_ref[t * 32:(t + 1) * 32, :] = r2[:, t * LANE:(t + 1) * LANE]
    h2 = jnp.dot(w2_ref[...], gat2_ref[...], preferred_element_type=jnp.float32)  # (64, 128)
    x2 = _leaky(_gn_per_row(h2[:, :49], g2_ref[...], b2_ref[...]))          # (64, 49)

    # Layer 3: Conv2d(64, 128, 3, 2, 1) + GroupNorm(64, 128) + LeakyReLU   -> (128, 16)
    # (conv-3 output channels arrive permuted so GN pair partners are 64 rows apart)
    r3 = jnp.dot(x2, s3_ref[...], preferred_element_type=jnp.float32)      # (64, 9*128)
    for t in range(9):
        gat3_ref[t * 64:(t + 1) * 64, :] = r3[:, t * LANE:(t + 1) * LANE]
    h3 = jnp.dot(w3_ref[...], gat3_ref[...], preferred_element_type=jnp.float32)  # (128, 128)
    x3 = _leaky(_gn_pairs(h3[:, :16], g3_ref[...], b3_ref[...]))            # (128, 16)

    # Head: Conv2d(128, 1, 4, 1, 0) + Sigmoid == full dot (VPU mul + reductions)
    zr = jnp.sum(x3 * w4_ref[...], axis=1, keepdims=True)                   # (128, 1)
    z = jnp.sum(zr, axis=0, keepdims=True)                                  # (1, 1)
    # exact sigmoid (approx reciprocal would route to the EUP, but it is a single scalar
    # per step and exactness keeps the 1e-3 verification tight)
    o_ref[...] = (1.0 / (1.0 + jnp.exp(-z))).reshape(1, 1, 1)


# ------------------------------- host-side constants ------------------------------- #

def _selection_cat(h, w, k, stride, pad):
    """S[p_in, t*LANE + q] = 1 iff conv output position q reads input position p_in at
    tap t (stride + zero padding folded in).  Each tap's P_out block is padded to LANE
    lanes so the in-kernel per-tap slices are 128-aligned; pad columns are all zero."""
    ho = (h + 2 * pad - k) // stride + 1
    wo = (w + 2 * pad - k) // stride + 1
    s = np.zeros((h * w, k * k * LANE), np.float32)
    for kh in range(k):
        for kw in range(k):
            t = kh * k + kw
            for oh in range(ho):
                ih = oh * stride + kh - pad
                if ih < 0 or ih >= h:
                    continue
                for ow in range(wo):
                    iw = ow * stride + kw - pad
                    if iw < 0 or iw >= w:
                        continue
                    s[ih * w + iw, t * LANE + oh * wo + ow] = 1.0
    return s


def _l1_patches(x):
    """x: (N, 1, 28, 28) -> (N, 16, 196); tap-major (kh, kw), spatial row-major.
    Tiny fused XLA prologue (pad + 16 strided slices + stack)."""
    n = x.shape[0]
    xp = jnp.pad(x, ((0, 0), (0, 0), (1, 1), (1, 1)))
    cols = []
    for kh in range(4):
        for kw in range(4):
            cols.append(xp[:, 0, kh:kh + 28:2, kw:kw + 28:2])   # (N, 14, 14)
    return jnp.stack(cols, axis=1).reshape(n, 16, 196)


def make_discriminator_forward(batch):
    s2 = jnp.asarray(_selection_cat(14, 14, 4, 2, 1))          # (196, 16*128)
    s3 = jnp.asarray(_selection_cat(7, 7, 3, 2, 1))            # (49,  9*128)
    # conv-3 output-channel permutation: GroupNorm(64, 128) partners land 64 rows apart
    perm = np.arange(128).reshape(64, 2).T.reshape(-1)         # [0,2,...,126,1,3,...,127]

    def const_spec(shape):
        nd = len(shape)
        return pl.BlockSpec(shape, lambda b, _nd=nd: (0,) * _nd)

    in_specs = [
        pl.BlockSpec((1, 16, 196), lambda b: (b, 0, 0)),        # p1 (per-sample block)
        const_spec((32, 16)),                                   # w1
        const_spec((196, 16 * LANE)),                           # s2
        const_spec((64, 16 * 32)),                              # w2
        const_spec((64, 1)),                                    # gamma2
        const_spec((64, 1)),                                    # beta2
        const_spec((49, 9 * LANE)),                             # s3
        const_spec((128, 9 * 64)),                              # w3
        const_spec((128, 1)),                                   # gamma3
        const_spec((128, 1)),                                   # beta3
        const_spec((128, 16)),                                  # w4
    ]

    # cost estimate parameterized by batch (per review), not hard-coded
    flops_per_sample = 2 * (32 * 16 * 196 + 32 * 196 * 16 * LANE + 64 * 512 * LANE
                            + 64 * 49 * 9 * LANE + 128 * 576 * LANE + 128 * 16)
    param_bytes = 4 * (32 * 16 + 196 * 16 * LANE + 64 * 512 + 49 * 9 * LANE
                       + 128 * 576 + 128 * 16 + 2 * 64 + 2 * 128)
    cost = pl.CostEstimate(flops=batch * flops_per_sample,
                           transcendentals=batch * 200,
                           bytes_accessed=batch * (16 * 196 * 4 + 4) + param_bytes)

    fused = pl.pallas_call(
        _disc_kernel,
        out_shape=jax.ShapeDtypeStruct((batch, 1, 1), jnp.float32),
        grid=(batch,),
        in_specs=in_specs,
        out_specs=pl.BlockSpec((1, 1, 1), lambda b: (b, 0, 0)),
        scratch_shapes=[pltpu.VMEM((16 * 32, LANE), jnp.float32),   # layer-2 tap scratch
                        pltpu.VMEM((9 * 64, LANE), jnp.float32)],   # layer-3 tap scratch
        compiler_params=pltpu.CompilerParams(
            dimension_semantics=("parallel",),
            vmem_limit_bytes=32 * 1024 * 1024),
        cost_estimate=cost,
    )

    @jax.jit
    def forward(x, params):
        w1, w2, g2, b2, w3, g3, b3, w4 = params
        p1 = _l1_patches(x).astype(jnp.float32)                              # (N, 16, 196)
        w1f = w1.reshape(32, 16).astype(jnp.float32)
        # weight columns ordered (tap-major, c_in) to match the scratch row layout
        w2f = w2.transpose(0, 2, 3, 1).reshape(64, 16 * 32).astype(jnp.float32)
        w3f = w3.transpose(0, 2, 3, 1).reshape(128, 9 * 64)[perm].astype(jnp.float32)
        w4f = w4.reshape(128, 16)[perm].astype(jnp.float32)
        g2c = g2.reshape(64, 1).astype(jnp.float32)
        b2c = b2.reshape(64, 1).astype(jnp.float32)
        g3c = g3[perm].reshape(128, 1).astype(jnp.float32)
        b3c = b3[perm].reshape(128, 1).astype(jnp.float32)
        out = fused(p1, w1f, s2, w2f, g2c, b2c, s3, w3f, g3c, b3c, w4f)
        return out.reshape(-1)                                               # (N,)

    return forward


# -------------------------------- pure-JAX reference -------------------------------- #

def ref_forward(x, params):
    w1, w2, g2, b2, w3, g3, b3, w4 = params

    def conv(v, w, s, p):
        return jax.lax.conv_general_dilated(
            v, w, (s, s), [(p, p), (p, p)],
            dimension_numbers=("NCHW", "OIHW", "NCHW"),
            precision=jax.lax.Precision.HIGHEST)

    def leaky(v):
        return jnp.where(v > 0, v, 0.2 * v)

    def gn(v, groups, gamma, beta, eps=1e-5):
        n, c, h, w = v.shape
        vg = v.reshape(n, groups, c // groups, h, w)
        m = vg.mean(axis=(2, 3, 4), keepdims=True)
        var = vg.var(axis=(2, 3, 4), keepdims=True)
        vh = ((vg - m) / jnp.sqrt(var + eps)).reshape(n, c, h, w)
        return vh * gamma.reshape(1, c, 1, 1) + beta.reshape(1, c, 1, 1)

    h = leaky(conv(x, w1, 2, 1))
    h = leaky(gn(conv(h, w2, 2, 1), 64, g2, b2))
    h = leaky(gn(conv(h, w3, 2, 1), 64, g3, b3))
    h = jax.nn.sigmoid(conv(h, w4, 1, 0))
    return h.reshape(-1, 1).squeeze(1)


# --------------------------------------- main --------------------------------------- #

if __name__ == "__main__":
    key = jax.random.PRNGKey(0)
    ks = jax.random.split(key, 9)
    N = 2

    x = jax.random.normal(ks[0], (N, 1, 28, 28), jnp.float32)
    w1 = 0.02 * jax.random.normal(ks[1], (32, 1, 4, 4), jnp.float32)
    w2 = 0.02 * jax.random.normal(ks[2], (64, 32, 4, 4), jnp.float32)
    w3 = 0.02 * jax.random.normal(ks[3], (128, 64, 3, 3), jnp.float32)
    w4 = 0.02 * jax.random.normal(ks[4], (1, 128, 4, 4), jnp.float32)
    g2 = 1.0 + 0.1 * jax.random.normal(ks[5], (64,), jnp.float32)
    b2 = 0.1 * jax.random.normal(ks[6], (64,), jnp.float32)
    g3 = 1.0 + 0.1 * jax.random.normal(ks[7], (128,), jnp.float32)
    b3 = 0.1 * jax.random.normal(ks[8], (128,), jnp.float32)
    params = (w1, w2, g2, b2, w3, g3, b3, w4)

    forward = make_discriminator_forward(N)
    out = jax.block_until_ready(forward(x, params))
    ref = ref_forward(x, params)

    assert out.shape == (N,), out.shape
    assert bool(jnp.all(jnp.isfinite(out)))
    assert bool(jnp.allclose(out, ref, rtol=1e-3, atol=1e-3)), (out, ref)
    print("KERNEL_OK")
</pallas_src>

<mosaic_0001>
module attributes {stable_mosaic.version = 11 : i64} {
  func.func @_disc_kernel(%arg0: i32, %arg1: memref<1x16x196xf32, #tpu.memory_space<vmem>>, %arg2: memref<32x16xf32, #tpu.memory_space<vmem>>, %arg3: memref<196x2048xf32, #tpu.memory_space<vmem>>, %arg4: memref<64x512xf32, #tpu.memory_space<vmem>>, %arg5: memref<64x1xf32, #tpu.memory_space<vmem>>, %arg6: memref<64x1xf32, #tpu.memory_space<vmem>>, %arg7: memref<49x1152xf32, #tpu.memory_space<vmem>>, %arg8: memref<128x576xf32, #tpu.memory_space<vmem>>, %arg9: memref<128x1xf32, #tpu.memory_space<vmem>>, %arg10: memref<128x1xf32, #tpu.memory_space<vmem>>, %arg11: memref<128x16xf32, #tpu.memory_space<vmem>>, %arg12: memref<1x1x1xf32, #tpu.memory_space<vmem>>, %arg13: memref<512x128xf32, #tpu.memory_space<vmem>>, %arg14: memref<576x128xf32, #tpu.memory_space<vmem>>) attributes {dimension_semantics = [#tpu.dimension_semantics<parallel>], iteration_bounds = array<i64: 2>, scalar_prefetch = 0 : i64, scratch_operands = 2 : i64, tpu.core_type = #tpu.core_type<tc>, window_params = [{transform_indices = @transform_0, window_bounds = array<i64: 1, 16, 196>}, {pipeline_mode = #tpu.pipeline_mode<synchronous>, transform_indices = @transform_1, window_bounds = array<i64: 32, 16>}, {pipeline_mode = #tpu.pipeline_mode<synchronous>, transform_indices = @transform_2, window_bounds = array<i64: 196, 2048>}, {pipeline_mode = #tpu.pipeline_mode<synchronous>, transform_indices = @transform_3, window_bounds = array<i64: 64, 512>}, {pipeline_mode = #tpu.pipeline_mode<synchronous>, transform_indices = @transform_4, window_bounds = array<i64: 64, 1>}, {pipeline_mode = #tpu.pipeline_mode<synchronous>, transform_indices = @transform_5, window_bounds = array<i64: 64, 1>}, {pipeline_mode = #tpu.pipeline_mode<synchronous>, transform_indices = @transform_6, window_bounds = array<i64: 49, 1152>}, {pipeline_mode = #tpu.pipeline_mode<synchronous>, transform_indices = @transform_7, window_bounds = array<i64: 128, 576>}, {pipeline_mode = #tpu.pipeline_mode<synchronous>, transform_indices = @transform_8, window_bounds = array<i64: 128, 1>}, {pipeline_mode = #tpu.pipeline_mode<synchronous>, transform_indices = @transform_9, window_bounds = array<i64: 128, 1>}, {pipeline_mode = #tpu.pipeline_mode<synchronous>, transform_indices = @transform_10, window_bounds = array<i64: 128, 16>}, {transform_indices = @transform_11, window_bounds = array<i64: 1, 1, 1>}]} {
    %c0 = arith.constant 0 : index
    %c0_0 = arith.constant 0 : index
    %0 = vector.load %arg2[%c0, %c0_0] : memref<32x16xf32, #tpu.memory_space<vmem>>, vector<32x16xf32>
    %c0_1 = arith.constant 0 : index
    %c0_2 = arith.constant 0 : index
    %c0_3 = arith.constant 0 : index
    %1 = vector.load %arg1[%c0_1, %c0_2, %c0_3] : memref<1x16x196xf32, #tpu.memory_space<vmem>>, vector<1x16x196xf32>
    %2 = vector.shape_cast %1 : vector<1x16x196xf32> to vector<16x196xf32>
    %cst = arith.constant dense<0.000000e+00> : vector<32x196xf32>
    %3 = tpu.matmul %0, %2, %cst {dimension_numbers = #tpu.dot_dimension_numbers<[1], [0], [0], [1], [0, 0, 1, 1], [], []>} : vector<32x16xf32>, vector<16x196xf32>, vector<32x196xf32> -> vector<32x196xf32>
    %cst_4 = arith.constant 0.000000e+00 : f32
    %4 = vector.broadcast %cst_4 : f32 to vector<32x196xf32>
    %5 = arith.cmpf ogt, %3, %4 : vector<32x196xf32>
    %cst_5 = arith.constant 2.000000e-01 : f32
    %6 = vector.broadcast %cst_5 : f32 to vector<32x196xf32>
    %7 = arith.mulf %6, %3 : vector<32x196xf32>
    %8 = arith.select %5, %3, %7 : vector<32x196xi1>, vector<32x196xf32>
    %c0_6 = arith.constant 0 : index
    %c0_7 = arith.constant 0 : index
    %9 = vector.load %arg3[%c0_6, %c0_7] : memref<196x2048xf32, #tpu.memory_space<vmem>>, vector<196x2048xf32>
    %cst_8 = arith.constant dense<0.000000e+00> : vector<32x2048xf32>
    %10 = tpu.matmul %8, %9, %cst_8 {dimension_numbers = #tpu.dot_dimension_numbers<[1], [0], [0], [1], [0, 0, 1, 1], [], []>} : vector<32x196xf32>, vector<196x2048xf32>, vector<32x2048xf32> -> vector<32x2048xf32>
    %11 = vector.extract_strided_slice %10 {offsets = [0, 0], sizes = [32, 128], strides = [1, 1]} : vector<32x2048xf32> to vector<32x128xf32>
    %c0_9 = arith.constant 0 : index
    %c0_10 = arith.constant 0 : index
    %12 = vector.load %arg13[%c0_9, %c0_10] : memref<512x128xf32, #tpu.memory_space<vmem>>, vector<32x128xf32>
    tpu.vector_store %arg13[%c0_9, %c0_10], %11 {strides = array<i32>} : memref<512x128xf32, #tpu.memory_space<vmem>>, vector<32x128xf32>,
    %13 = vector.extract_strided_slice %10 {offsets = [0, 128], sizes = [32, 128], strides = [1, 1]} : vector<32x2048xf32> to vector<32x128xf32>
    %c32 = arith.constant 32 : index
    %c0_11 = arith.constant 0 : index
    %14 = vector.load %arg13[%c32, %c0_11] : memref<512x128xf32, #tpu.memory_space<vmem>>, vector<32x128xf32>
    tpu.vector_store %arg13[%c32, %c0_11], %13 {strides = array<i32>} : memref<512x128xf32, #tpu.memory_space<vmem>>, vector<32x128xf32>,
    %15 = vector.extract_strided_slice %10 {offsets = [0, 256], sizes = [32, 128], strides = [1, 1]} : vector<32x2048xf32> to vector<32x128xf32>
    %c64 = arith.constant 64 : index
    %c0_12 = arith.constant 0 : index
    %16 = vector.load %arg13[%c64, %c0_12] : memref<512x128xf32, #tpu.memory_space<vmem>>, vector<32x128xf32>
    tpu.vector_store %arg13[%c64, %c0_12], %15 {strides = array<i32>} : memref<512x128xf32, #tpu.memory_space<vmem>>, vector<32x128xf32>,
    %17 = vector.extract_strided_slice %10 {offsets = [0, 384], sizes = [32, 128], strides = [1, 1]} : vector<32x2048xf32> to vector<32x128xf32>
    %c96 = arith.constant 96 : index
    %c0_13 = arith.constant 0 : index
    %18 = vector.load %arg13[%c96, %c0_13] : memref<512x128xf32, #tpu.memory_space<vmem>>, vector<32x128xf32>
    tpu.vector_store %arg13[%c96, %c0_13], %17 {strides = array<i32>} : memref<512x128xf32, #tpu.memory_space<vmem>>, vector<32x128xf32>,
    %19 = vector.extract_strided_slice %10 {offsets = [0, 512], sizes = [32, 128], strides = [1, 1]} : vector<32x2048xf32> to vector<32x128xf32>
    %c128 = arith.constant 128 : index
    %c0_14 = arith.constant 0 : index
    %20 = vector.load %arg13[%c128, %c0_14] : memref<512x128xf32, #tpu.memory_space<vmem>>, vector<32x128xf32>
    tpu.vector_store %arg13[%c128, %c0_14], %19 {strides = array<i32>} : memref<512x128xf32, #tpu.memory_space<vmem>>, vector<32x128xf32>,
    %21 = vector.extract_strided_slice %10 {offsets = [0, 640], sizes = [32, 128], strides = [1, 1]} : vector<32x2048xf32> to vector<32x128xf32>
    %c160 = arith.constant 160 : index
    %c0_15 = arith.constant 0 : index
    %22 = vector.load %arg13[%c160, %c0_15] : memref<512x128xf32, #tpu.memory_space<vmem>>, vector<32x128xf32>
    tpu.vector_store %arg13[%c160, %c0_15], %21 {strides = array<i32>} : memref<512x128xf32, #tpu.memory_space<vmem>>, vector<32x128xf32>,
    %23 = vector.extract_strided_slice %10 {offsets = [0, 768], sizes = [32, 128], strides = [1, 1]} : vector<32x2048xf32> to vector<32x128xf32>
    %c192 = arith.constant 192 : index
    %c0_16 = arith.constant 0 : index
    %24 = vector.load %arg13[%c192, %c0_16] : memref<512x128xf32, #tpu.memory_space<vmem>>, vector<32x128xf32>
    tpu.vector_store %arg13[%c192, %c0_16], %23 {strides = array<i32>} : memref<512x128xf32, #tpu.memory_space<vmem>>, vector<32x128xf32>,
    %25 = vector.extract_strided_slice %10 {offsets = [0, 896], sizes = [32, 128], strides = [1, 1]} : vector<32x2048xf32> to vector<32x128xf32>
    %c224 = arith.constant 224 : index
    %c0_17 = arith.constant 0 : index
    %26 = vector.load %arg13[%c224, %c0_17] : memref<512x128xf32, #tpu.memory_space<vmem>>, vector<32x128xf32>
    tpu.vector_store %arg13[%c224, %c0_17], %25 {strides = array<i32>} : memref<512x128xf32, #tpu.memory_space<vmem>>, vector<32x128xf32>,
    %27 = vector.extract_strided_slice %10 {offsets = [0, 1024], sizes = [32, 128], strides = [1, 1]} : vector<32x2048xf32> to vector<32x128xf32>
    %c256 = arith.constant 256 : index
    %c0_18 = arith.constant 0 : index
    %28 = vector.load %arg13[%c256, %c0_18] : memref<512x128xf32, #tpu.memory_space<vmem>>, vector<32x128xf32>
    tpu.vector_store %arg13[%c256, %c0_18], %27 {strides = array<i32>} : memref<512x128xf32, #tpu.memory_space<vmem>>, vector<32x128xf32>,
    %29 = vector.extract_strided_slice %10 {offsets = [0, 1152], sizes = [32, 128], strides = [1, 1]} : vector<32x2048xf32> to vector<32x128xf32>
    %c288 = arith.constant 288 : index
    %c0_19 = arith.constant 0 : index
    %30 = vector.load %arg13[%c288, %c0_19] : memref<512x128xf32, #tpu.memory_space<vmem>>, vector<32x128xf32>
    tpu.vector_store %arg13[%c288, %c0_19], %29 {strides = array<i32>} : memref<512x128xf32, #tpu.memory_space<vmem>>, vector<32x128xf32>,
    %31 = vector.extract_strided_slice %10 {offsets = [0, 1280], sizes = [32, 128], strides = [1, 1]} : vector<32x2048xf32> to vector<32x128xf32>
    %c320 = arith.constant 320 : index
    %c0_20 = arith.constant 0 : index
    %32 = vector.load %arg13[%c320, %c0_20] : memref<512x128xf32, #tpu.memory_space<vmem>>, vector<32x128xf32>
    tpu.vector_store %arg13[%c320, %c0_20], %31 {strides = array<i32>} : memref<512x128xf32, #tpu.memory_space<vmem>>, vector<32x128xf32>,
    %33 = vector.extract_strided_slice %10 {offsets = [0, 1408], sizes = [32, 128], strides = [1, 1]} : vector<32x2048xf32> to vector<32x128xf32>
    %c352 = arith.constant 352 : index
    %c0_21 = arith.constant 0 : index
    %34 = vector.load %arg13[%c352, %c0_21] : memref<512x128xf32, #tpu.memory_space<vmem>>, vector<32x128xf32>
    tpu.vector_store %arg13[%c352, %c0_21], %33 {strides = array<i32>} : memref<512x128xf32, #tpu.memory_space<vmem>>, vector<32x128xf32>,
    %35 = vector.extract_strided_slice %10 {offsets = [0, 1536], sizes = [32, 128], strides = [1, 1]} : vector<32x2048xf32> to vector<32x128xf32>
    %c384 = arith.constant 384 : index
    %c0_22 = arith.constant 0 : index
    %36 = vector.load %arg13[%c384, %c0_22] : memref<512x128xf32, #tpu.memory_space<vmem>>, vector<32x128xf32>
    tpu.vector_store %arg13[%c384, %c0_22], %35 {strides = array<i32>} : memref<512x128xf32, #tpu.memory_space<vmem>>, vector<32x128xf32>,
    %37 = vector.extract_strided_slice %10 {offsets = [0, 1664], sizes = [32, 128], strides = [1, 1]} : vector<32x2048xf32> to vector<32x128xf32>
    %c416 = arith.constant 416 : index
    %c0_23 = arith.constant 0 : index
    %38 = vector.load %arg13[%c416, %c0_23] : memref<512x128xf32, #tpu.memory_space<vmem>>, vector<32x128xf32>
    tpu.vector_store %arg13[%c416, %c0_23], %37 {strides = array<i32>} : memref<512x128xf32, #tpu.memory_space<vmem>>, vector<32x128xf32>,
    %39 = vector.extract_strided_slice %10 {offsets = [0, 1792], sizes = [32, 128], strides = [1, 1]} : vector<32x2048xf32> to vector<32x128xf32>
    %c448 = arith.constant 448 : index
    %c0_24 = arith.constant 0 : index
    %40 = vector.load %arg13[%c448, %c0_24] : memref<512x128xf32, #tpu.memory_space<vmem>>, vector<32x128xf32>
    tpu.vector_store %arg13[%c448, %c0_24], %39 {strides = array<i32>} : memref<512x128xf32, #tpu.memory_space<vmem>>, vector<32x128xf32>,
    %41 = vector.extract_strided_slice %10 {offsets = [0, 1920], sizes = [32, 128], strides = [1, 1]} : vector<32x2048xf32> to vector<32x128xf32>
    %c480 = arith.constant 480 : index
    %c0_25 = arith.constant 0 : index
    %42 = vector.load %arg13[%c480, %c0_25] : memref<512x128xf32, #tpu.memory_space<vmem>>, vector<32x128xf32>
    tpu.vector_store %arg13[%c480, %c0_25], %41 {strides = array<i32>} : memref<512x128xf32, #tpu.memory_space<vmem>>, vector<32x128xf32>,
    %c0_26 = arith.constant 0 : index
    %c0_27 = arith.constant 0 : index
    %43 = vector.load %arg4[%c0_26, %c0_27] : memref<64x512xf32, #tpu.memory_space<vmem>>, vector<64x512xf32>
    %c0_28 = arith.constant 0 : index
    %c0_29 = arith.constant 0 : index
    %44 = vector.load %arg13[%c0_28, %c0_29] : memref<512x128xf32, #tpu.memory_space<vmem>>, vector<512x128xf32>
    %cst_30 = arith.constant dense<0.000000e+00> : vector<64x128xf32>
    %45 = tpu.matmul %43, %44, %cst_30 {dimension_numbers = #tpu.dot_dimension_numbers<[1], [0], [0], [1], [0, 0, 1, 1], [], []>} : vector<64x512xf32>, vector<512x128xf32>, vector<64x128xf32> -> vector<64x128xf32>
    %46 = vector.extract_strided_slice %45 {offsets = [0, 0], sizes = [64, 49], strides = [1, 1]} : vector<64x128xf32> to vector<64x49xf32>
    %c0_31 = arith.constant 0 : index
    %c0_32 = arith.constant 0 : index
    %47 = vector.load %arg5[%c0_31, %c0_32] : memref<64x1xf32, #tpu.memory_space<vmem>>, vector<64x1xf32>
    %c0_33 = arith.constant 0 : index
    %c0_34 = arith.constant 0 : index
    %48 = vector.load %arg6[%c0_33, %c0_34] : memref<64x1xf32, #tpu.memory_space<vmem>>, vector<64x1xf32>
    %cst_35 = arith.constant dense<0.000000e+00> : vector<64xf32>
    %49 = vector.multi_reduction <add>, %46, %cst_35 [1] : vector<64x49xf32> to vector<64xf32>
    %50 = vector.shape_cast %49 : vector<64xf32> to vector<64x1xf32>
    %cst_36 = arith.constant 0.0204081628 : f32
    %51 = vector.broadcast %cst_36 : f32 to vector<64x1xf32>
    %52 = arith.mulf %50, %51 : vector<64x1xf32>
    %53 = vector.broadcast %52 : vector<64x1xf32> to vector<64x49xf32>
    %54 = arith.subf %46, %53 : vector<64x49xf32>
    %55 = arith.mulf %54, %54 : vector<64x49xf32>
    %cst_37 = arith.constant dense<0.000000e+00> : vector<64xf32>
    %56 = vector.multi_reduction <add>, %55, %cst_37 [1] : vector<64x49xf32> to vector<64xf32>
    %57 = vector.shape_cast %56 : vector<64xf32> to vector<64x1xf32>
    %cst_38 = arith.constant 0.0204081628 : f32
    %58 = vector.broadcast %cst_38 : f32 to vector<64x1xf32>
    %59 = arith.mulf %57, %58 : vector<64x1xf32>
    %cst_39 = arith.constant 9.99999974E-6 : f32
    %60 = vector.broadcast %cst_39 : f32 to vector<64x1xf32>
    %61 = arith.addf %59, %60 : vector<64x1xf32>
    %62 = math.rsqrt %61 : vector<64x1xf32>
    %63 = vector.broadcast %62 : vector<64x1xf32> to vector<64x49xf32>
    %64 = arith.mulf %54, %63 : vector<64x49xf32>
    %65 = vector.broadcast %47 : vector<64x1xf32> to vector<64x49xf32>
    %66 = arith.mulf %64, %65 : vector<64x49xf32>
    %67 = vector.broadcast %48 : vector<64x1xf32> to vector<64x49xf32>
    %68 = arith.addf %66, %67 : vector<64x49xf32>
    %cst_40 = arith.constant 0.000000e+00 : f32
    %69 = vector.broadcast %cst_40 : f32 to vector<64x49xf32>
    %70 = arith.cmpf ogt, %68, %69 : vector<64x49xf32>
    %cst_41 = arith.constant 2.000000e-01 : f32
    %71 = vector.broadcast %cst_41 : f32 to vector<64x49xf32>
    %72 = arith.mulf %71, %68 : vector<64x49xf32>
    %73 = arith.select %70, %68, %72 : vector<64x49xi1>, vector<64x49xf32>
    %c0_42 = arith.constant 0 : index
    %c0_43 = arith.constant 0 : index
    %74 = vector.load %arg7[%c0_42, %c0_43] : memref<49x1152xf32, #tpu.memory_space<vmem>>, vector<49x1152xf32>
    %cst_44 = arith.constant dense<0.000000e+00> : vector<64x1152xf32>
    %75 = tpu.matmul %73, %74, %cst_44 {dimension_numbers = #tpu.dot_dimension_numbers<[1], [0], [0], [1], [0, 0, 1, 1], [], []>} : vector<64x49xf32>, vector<49x1152xf32>, vector<64x1152xf32> -> vector<64x1152xf32>
    %76 = vector.extract_strided_slice %75 {offsets = [0, 0], sizes = [64, 128], strides = [1, 1]} : vector<64x1152xf32> to vector<64x128xf32>
    %c0_45 = arith.constant 0 : index
    %c0_46 = arith.constant 0 : index
    %77 = vector.load %arg14[%c0_45, %c0_46] : memref<576x128xf32, #tpu.memory_space<vmem>>, vector<64x128xf32>
    tpu.vector_store %arg14[%c0_45, %c0_46], %76 {strides = array<i32>} : memref<576x128xf32, #tpu.memory_space<vmem>>, vector<64x128xf32>,
    %78 = vector.extract_strided_slice %75 {offsets = [0, 128], sizes = [64, 128], strides = [1, 1]} : vector<64x1152xf32> to vector<64x128xf32>
    %c64_47 = arith.constant 64 : index
    %c0_48 = arith.constant 0 : index
    %79 = vector.load %arg14[%c64_47, %c0_48] : memref<576x128xf32, #tpu.memory_space<vmem>>, vector<64x128xf32>
    tpu.vector_store %arg14[%c64_47, %c0_48], %78 {strides = array<i32>} : memref<576x128xf32, #tpu.memory_space<vmem>>, vector<64x128xf32>,
    %80 = vector.extract_strided_slice %75 {offsets = [0, 256], sizes = [64, 128], strides = [1, 1]} : vector<64x1152xf32> to vector<64x128xf32>
    %c128_49 = arith.constant 128 : index
    %c0_50 = arith.constant 0 : index
    %81 = vector.load %arg14[%c128_49, %c0_50] : memref<576x128xf32, #tpu.memory_space<vmem>>, vector<64x128xf32>
    tpu.vector_store %arg14[%c128_49, %c0_50], %80 {strides = array<i32>} : memref<576x128xf32, #tpu.memory_space<vmem>>, vector<64x128xf32>,
    %82 = vector.extract_strided_slice %75 {offsets = [0, 384], sizes = [64, 128], strides = [1, 1]} : vector<64x1152xf32> to vector<64x128xf32>
    %c192_51 = arith.constant 192 : index
    %c0_52 = arith.constant 0 : index
    %83 = vector.load %arg14[%c192_51, %c0_52] : memref<576x128xf32, #tpu.memory_space<vmem>>, vector<64x128xf32>
    tpu.vector_store %arg14[%c192_51, %c0_52], %82 {strides = array<i32>} : memref<576x128xf32, #tpu.memory_space<vmem>>, vector<64x128xf32>,
    %84 = vector.extract_strided_slice %75 {offsets = [0, 512], sizes = [64, 128], strides = [1, 1]} : vector<64x1152xf32> to vector<64x128xf32>
    %c256_53 = arith.constant 256 : index
    %c0_54 = arith.constant 0 : index
    %85 = vector.load %arg14[%c256_53, %c0_54] : memref<576x128xf32, #tpu.memory_space<vmem>>, vector<64x128xf32>
    tpu.vector_store %arg14[%c256_53, %c0_54], %84 {strides = array<i32>} : memref<576x128xf32, #tpu.memory_space<vmem>>, vector<64x128xf32>,
    %86 = vector.extract_strided_slice %75 {offsets = [0, 640], sizes = [64, 128], strides = [1, 1]} : vector<64x1152xf32> to vector<64x128xf32>
    %c320_55 = arith.constant 320 : index
    %c0_56 = arith.constant 0 : index
    %87 = vector.load %arg14[%c320_55, %c0_56] : memref<576x128xf32, #tpu.memory_space<vmem>>, vector<64x128xf32>
    tpu.vector_store %arg14[%c320_55, %c0_56], %86 {strides = array<i32>} : memref<576x128xf32, #tpu.memory_space<vmem>>, vector<64x128xf32>,
    %88 = vector.extract_strided_slice %75 {offsets = [0, 768], sizes = [64, 128], strides = [1, 1]} : vector<64x1152xf32> to vector<64x128xf32>
    %c384_57 = arith.constant 384 : index
    %c0_58 = arith.constant 0 : index
    %89 = vector.load %arg14[%c384_57, %c0_58] : memref<576x128xf32, #tpu.memory_space<vmem>>, vector<64x128xf32>
    tpu.vector_store %arg14[%c384_57, %c0_58], %88 {strides = array<i32>} : memref<576x128xf32, #tpu.memory_space<vmem>>, vector<64x128xf32>,
    %90 = vector.extract_strided_slice %75 {offsets = [0, 896], sizes = [64, 128], strides = [1, 1]} : vector<64x1152xf32> to vector<64x128xf32>
    %c448_59 = arith.constant 448 : index
    %c0_60 = arith.constant 0 : index
    %91 = vector.load %arg14[%c448_59, %c0_60] : memref<576x128xf32, #tpu.memory_space<vmem>>, vector<64x128xf32>
    tpu.vector_store %arg14[%c448_59, %c0_60], %90 {strides = array<i32>} : memref<576x128xf32, #tpu.memory_space<vmem>>, vector<64x128xf32>,
    %92 = vector.extract_strided_slice %75 {offsets = [0, 1024], sizes = [64, 128], strides = [1, 1]} : vector<64x1152xf32> to vector<64x128xf32>
    %c512 = arith.constant 512 : index
    %c0_61 = arith.constant 0 : index
    %93 = vector.load %arg14[%c512, %c0_61] : memref<576x128xf32, #tpu.memory_space<vmem>>, vector<64x128xf32>
    tpu.vector_store %arg14[%c512, %c0_61], %92 {strides = array<i32>} : memref<576x128xf32, #tpu.memory_space<vmem>>, vector<64x128xf32>,
    %c0_62 = arith.constant 0 : index
    %c0_63 = arith.constant 0 : index
    %94 = vector.load %arg8[%c0_62, %c0_63] : memref<128x576xf32, #tpu.memory_space<vmem>>, vector<128x576xf32>
    %c0_64 = arith.constant 0 : index
    %c0_65 = arith.constant 0 : index
    %95 = vector.load %arg14[%c0_64, %c0_65] : memref<576x128xf32, #tpu.memory_space<vmem>>, vector<576x128xf32>
    %cst_66 = arith.constant dense<0.000000e+00> : vector<128x128xf32>
    %96 = tpu.matmul %94, %95, %cst_66 {dimension_numbers = #tpu.dot_dimension_numbers<[1], [0], [0], [1], [0, 0, 1, 1], [], []>} : vector<128x576xf32>, vector<576x128xf32>, vector<128x128xf32> -> vector<128x128xf32>
    %97 = vector.extract_strided_slice %96 {offsets = [0, 0], sizes = [128, 16], strides = [1, 1]} : vector<128x128xf32> to vector<128x16xf32>
    %c0_67 = arith.constant 0 : index
    %c0_68 = arith.constant 0 : index
    %98 = vector.load %arg9[%c0_67, %c0_68] : memref<128x1xf32, #tpu.memory_space<vmem>>, vector<128x1xf32>
    %c0_69 = arith.constant 0 : index
    %c0_70 = arith.constant 0 : index
    %99 = vector.load %arg10[%c0_69, %c0_70] : memref<128x1xf32, #tpu.memory_space<vmem>>, vector<128x1xf32>
    %cst_71 = arith.constant dense<0.000000e+00> : vector<128xf32>
    %100 = vector.multi_reduction <add>, %97, %cst_71 [1] : vector<128x16xf32> to vector<128xf32>
    %101 = vector.shape_cast %100 : vector<128xf32> to vector<128x1xf32>
    %102 = vector.extract_strided_slice %101 {offsets = [0, 0], sizes = [64, 1], strides = [1, 1]} : vector<128x1xf32> to vector<64x1xf32>
    %103 = vector.extract_strided_slice %101 {offsets = [64, 0], sizes = [64, 1], strides = [1, 1]} : vector<128x1xf32> to vector<64x1xf32>
    %104 = arith.addf %102, %103 : vector<64x1xf32>
    %105 = tpu.concatenate %104, %104 in 0 : vector<64x1xf32>, vector<64x1xf32> -> vector<128x1xf32>
    %cst_72 = arith.constant 3.125000e-02 : f32
    %106 = vector.broadcast %cst_72 : f32 to vector<128x1xf32>
    %107 = arith.mulf %105, %106 : vector<128x1xf32>
    %108 = vector.broadcast %107 : vector<128x1xf32> to vector<128x16xf32>
    %109 = arith.subf %97, %108 : vector<128x16xf32>
    %110 = arith.mulf %109, %109 : vector<128x16xf32>
    %cst_73 = arith.constant dense<0.000000e+00> : vector<128xf32>
    %111 = vector.multi_reduction <add>, %110, %cst_73 [1] : vector<128x16xf32> to vector<128xf32>
    %112 = vector.shape_cast %111 : vector<128xf32> to vector<128x1xf32>
    %113 = vector.extract_strided_slice %112 {offsets = [0, 0], sizes = [64, 1], strides = [1, 1]} : vector<128x1xf32> to vector<64x1xf32>
    %114 = vector.extract_strided_slice %112 {offsets = [64, 0], sizes = [64, 1], strides = [1, 1]} : vector<128x1xf32> to vector<64x1xf32>
    %115 = arith.addf %113, %114 : vector<64x1xf32>
    %116 = tpu.concatenate %115, %115 in 0 : vector<64x1xf32>, vector<64x1xf32> -> vector<128x1xf32>
    %cst_74 = arith.constant 3.125000e-02 : f32
    %117 = vector.broadcast %cst_74 : f32 to vector<128x1xf32>
    %118 = arith.mulf %116, %117 : vector<128x1xf32>
    %cst_75 = arith.constant 9.99999974E-6 : f32
    %119 = vector.broadcast %cst_75 : f32 to vector<128x1xf32>
    %120 = arith.addf %118, %119 : vector<128x1xf32>
    %121 = math.rsqrt %120 : vector<128x1xf32>
    %122 = vector.broadcast %121 : vector<128x1xf32> to vector<128x16xf32>
    %123 = arith.mulf %109, %122 : vector<128x16xf32>
    %124 = vector.broadcast %98 : vector<128x1xf32> to vector<128x16xf32>
    %125 = arith.mulf %123, %124 : vector<128x16xf32>
    %126 = vector.broadcast %99 : vector<128x1xf32> to vector<128x16xf32>
    %127 = arith.addf %125, %126 : vector<128x16xf32>
    %cst_76 = arith.constant 0.000000e+00 : f32
    %128 = vector.broadcast %cst_76 : f32 to vector<128x16xf32>
    %129 = arith.cmpf ogt, %127, %128 : vector<128x16xf32>
    %cst_77 = arith.constant 2.000000e-01 : f32
    %130 = vector.broadcast %cst_77 : f32 to vector<128x16xf32>
    %131 = arith.mulf %130, %127 : vector<128x16xf32>
    %132 = arith.select %129, %127, %131 : vector<128x16xi1>, vector<128x16xf32>
    %c0_78 = arith.constant 0 : index
    %c0_79 = arith.constant 0 : index
    %133 = vector.load %arg11[%c0_78, %c0_79] : memref<128x16xf32, #tpu.memory_space<vmem>>, vector<128x16xf32>
    %134 = arith.mulf %132, %133 : vector<128x16xf32>
    %cst_80 = arith.constant dense<0.000000e+00> : vector<128xf32>
    %135 = vector.multi_reduction <add>, %134, %cst_80 [1] : vector<128x16xf32> to vector<128xf32>
    %136 = vector.shape_cast %135 : vector<128xf32> to vector<128x1xf32>
    %cst_81 = arith.constant dense<0.000000e+00> : vector<1xf32>
    %137 = vector.multi_reduction <add>, %136, %cst_81 [0] : vector<128x1xf32> to vector<1xf32>
    %138 = vector.shape_cast %137 : vector<1xf32> to vector<1x1xf32>
    %cst_82 = arith.constant 0.000000e+00 : f32
    %139 = vector.broadcast %cst_82 : f32 to vector<1x1xf32>
    %140 = arith.subf %139, %138 : vector<1x1xf32>
    %141 = math.exp %140 : vector<1x1xf32>
    %cst_83 = arith.constant 1.000000e+00 : f32
    %142 = vector.broadcast %cst_83 : f32 to vector<1x1xf32>
    %143 = arith.addf %142, %141 : vector<1x1xf32>
    %cst_84 = arith.constant 1.000000e+00 : f32
    %144 = vector.broadcast %cst_84 : f32 to vector<1x1xf32>
    %145 = arith.divf %144, %143 : vector<1x1xf32>
    %146 = vector.shape_cast %145 : vector<1x1xf32> to vector<1x1x1xf32>
    %c0_85 = arith.constant 0 : index
    %c0_86 = arith.constant 0 : index
    %c0_87 = arith.constant 0 : index
    %147 = vector.load %arg12[%c0_85, %c0_86, %c0_87] : memref<1x1x1xf32, #tpu.memory_space<vmem>>, vector<1x1x1xf32>
    tpu.vector_store %arg12[%c0_85, %c0_86, %c0_87], %146 {strides = array<i32>} : memref<1x1x1xf32, #tpu.memory_space<vmem>>, vector<1x1x1xf32>,
    return
  }
  func.func @transform_0(%arg0: i32) -> (i32, i32, i32) {
    %c0_i32 = arith.constant 0 : i32
    %c0_i32_0 = arith.constant 0 : i32
    %c0_i32_1 = arith.constant 0 : i32
    return %arg0, %c0_i32, %c0_i32_0 : i32, i32, i32
  }
  func.func @transform_1(%arg0: i32) -> (i32, i32) {
    %c0_i32 = arith.constant 0 : i32
    %c0_i32_0 = arith.constant 0 : i32
    %c0_i32_1 = arith.constant 0 : i32
    return %c0_i32, %c0_i32_0 : i32, i32
  }
  func.func @transform_2(%arg0: i32) -> (i32, i32) {
    %c0_i32 = arith.constant 0 : i32
    %c0_i32_0 = arith.constant 0 : i32
    %c0_i32_1 = arith.constant 0 : i32
    return %c0_i32, %c0_i32_0 : i32, i32
  }
  func.func @transform_3(%arg0: i32) -> (i32, i32) {
    %c0_i32 = arith.constant 0 : i32
    %c0_i32_0 = arith.constant 0 : i32
    %c0_i32_1 = arith.constant 0 : i32
    return %c0_i32, %c0_i32_0 : i32, i32
  }
  func.func @transform_4(%arg0: i32) -> (i32, i32) {
    %c0_i32 = arith.constant 0 : i32
    %c0_i32_0 = arith.constant 0 : i32
    %c0_i32_1 = arith.constant 0 : i32
    return %c0_i32, %c0_i32_0 : i32, i32
  }
  func.func @transform_5(%arg0: i32) -> (i32, i32) {
    %c0_i32 = arith.constant 0 : i32
    %c0_i32_0 = arith.constant 0 : i32
    %c0_i32_1 = arith.constant 0 : i32
    return %c0_i32, %c0_i32_0 : i32, i32
  }
  func.func @transform_6(%arg0: i32) -> (i32, i32) {
    %c0_i32 = arith.constant 0 : i32
    %c0_i32_0 = arith.constant 0 : i32
    %c0_i32_1 = arith.constant 0 : i32
    return %c0_i32, %c0_i32_0 : i32, i32
  }
  func.func @transform_7(%arg0: i32) -> (i32, i32) {
    %c0_i32 = arith.constant 0 : i32
    %c0_i32_0 = arith.constant 0 : i32
    %c0_i32_1 = arith.constant 0 : i32
    return %c0_i32, %c0_i32_0 : i32, i32
  }
  func.func @transform_8(%arg0: i32) -> (i32, i32) {
    %c0_i32 = arith.constant 0 : i32
    %c0_i32_0 = arith.constant 0 : i32
    %c0_i32_1 = arith.constant 0 : i32
    return %c0_i32, %c0_i32_0 : i32, i32
  }
  func.func @transform_9(%arg0: i32) -> (i32, i32) {
    %c0_i32 = arith.constant 0 : i32
    %c0_i32_0 = arith.constant 0 : i32
    %c0_i32_1 = arith.constant 0 : i32
    return %c0_i32, %c0_i32_0 : i32, i32
  }
  func.func @transform_10(%arg0: i32) -> (i32, i32) {
    %c0_i32 = arith.constant 0 : i32
    %c0_i32_0 = arith.constant 0 : i32
    %c0_i32_1 = arith.constant 0 : i32
    return %c0_i32, %c0_i32_0 : i32, i32
  }
  func.func @transform_11(%arg0: i32) -> (i32, i32, i32) {
    %c0_i32 = arith.constant 0 : i32
    %c0_i32_0 = arith.constant 0 : i32
    %c0_i32_1 = arith.constant 0 : i32
    return %arg0, %c0_i32, %c0_i32_0 : i32, i32, i32
  }
}

</mosaic_0001>

<bundles_post_ra>
// kernel: forward.1
= control target key start
LH: loop header
LB: loop body
LE: loop exit
PB: predicated region body
PF: predicated region fallthrough
CT: control target
= control target key end

     0   :  { %s5596_s17 = smov 0   ;;  %s8262_s0 = inlined_call_operand.vmem [shape: f32[2,16,196], index: 0, kind: input, shape index: {}]   ;;  %s8263_s1 = inlined_call_operand.vmem [shape: f32[32,16], index: 1, kind: input, shape index: {}]   ;;  %s8264_s2 = inlined_call_operand.vmem [shape: f32[196,2048], index: 2, kind: input, shape index: {}]   ;;  %s8265_s3 = inlined_call_operand.vmem [shape: f32[64,512], index: 3, kind: input, shape index: {}]   ;;  %s8266_s4 = inlined_call_operand.vmem [shape: f32[64,1], index: 4, kind: input, shape index: {}]   ;;  %s8267_s5 = inlined_call_operand.vmem [shape: f32[64,1], index: 5, kind: input, shape index: {}]   ;;  %s8268_s6 = inlined_call_operand.vmem [shape: f32[49,1152], index: 6, kind: input, shape index: {}]   ;;  %s8269_s7 = inlined_call_operand.vmem [shape: f32[128,576], index: 7, kind: input, shape index: {}]   ;;  %s8270_s8 = inlined_call_operand.vmem [shape: f32[128,1], index: 8, kind: input, shape index: {}]   ;;  %s8271_s9 = inlined_call_operand.vmem [shape: f32[128,1], index: 9, kind: input, shape index: {}]   ;;  %s8272_s10 = inlined_call_operand.vmem [shape: f32[128,16], index: 10, kind: input, shape index: {}]   ;;  %s8273_s11 = inlined_call_operand.vmem [shape: f32[2,1,1], index: 11, kind: output, shape index: {}]  }
   0x1 LB: > { %s4382_s18 = sadd.s32 4294967295, %s5532_s17   ;;  %p4386_p0 = scmp.ge.s32.totalorder %s5532_s17, 1  ;;  %s5532_s17 = sphi %s5596_s17, %s21_s17  }
   0x2   : > { %p337_p1 = scmp.lt.s32.totalorder %s5532_s17, 3 }
   0x4   : > { %p338_p2 = pnand %p4386_p0, %p337_p1 }
   0x5   : > { %p375_p3 = scmp.lt.s32.totalorder (!%p338_p2), %s4382_s18, 1  ;;  %v5534_v0 = vmov (!%p338_p2), 0.0   ;;  %v518_v1 = vld [vmem:[%s8264_s2 + $0x8] sm:$0xff] (!%p338_p2)  ;;  %v517_v4 = vld [vmem:[%s8264_s2] sm:$0xff] (!%p338_p2)  ;;  %v520_v5 = vld [vmem:[%s8264_s2 + $0x18] sm:$0xff] (!%p338_p2)  ;;  %vm391_vm0 = vcmask (!%p338_p2), 130048  }
   0x6   : > { %341 = sbr.rel (%p338_p2) target bundleno = 2601 (0xa29), region = 64  ;;  %468 = vmatprep.mubr.f32.mxu0 (!%p338_p2), %v5534_v0  ;;  %v534_v2 = vld [vmem:[%s8264_s2 + $0x88] sm:$0xff] (!%p338_p2)  ;;  %v533_v6 = vld [vmem:[%s8264_s2 + $0x80] sm:$0xff] (!%p338_p2)  ;;  %v536_v7 = vld [vmem:[%s8264_s2 + $0x98] sm:$0xff] (!%p338_p2)  ;;  %vm930_vm1 = vcmask (!%p338_p2), 1043456   ;;  %vm917_vm4 = vcmask (!%p338_p2), 556032  }
   0x7   : > { %v4890_v3 = vpack.c.bf16 (!%p338_p2), %v534_v2, %v518_v1  ;;  %v4892_v8 = vpack.c.bf16 (!%p338_p2), %v533_v6, %v517_v4  ;;  %v550_v9 = vld [vmem:[%s8264_s2 + $0x108] sm:$0xff] (!%p338_p2)  ;;  %v519_v11 = vld [vmem:[%s8264_s2 + $0x10] sm:$0xff] (!%p338_p2)  ;;  %v549_v13 = vld [vmem:[%s8264_s2 + $0x100] sm:$0xff] (!%p338_p2)  ;;  %v4938_v21 = vpack.c.bf16 (!%p338_p2), %v536_v7, %v520_v5  ;;  %vm2077_vm11 = vcmask (!%p338_p2), 400384  }
   0x8   : > { %v566_v10 = vld [vmem:[%s8264_s2 + $0x188] sm:$0xff] (!%p338_p2)  ;;  %v565_v14 = vld [vmem:[%s8264_s2 + $0x180] sm:$0xff] (!%p338_p2)  ;;  %v535_v22 = vld [vmem:[%s8264_s2 + $0x90] sm:$0xff] (!%p338_p2)  ;;  %vm2389_vm12 = vcmask (!%p338_p2), 1040384  }
   0x9   : > { %4891 = vmatprep.subr.bf16.mxu1 (!%p338_p2), %v4890_v3  ;;  %v4894_v12 = vpack.c.bf16 (!%p338_p2), %v566_v10, %v550_v9  ;;  %v4896_v18 = vpack.c.bf16 (!%p338_p2), %v565_v14, %v549_v13  ;;  %v552_v23 = vld [vmem:[%s8264_s2 + $0x118] sm:$0xff] (!%p338_p2)  ;;  %v582_v26 = vld [vmem:[%s8264_s2 + $0x208] sm:$0xff] (!%p338_p2)  ;;  %v581_v29 = vld [vmem:[%s8264_s2 + $0x200] sm:$0xff] (!%p338_p2)  ;;  %v4940_v32 = vpack.c.bf16 (!%p338_p2), %v535_v22, %v519_v11 }
   0xa   : > { %4893 = vmatpush1.bf16.msra.mxu1 (!%p338_p2), %v4892_v8  ;;  %v568_v25 = vld [vmem:[%s8264_s2 + $0x198] sm:$0xff] (!%p338_p2)  ;;  %v598_v27 = vld [vmem:[%s8264_s2 + $0x288] sm:$0xff] (!%p338_p2)  ;;  %v597_v30 = vld [vmem:[%s8264_s2 + $0x280] sm:$0xff] (!%p338_p2) }
   0xb   : > { %4895 = vmatprep.subr.bf16.mxu1 (!%p338_p2), %v4894_v12  ;;  %v4898_v28 = vpack.c.bf16 (!%p338_p2), %v598_v27, %v582_v26  ;;  %v383_v31 = vld [vmem:[%s8263_s1] sm:$0xff] (!%p338_p2)  ;;  %v551_v33 = vld [vmem:[%s8264_s2 + $0x110] sm:$0xff] (!%p338_p2)  ;;  %v614_v34 = vld [vmem:[%s8264_s2 + $0x308] sm:$0xff] (!%p338_p2)  ;;  %v4942_v35 = vpack.c.bf16 (!%p338_p2), %v568_v25, %v552_v23  ;;  %v4900_v38 = vpack.c.bf16 (!%p338_p2), %v597_v30, %v581_v29 }
   0xc   : > { %v567_v36 = vld [vmem:[%s8264_s2 + $0x190] sm:$0xff] (!%p338_p2)  ;;  %v584_v37 = vld [vmem:[%s8264_s2 + $0x218] sm:$0xff] (!%p338_p2)  ;;  %v630_v39 = vld [vmem:[%s8264_s2 + $0x388] sm:$0xff] (!%p338_p2) }
   0xd   : > { %s8275_s18 = smov (!%p375_p3, %s4382_s18), 1  ;;  %v600_v40 = vld [vmem:[%s8264_s2 + $0x298] sm:$0xff]  ;;  %v4902_v41 = vpack.c.bf16 %v630_v39, %v614_v34  ;;  %v613_v42 = vld [vmem:[%s8264_s2 + $0x300] sm:$0xff]  ;;  %v646_v44 = vld [vmem:[%s8264_s2 + $0x408] sm:$0xff]  ;;  %v4944_v47 = vpack.c.bf16 %v567_v36, %v551_v33 }
   0xe   : > { %s4508_s29 = sshll.u32 %s8275_s18, 5  ;;  %4897 = vmatpush1.bf16.msra.mxu1 %v4896_v18  ;;  %v629_v43 = vld [vmem:[%s8264_s2 + $0x380] sm:$0xff]  ;;  %v662_v45 = vld [vmem:[%s8264_s2 + $0x488] sm:$0xff]  ;;  %v4946_v48 = vpack.c.bf16 %v600_v40, %v584_v37  ;;  %v583_v49 = vld [vmem:[%s8264_s2 + $0x210] sm:$0xff]  ;;  %s382_s19 = scalar_lea.vmem %s8273_s11, %s8275_s18 }
   0xf   : > { %s379_s21 = scalar_lea.vmem %s8262_s0, %s4508_s29  ;;  %4899 = vmatprep.subr.bf16.mxu1 %v4898_v28  ;;  %v384_v46 = vld [vmem:[%s8263_s1 + $0x8] sm:$0xff]  ;;  %v599_v50 = vld [vmem:[%s8264_s2 + $0x290] sm:$0xff]  ;;  %v616_v51 = vld [vmem:[%s8264_s2 + $0x318] sm:$0xff]  ;;  %v4904_v52 = vpack.c.bf16 %v629_v43, %v613_v42  ;;  %v4906_v54 = vpack.c.bf16 %v662_v45, %v646_v44 }
  0x10   : > { %v388_v15 = vld [vmem:[%s379_s21 + $0x8] sm:$0xff]  ;;  %v390_v16 = vld [vmem:[%s379_s21 + $0x18] sm:$0xff]  ;;  %v387_v17 = vld [vmem:[%s379_s21] sm:$0xff]  ;;  %v4948_v60 = vpack.c.bf16 %v599_v50, %v583_v49 }
  0x11   : > { %v4886_v19 = vpack.c.bf16 %v390_v16, %v388_v15  ;;  %v389_v20 = vld [vmem:[%s379_s21 + $0x10] sm:$0xff]  ;;  %v632_v53 = vld [vmem:[%s8264_s2 + $0x398] sm:$0xff]  ;;  %v645_v55 = vld [vmem:[%s8264_s2 + $0x400] sm:$0xff] }
  0x12   : > { %v4888_v24 = vpack.c.bf16 %v389_v20, %v387_v17  ;;  %4901 = vmatpush1.bf16.msra.mxu1 %v4900_v38  ;;  %v661_v56 = vld [vmem:[%s8264_s2 + $0x480] sm:$0xff]  ;;  %v678_v57 = vld [vmem:[%s8264_s2 + $0x508] sm:$0xff]  ;;  %v385_v59 = vld [vmem:[%s8263_s1 + $0x10] sm:$0xff]  ;;  %v4950_v61 = vpack.c.bf16 %v632_v53, %v616_v51 }
  0x13   : > { %4887 = vmatprep.subr.bf16.mxu0 %v4886_v19  ;;  %4903 = vmatprep.subr.bf16.mxu1 %v4902_v41  ;;  %v694_v58 = vld [vmem:[%s8264_s2 + $0x588] sm:$0xff]  ;;  %v615_v62 = vld [vmem:[%s8264_s2 + $0x310] sm:$0xff]  ;;  %v648_v1 = vld [vmem:[%s8264_s2 + $0x418] sm:$0xff]  ;;  %v4908_v2 = vpack.c.bf16 %v661_v56, %v645_v55 }
  0x14   : > { %4889 = vmatpush1.bf16.msra.mxu0 %v4888_v24  ;;  %v631_v63 = vld [vmem:[%s8264_s2 + $0x390] sm:$0xff]  ;;  %v664_v3 = vld [vmem:[%s8264_s2 + $0x498] sm:$0xff]  ;;  %v4910_v4 = vpack.c.bf16 %v694_v58, %v678_v57  ;;  %v677_v5 = vld [vmem:[%s8264_s2 + $0x500] sm:$0xff] }
  0x15   : > { %4939 = vmatprep.subr.bf16.mxu0 %v4938_v21  ;;  %v693_v6 = vld [vmem:[%s8264_s2 + $0x580] sm:$0xff]  ;;  %v710_v7 = vld [vmem:[%s8264_s2 + $0x608] sm:$0xff]  ;;  %v386_v9 = vld [vmem:[%s8263_s1 + $0x18] sm:$0xff]  ;;  %v4952_v10 = vpack.c.bf16 %v631_v63, %v615_v62  ;;  %v4954_v11 = vpack.c.bf16 %v664_v3, %v648_v1 }
  0x16   : > { %4905 = vmatpush1.bf16.msra.mxu1 %v4904_v52  ;;  %v726_v8 = vld [vmem:[%s8264_s2 + $0x688] sm:$0xff]  ;;  %v647_v12 = vld [vmem:[%s8264_s2 + $0x410] sm:$0xff]  ;;  %v680_v14 = vld [vmem:[%s8264_s2 + $0x518] sm:$0xff]  ;;  %v4912_v15 = vpack.c.bf16 %v693_v6, %v677_v5 }
  0x17   : > { %4389 = vmatmul.mubr.msk.f32.vlgmr.msra.gmra.mrb[0].mxu0 %vm391_vm0, %v383_v31  ;;  %4907 = vmatprep.subr.bf16.mxu1 %v4906_v54  ;;  %v663_v13 = vld [vmem:[%s8264_s2 + $0x490] sm:$0xff]  ;;  %v696_v16 = vld [vmem:[%s8264_s2 + $0x598] sm:$0xff]  ;;  %v4914_v17 = vpack.c.bf16 %v726_v8, %v710_v7  ;;  %v709_v18 = vld [vmem:[%s8264_s2 + $0x600] sm:$0xff] }
  0x18   : > { %474 = vmatprep.mubr.f32.mxu0 %v5534_v0  ;;  %4941 = vmatpush1.bf16.msra.mxu0 %v4940_v32  ;;  %v725_v19 = vld [vmem:[%s8264_s2 + $0x680] sm:$0xff]  ;;  %v742_v20 = vld [vmem:[%s8264_s2 + $0x708] sm:$0xff]  ;;  %v4956_v22 = vpack.c.bf16 %v663_v13, %v647_v12  ;;  %v4958_v23 = vpack.c.bf16 %v696_v16, %v680_v14  ;;  %v679_v24 = vld [vmem:[%s8264_s2 + $0x510] sm:$0xff] }
  0x19   : > { %4943 = vmatprep.subr.bf16.mxu0 %v4942_v35  ;;  %v758_v21 = vld [vmem:[%s8264_s2 + $0x788] sm:$0xff]  ;;  %v695_v25 = vld [vmem:[%s8264_s2 + $0x590] sm:$0xff]  ;;  %v712_v26 = vld [vmem:[%s8264_s2 + $0x618] sm:$0xff]  ;;  %v4916_v27 = vpack.c.bf16 %v725_v19, %v709_v18 }
  0x1a   : > { %4909 = vmatpush1.bf16.msra.mxu1 %v4908_v2  ;;  %v728_v28 = vld [vmem:[%s8264_s2 + $0x698] sm:$0xff]  ;;  %v4918_v29 = vpack.c.bf16 %v758_v21, %v742_v20  ;;  %v741_v30 = vld [vmem:[%s8264_s2 + $0x700] sm:$0xff]  ;;  %v774_v32 = vld [vmem:[%s8264_s2 + $0x808] sm:$0xff]  ;;  %v4960_v34 = vpack.c.bf16 %v695_v25, %v679_v24 }
  0x1b   : > { %4390 = vmatmul.mubr.msk.f32.gmra.mrb[2].mxu0 %vm391_vm0, %v384_v46  ;;  %4911 = vmatprep.subr.bf16.mxu1 %v4910_v4  ;;  %v757_v31 = vld [vmem:[%s8264_s2 + $0x780] sm:$0xff]  ;;  %v790_v33 = vld [vmem:[%s8264_s2 + $0x888] sm:$0xff]  ;;  %v4962_v35 = vpack.c.bf16 %v728_v28, %v712_v26  ;;  %v711_v36 = vld [vmem:[%s8264_s2 + $0x610] sm:$0xff] }
  0x1c   : > { %480 = vmatprep.mubr.f32.mxu0 %v5534_v0  ;;  %4945 = vmatpush1.bf16.msra.mxu0 %v4944_v47  ;;  %v727_v37 = vld [vmem:[%s8264_s2 + $0x690] sm:$0xff]  ;;  %v744_v38 = vld [vmem:[%s8264_s2 + $0x718] sm:$0xff]  ;;  %v4920_v39 = vpack.c.bf16 %v757_v31, %v741_v30  ;;  %v4922_v41 = vpack.c.bf16 %v790_v33, %v774_v32  ;;  %v773_v42 = vld [vmem:[%s8264_s2 + $0x800] sm:$0xff] }
  0x1d   : > { %4947 = vmatprep.subr.bf16.mxu0 %v4946_v48  ;;  %v760_v40 = vld [vmem:[%s8264_s2 + $0x798] sm:$0xff]  ;;  %v789_v43 = vld [vmem:[%s8264_s2 + $0x880] sm:$0xff]  ;;  %v806_v44 = vld [vmem:[%s8264_s2 + $0x908] sm:$0xff]  ;;  %v4964_v46 = vpack.c.bf16 %v727_v37, %v711_v36 }
  0x1e   : > { %4913 = vmatpush1.bf16.msra.mxu1 %v4912_v15  ;;  %v822_v45 = vld [vmem:[%s8264_s2 + $0x988] sm:$0xff]  ;;  %v4966_v47 = vpack.c.bf16 %v760_v40, %v744_v38  ;;  %v743_v48 = vld [vmem:[%s8264_s2 + $0x710] sm:$0xff]  ;;  %v776_v50 = vld [vmem:[%s8264_s2 + $0x818] sm:$0xff]  ;;  %v4924_v51 = vpack.c.bf16 %v789_v43, %v773_v42 }
  0x1f   : > { %4391 = vmatmul.mubr.msk.f32.gmra.mrb[4].mxu0 %vm391_vm0, %v385_v59  ;;  %4915 = vmatprep.subr.bf16.mxu1 %v4914_v17  ;;  %v759_v49 = vld [vmem:[%s8264_s2 + $0x790] sm:$0xff]  ;;  %v792_v52 = vld [vmem:[%s8264_s2 + $0x898] sm:$0xff]  ;;  %v4926_v53 = vpack.c.bf16 %v822_v45, %v806_v44  ;;  %v805_v54 = vld [vmem:[%s8264_s2 + $0x900] sm:$0xff] }
  0x20   : > { %486 = vmatprep.mubr.f32.mxu0 %v5534_v0  ;;  %4949 = vmatpush1.bf16.msra.mxu0 %v4948_v60  ;;  %v821_v55 = vld [vmem:[%s8264_s2 + $0x980] sm:$0xff]  ;;  %v838_v56 = vld [vmem:[%s8264_s2 + $0xa08] sm:$0xff]  ;;  %v4968_v58 = vpack.c.bf16 %v759_v49, %v743_v48  ;;  %v4970_v59 = vpack.c.bf16 %v792_v52, %v776_v50  ;;  %v775_v60 = vld [vmem:[%s8264_s2 + $0x810] sm:$0xff] }
  0x21   : > { %4951 = vmatprep.subr.bf16.mxu0 %v4950_v61  ;;  %v854_v57 = vld [vmem:[%s8264_s2 + $0xa88] sm:$0xff]  ;;  %v791_v61 = vld [vmem:[%s8264_s2 + $0x890] sm:$0xff]  ;;  %v808_v62 = vld [vmem:[%s8264_s2 + $0x918] sm:$0xff]  ;;  %v4928_v63 = vpack.c.bf16 %v821_v55, %v805_v54 }
  0x22   : > { %4917 = vmatpush1.bf16.msra.mxu1 %v4916_v27  ;;  %v824_v1 = vld [vmem:[%s8264_s2 + $0x998] sm:$0xff]  ;;  %v4930_v2 = vpack.c.bf16 %v854_v57, %v838_v56  ;;  %v837_v3 = vld [vmem:[%s8264_s2 + $0xa00] sm:$0xff]  ;;  %v870_v5 = vld [vmem:[%s8264_s2 + $0xb08] sm:$0xff]  ;;  %v4972_v7 = vpack.c.bf16 %v791_v61, %v775_v60 }
  0x23   : > { %4392 = vmatmul.mubr.msk.f32.gmra.mrb[6].mxu0 %vm391_vm0, %v386_v9  ;;  %4919 = vmatprep.subr.bf16.mxu1 %v4918_v29  ;;  %v853_v4 = vld [vmem:[%s8264_s2 + $0xa80] sm:$0xff]  ;;  %v886_v6 = vld [vmem:[%s8264_s2 + $0xb88] sm:$0xff]  ;;  %v4974_v8 = vpack.c.bf16 %v824_v1, %v808_v62  ;;  %v807_v9 = vld [vmem:[%s8264_s2 + $0x910] sm:$0xff] }
  0x24   : > { %4953 = vmatpush1.bf16.msra.mxu0 %v4952_v10  ;;  %v823_v10 = vld [vmem:[%s8264_s2 + $0x990] sm:$0xff]  ;;  %v840_v12 = vld [vmem:[%s8264_s2 + $0xa18] sm:$0xff]  ;;  %v4934_v14 = vpack.c.bf16 %v886_v6, %v870_v5  ;;  %v885_v24 = vld [vmem:[%s8264_s2 + $0xb80] sm:$0xff] }
  0x25   : > { %4955 = vmatprep.subr.bf16.mxu0 %v4954_v11  ;;  %v4932_v11 = vpack.c.bf16 %v853_v4, %v837_v3  ;;  %v856_v13 = vld [vmem:[%s8264_s2 + $0xa98] sm:$0xff]  ;;  %v4976_v15 = vpack.c.bf16 %v823_v10, %v807_v9  ;;  %v839_v17 = vld [vmem:[%s8264_s2 + $0xa10] sm:$0xff]  ;;  %v902_v29 = vld [vmem:[%s8264_s2 + $0xc08] sm:$0xf] }
  0x26   : > { %4921 = vmatpush1.bf16.msra.mxu1 %v4920_v39  ;;  %v4978_v16 = vpack.c.bf16 %v856_v13, %v840_v12  ;;  %v855_v18 = vld [vmem:[%s8264_s2 + $0xa90] sm:$0xff]  ;;  %v872_v19 = vld [vmem:[%s8264_s2 + $0xb18] sm:$0xff]  ;;  %v522_v31 = vld [vmem:[%s8264_s2 + $0x28] sm:$0xff] }
  0x27   : > { %4923 = vmatprep.subr.bf16.mxu1 %v4922_v41  ;;  %v888_v20 = vld [vmem:[%s8264_s2 + $0xb98] sm:$0xff]  ;;  %v4980_v21 = vpack.c.bf16 %v855_v18, %v839_v17  ;;  %v871_v25 = vld [vmem:[%s8264_s2 + $0xb10] sm:$0xff]  ;;  %v901_v32 = vld [vmem:[%s8264_s2 + $0xc00] sm:$0xf] }
  0x28   : > { %4957 = vmatpush1.bf16.msra.mxu0 %v4956_v22  ;;  %v4982_v22 = vpack.c.bf16 %v888_v20, %v872_v19  ;;  %v887_v27 = vld [vmem:[%s8264_s2 + $0xb90] sm:$0xff]  ;;  %v904_v30 = vld [vmem:[%s8264_s2 + $0xc18] sm:$0xf]  ;;  %v521_v39 = vld [vmem:[%s8264_s2 + $0x20] sm:$0xff] }
  0x29   : > { %4959 = vmatprep.subr.bf16.mxu0 %v4958_v23  ;;  %v869_v23 = vld [vmem:[%s8264_s2 + $0xb00] sm:$0xff]  ;;  %v4984_v28 = vpack.c.bf16 %v887_v27, %v871_v25  ;;  %v903_v33 = vld [vmem:[%s8264_s2 + $0xc10] sm:$0xf]  ;;  %v524_v36 = vld [vmem:[%s8264_s2 + $0x38] sm:$0xff] }
  0x2a   : > { %4925 = vmatpush1.bf16.msra.mxu1 %v4924_v51  ;;  %v4936_v26 = vpack.c.bf16 %v885_v24, %v869_v23  ;;  %v540_v37 = vld [vmem:[%s8264_s2 + $0xb8] sm:$0xff]  ;;  %v537_v40 = vld [vmem:[%s8264_s2 + $0xa0] sm:$0xff]  ;;  %v523_v42 = vld [vmem:[%s8264_s2 + $0x30] sm:$0xff] }
  0x2b   : > { %4927 = vmatprep.subr.bf16.mxu1 %v4926_v53  ;;  %v5034_v38 = vpack.c.bf16 %v540_v37, %v524_v36  ;;  %v539_v43 = vld [vmem:[%s8264_s2 + $0xb0] sm:$0xff]  ;;  %v554_v44 = vld [vmem:[%s8264_s2 + $0x128] sm:$0xff]  ;;  %v556_v48 = vld [vmem:[%s8264_s2 + $0x138] sm:$0xff]  ;;  %v4988_v51 = vpack.c.bf16 %v537_v40, %v521_v39 }
  0x2c   : > { %4961 = vmatpush1.bf16.msra.mxu0 %v4960_v34  ;;  %v538_v34 = vld [vmem:[%s8264_s2 + $0xa8] sm:$0xff]  ;;  %v572_v49 = vld [vmem:[%s8264_s2 + $0x1b8] sm:$0xff]  ;;  %v5036_v52 = vpack.c.bf16 %v539_v43, %v523_v42  ;;  %v553_v53 = vld [vmem:[%s8264_s2 + $0x120] sm:$0xff] }
  0x2d   : > { %4963 = vmatprep.subr.bf16.mxu0 %v4962_v35  ;;  %v4986_v35 = vpack.c.bf16 %v538_v34, %v522_v31  ;;  %v569_v54 = vld [vmem:[%s8264_s2 + $0x1a0] sm:$0xff]  ;;  %v555_v55 = vld [vmem:[%s8264_s2 + $0x130] sm:$0xff]  ;;  %v586_v61 = vld [vmem:[%s8264_s2 + $0x228] sm:$0xff] }
  0x2e   : > { %4929 = vmatpush1.bf16.msra.mxu1 %v4928_v63  ;;  %v571_v60 = vld [vmem:[%s8264_s2 + $0x1b0] sm:$0xff]  ;;  %v602_v62 = vld [vmem:[%s8264_s2 + $0x2a8] sm:$0xff]  ;;  %v588_v3 = vld [vmem:[%s8264_s2 + $0x238] sm:$0xff] }
  0x2f   : > { %4931 = vmatprep.subr.bf16.mxu1 %v4930_v2  ;;  %v604_v4 = vld [vmem:[%s8264_s2 + $0x2b8] sm:$0xff]  ;;  %v585_v9 = vld [vmem:[%s8264_s2 + $0x220] sm:$0xff]  ;;  %v618_v17 = vld [vmem:[%s8264_s2 + $0x328] sm:$0xff] }
  0x30   : > { %4965 = vmatpush1.bf16.msra.mxu0 %v4964_v46  ;;  %v601_v10 = vld [vmem:[%s8264_s2 + $0x2a0] sm:$0xff]  ;;  %v634_v18 = vld [vmem:[%s8264_s2 + $0x3a8] sm:$0xff]  ;;  %v635_v34 = vld [vmem:[%s8264_s2 + $0x3b0] sm:$0xff] }
  0x31   : > { %4967 = vmatprep.subr.bf16.mxu0 %v4966_v47  ;;  %v570_v47 = vld [vmem:[%s8264_s2 + $0x1a8] sm:$0xff]  ;;  %v4996_v25 = vpack.c.bf16 %v601_v10, %v585_v9  ;;  %v617_v27 = vld [vmem:[%s8264_s2 + $0x320] sm:$0xff]  ;;  %v652_v40 = vld [vmem:[%s8264_s2 + $0x438] sm:$0xff] }
  0x32   : > { %4933 = vmatpush1.bf16.msra.mxu1 %v4932_v11  ;;  %v587_v11 = vld [vmem:[%s8264_s2 + $0x230] sm:$0xff]  ;;  %v650_v37 = vld [vmem:[%s8264_s2 + $0x428] sm:$0xff]  ;;  %v713_v10 = vld [vmem:[%s8264_s2 + $0x620] sm:$0xff] }
  0x33   : > { %4935 = vmatprep.subr.bf16.mxu1 %v4934_v14  ;;  %v4994_v14 = vpack.c.bf16 %v602_v62, %v586_v61  ;;  %v666_v39 = vld [vmem:[%s8264_s2 + $0x4a8] sm:$0xff] }
  0x34   : > { %4969 = vmatpush1.bf16.msra.mxu0 %v4968_v58  ;;  %v4990_v58 = vpack.c.bf16 %v570_v47, %v554_v44 }
  0x35   : > { %4971 = vmatprep.subr.bf16.mxu0 %v4970_v59  ;;  %v5038_v59 = vpack.c.bf16 %v572_v49, %v556_v48  ;;  %v651_v48 = vld [vmem:[%s8264_s2 + $0x430] sm:$0xff] }
  0x36   : > { %4937 = vmatpush1.bf16.msra.mxu1 %v4936_v26  ;;  %v667_v49 = vld [vmem:[%s8264_s2 + $0x4b0] sm:$0xff] }
  0x37   : > { %4393 = vmatprep.subr.msk.mxu1 %vm930_vm1, %v902_v29 }
  0x38   : > { %4973 = vmatpush1.bf16.msra.mxu0 %v4972_v7  ;;  %v4992_v7 = vpack.c.bf16 %v569_v54, %v553_v53  ;;  %v698_v53 = vld [vmem:[%s8264_s2 + $0x5a8] sm:$0xff]  ;;  %v684_v54 = vld [vmem:[%s8264_s2 + $0x538] sm:$0xff] }
  0x39   : > { %4975 = vmatprep.subr.bf16.mxu0 %v4974_v8  ;;  %v5040_v8 = vpack.c.bf16 %v571_v60, %v555_v55  ;;  %v700_v55 = vld [vmem:[%s8264_s2 + $0x5b8] sm:$0xff]  ;;  %v697_v60 = vld [vmem:[%s8264_s2 + $0x5a0] sm:$0xff] }
  0x3a   : > { %4394 = vmatpush1.msk.msra.mxu1 %vm930_vm1, %v901_v32  ;;  %v633_v32 = vld [vmem:[%s8264_s2 + $0x3a0] sm:$0xff]  ;;  %v5054_v62 = vpack.c.bf16 %v700_v55, %v684_v54  ;;  %v811_v55 = vld [vmem:[%s8264_s2 + $0x930] sm:$0xff] }
  0x3b   : > { %4987 = vmatprep.subr.bf16.mxu1 %v4986_v35  ;;  %v5000_v43 = vpack.c.bf16 %v633_v32, %v617_v27  ;;  %v794_v32 = vld [vmem:[%s8264_s2 + $0x8a8] sm:$0xff] }
  0x3c   : > { %4977 = vmatpush1.bf16.msra.mxu0 %v4976_v15  ;;  %v5042_v15 = vpack.c.bf16 %v604_v4, %v588_v3  ;;  %v714_v3 = vld [vmem:[%s8264_s2 + $0x628] sm:$0xff] }
  0x3d   : > { %4979 = vmatprep.subr.bf16.mxu0 %v4978_v16  ;;  %v603_v16 = vld [vmem:[%s8264_s2 + $0x2b0] sm:$0xff]  ;;  %v730_v4 = vld [vmem:[%s8264_s2 + $0x6a8] sm:$0xff] }
  0x3e   : > { %v5044_v26 = vpack.c.bf16 %v603_v16, %v587_v11  ;;  %v729_v11 = vld [vmem:[%s8264_s2 + $0x6a0] sm:$0xff]  ;;  %v731_v16 = vld [vmem:[%s8264_s2 + $0x6b0] sm:$0xff] }
  0x40   : > { %4981 = vmatpush1.bf16.msra.mxu0 %v4980_v21  ;;  %v620_v21 = vld [vmem:[%s8264_s2 + $0x338] sm:$0xff] }
  0x41   : > { %4983 = vmatprep.subr.bf16.mxu0 %v4982_v22  ;;  %v636_v22 = vld [vmem:[%s8264_s2 + $0x3b8] sm:$0xff] }
  0x42   : > { %v5046_v31 = vpack.c.bf16 %v636_v22, %v620_v21  ;;  %v5012_v21 = vpack.c.bf16 %v729_v11, %v713_v10  ;;  %v890_v10 = vld [vmem:[%s8264_s2 + $0xba8] sm:$0xff]  ;;  %v876_v11 = vld [vmem:[%s8264_s2 + $0xb38] sm:$0xff] }
  0x44   : > { %4985 = vmatpush1.bf16.msra.mxu0 %v4984_v28 }
  0x45   : > { %4399 = vmatprep.subr.msk.mxu0 %vm930_vm1, %v904_v30  ;;  %v4998_v30 = vpack.c.bf16 %v634_v18, %v618_v17  ;;  %v746_v17 = vld [vmem:[%s8264_s2 + $0x728] sm:$0xff] }
  0x46   : > { %v762_v18 = vld [vmem:[%s8264_s2 + $0x7a8] sm:$0xff] }
  0x48   : > { %4400 = vmatpush1.msk.msra.mxu0 %vm930_vm1, %v903_v33  ;;  %v619_v33 = vld [vmem:[%s8264_s2 + $0x330] sm:$0xff] }
  0x49   : > { %5035 = vmatprep.subr.bf16.mxu0 %v5034_v38  ;;  %v5048_v44 = vpack.c.bf16 %v635_v34, %v619_v33  ;;  %v780_v33 = vld [vmem:[%s8264_s2 + $0x838] sm:$0xff] }
  0x4a   : > { %v796_v34 = vld [vmem:[%s8264_s2 + $0x8b8] sm:$0xff] }
  0xea   : > { %v470_v41 = vpop.f32.mrb[0].mxu0 }
  0xeb   : > { %v501_v45 = vmul.f32 0.2, %v470_v41  ;;  %v472_v46 = vpop.f32.mrb[1].mxu0  ;;  %vm493_vm2 = vcmp.gt.f32.partialorder %v470_v41, 0.0 }
  0xec   : > { %vm494_vm3 = vcmp.gt.f32.partialorder %v472_v46, 0.0  ;;  %v502_v50 = vmul.f32 0.2, %v472_v46 }
  0xed   : > { %v5991_v63 = vsel %vm493_vm2, %v470_v41, %v501_v45  ;;  %v668_v41 = vld [vmem:[%s8264_s2 + $0x4b8] sm:$0xff]  ;;  %v649_v45 = vld [vmem:[%s8264_s2 + $0x420] sm:$0xff] }
  0xee   : > { %v5979_v56 = vsel %vm494_vm3, %v472_v46, %v502_v50  ;;  %v476_v57 = vpop.f32.mrb[2].mxu0  ;;  %v665_v46 = vld [vmem:[%s8264_s2 + $0x4a0] sm:$0xff]  ;;  %v682_v50 = vld [vmem:[%s8264_s2 + $0x528] sm:$0xff] }
  0xef   : > { %vm495_vm5 = vcmp.gt.f32.partialorder %v476_v57, 0.0  ;;  %v503_v1 = vmul.f32 0.2, %v476_v57  ;;  %v478_v2 = vpop.f32.mrb[3].mxu0  ;;  %4395 = vmatprep.mubr.msk.f32.mxu1 %vm917_vm4, %v5979_v56  ;;  %4401 = vmatprep.mubr.msk.f32.mxu0 %vm917_vm4, %v5979_v56  ;;  %v5006_v61 = vpack.c.bf16 %v698_v53, %v682_v50 }
  0xf0   : > { %vm496_vm6 = vcmp.gt.f32.partialorder %v478_v2, 0.0  ;;  %v504_v5 = vmul.f32 0.2, %v478_v2  ;;  %1044 = vmatmul.mubr.f32.vlgmr.msra.gmra.mrb[0].mxu1 %v5991_v63  ;;  %1133 = vmatmul.mubr.f32.vlgmr.msra.gmra.mrb[8].mxu0 %v5991_v63 }
  0xf1   : > { %v6005_v6 = vsel %vm495_vm5, %v476_v57, %v503_v1  ;;  %4989 = vmatpush1.bf16.msra.mxu1 %v4988_v51  ;;  %5037 = vmatpush1.bf16.msra.mxu0 %v5036_v52  ;;  %v5002_v51 = vpack.c.bf16 %v666_v39, %v650_v37  ;;  %v5050_v52 = vpack.c.bf16 %v668_v41, %v652_v40  ;;  %v683_v1 = vld [vmem:[%s8264_s2 + $0x530] sm:$0xff]  ;;  %v777_v37 = vld [vmem:[%s8264_s2 + $0x820] sm:$0xff] }
  0xf2   : > { %v6016_v12 = vsel %vm496_vm6, %v478_v2, %v504_v5  ;;  %v482_v13 = vpop.f32.mrb[4].mxu0  ;;  %4991 = vmatprep.subr.bf16.mxu1 %v4990_v58  ;;  %5039 = vmatprep.subr.bf16.mxu0 %v5038_v59  ;;  %v5004_v57 = vpack.c.bf16 %v665_v46, %v649_v45  ;;  %v5052_v58 = vpack.c.bf16 %v667_v49, %v651_v48  ;;  %v681_v59 = vld [vmem:[%s8264_s2 + $0x520] sm:$0xff]  ;;  %v699_v2 = vld [vmem:[%s8264_s2 + $0x5b0] sm:$0xff]  ;;  %v716_v5 = vld [vmem:[%s8264_s2 + $0x638] sm:$0xff]  ;;  %vm3198_vm6 = vcmask 523264  }
  0xf3   : > { %vm497_vm7 = vcmp.gt.f32.partialorder %v482_v13, 0.0  ;;  %v505_v19 = vmul.f32 0.2, %v482_v13  ;;  %v484_v20 = vpop.f32.mrb[5].mxu0  ;;  %4396 = vmatprep.mubr.msk.f32.mxu1 %vm917_vm4, %v6016_v12  ;;  %4402 = vmatprep.mubr.msk.f32.mxu0 %vm917_vm4, %v6016_v12  ;;  %v5056_v9 = vpack.c.bf16 %v699_v2, %v683_v1  ;;  %v5066_v40 = vpack.c.bf16 %v796_v34, %v780_v33  ;;  %v779_v41 = vld [vmem:[%s8264_s2 + $0x830] sm:$0xff]  ;;  %v826_v45 = vld [vmem:[%s8264_s2 + $0x9a8] sm:$0xff] }
  0xf4   : > { %vm498_vm8 = vcmp.gt.f32.partialorder %v484_v20, 0.0  ;;  %v506_v23 = vmul.f32 0.2, %v484_v20  ;;  %1050 = vmatmul.mubr.f32.gmra.mrb[2].mxu1 %v6005_v6  ;;  %1139 = vmatmul.mubr.f32.gmra.mrb[10].mxu0 %v6005_v6  ;;  %v812_v46 = vld [vmem:[%s8264_s2 + $0x938] sm:$0xff]  ;;  %v841_v2 = vld [vmem:[%s8264_s2 + $0xa20] sm:$0xff] }
  0xf5   : > { %v6039_v24 = vsel %vm497_vm7, %v482_v13, %v505_v19  ;;  %4993 = vmatpush1.bf16.msra.mxu1 %v4992_v7  ;;  %5041 = vmatpush1.bf16.msra.mxu0 %v5040_v8  ;;  %v732_v7 = vld [vmem:[%s8264_s2 + $0x6b8] sm:$0xff]  ;;  %v5008_v8 = vpack.c.bf16 %v697_v60, %v681_v59  ;;  %v5010_v13 = vpack.c.bf16 %v730_v4, %v714_v3  ;;  %v858_v59 = vld [vmem:[%s8264_s2 + $0xaa8] sm:$0xff]  ;;  %v857_v3 = vld [vmem:[%s8264_s2 + $0xaa0] sm:$0xff] }
  0xf6   : > { %v6044_v28 = vsel %vm498_vm8, %v484_v20, %v506_v23  ;;  %v488_v29 = vpop.f32.mrb[6].mxu0  ;;  %4995 = vmatprep.subr.bf16.mxu1 %v4994_v14  ;;  %5043 = vmatprep.subr.bf16.mxu0 %v5042_v15  ;;  %v5058_v14 = vpack.c.bf16 %v732_v7, %v716_v5  ;;  %v715_v15 = vld [vmem:[%s8264_s2 + $0x630] sm:$0xff]  ;;  %v748_v19 = vld [vmem:[%s8264_s2 + $0x738] sm:$0xff]  ;;  %v745_v23 = vld [vmem:[%s8264_s2 + $0x720] sm:$0xff] }
  0xf7   : > { %vm499_vm9 = vcmp.gt.f32.partialorder %v488_v29, 0.0  ;;  %v507_v35 = vmul.f32 0.2, %v488_v29  ;;  %v490_v36 = vpop.f32.mrb[7].mxu0  ;;  %4397 = vmatprep.mubr.msk.f32.mxu1 %vm917_vm4, %v6044_v28  ;;  %4403 = vmatprep.mubr.msk.f32.mxu0 %vm917_vm4, %v6044_v28  ;;  %v764_v20 = vld [vmem:[%s8264_s2 + $0x7b8] sm:$0xff]  ;;  %v5060_v22 = vpack.c.bf16 %v731_v16, %v715_v15  ;;  %v843_v7 = vld [vmem:[%s8264_s2 + $0xa30] sm:$0xff] }
  0xf8   : > { %vm500_vm10 = vcmp.gt.f32.partialorder %v490_v36, 0.0  ;;  %v508_v38 = vmul.f32 0.2, %v490_v36  ;;  %1056 = vmatmul.mubr.f32.gmra.mrb[4].mxu1 %v6039_v24  ;;  %1145 = vmatmul.mubr.f32.gmra.mrb[12].mxu0 %v6039_v24  ;;  %v5062_v27 = vpack.c.bf16 %v764_v20, %v748_v19  ;;  %v828_v48 = vld [vmem:[%s8264_s2 + $0x9b8] sm:$0xff]  ;;  %v873_v16 = vld [vmem:[%s8264_s2 + $0xb20] sm:$0xff]  ;;  %v875_v20 = vld [vmem:[%s8264_s2 + $0xb30] sm:$0xff] }
  0xf9   : > { %v6073_v42 = vsel %vm499_vm9, %v488_v29, %v507_v35  ;;  %4997 = vmatpush1.bf16.msra.mxu1 %v4996_v25  ;;  %5045 = vmatpush1.bf16.msra.mxu0 %v5044_v26  ;;  %v761_v25 = vld [vmem:[%s8264_s2 + $0x7a0] sm:$0xff]  ;;  %v5014_v26 = vpack.c.bf16 %v762_v18, %v746_v17  ;;  %v747_v29 = vld [vmem:[%s8264_s2 + $0x730] sm:$0xff]  ;;  %v5070_v54 = vpack.c.bf16 %v828_v48, %v812_v46  ;;  %v844_v60 = vld [vmem:[%s8264_s2 + $0xa38] sm:$0xff] }
  0xfa   : > { %v6081_v47 = vsel %vm500_vm10, %v490_v36, %v508_v38  ;;  %4999 = vmatprep.subr.bf16.mxu1 %v4998_v30  ;;  %5047 = vmatprep.subr.bf16.mxu0 %v5046_v31  ;;  %v763_v30 = vld [vmem:[%s8264_s2 + $0x7b0] sm:$0xff]  ;;  %v778_v31 = vld [vmem:[%s8264_s2 + $0x828] sm:$0xff]  ;;  %v5016_v35 = vpack.c.bf16 %v761_v25, %v745_v23  ;;  %v793_v38 = vld [vmem:[%s8264_s2 + $0x8a0] sm:$0xff] }
  0xfb   : > { %4398 = vmatprep.mubr.msk.f32.mxu1 %vm917_vm4, %v6081_v47  ;;  %4404 = vmatprep.mubr.msk.f32.mxu0 %vm917_vm4, %v6081_v47  ;;  %v5064_v36 = vpack.c.bf16 %v763_v30, %v747_v29  ;;  %v5018_v39 = vpack.c.bf16 %v794_v32, %v778_v31  ;;  %v5020_v49 = vpack.c.bf16 %v793_v38, %v777_v37  ;;  %v889_v19 = vld [vmem:[%s8264_s2 + $0xba0] sm:$0xff]  ;;  %v906_v25 = vld [vmem:[%s8264_s2 + $0xc28] sm:$0xf]  ;;  %v528_v30 = vld [vmem:[%s8264_s2 + $0x58] sm:$0xff] }
  0xfc   : > { %1062 = vmatmul.mubr.f32.gmra.mrb[6].mxu1 %v6073_v42  ;;  %1151 = vmatmul.mubr.f32.gmra.mrb[14].mxu0 %v6073_v42  ;;  %v542_v29 = vld [vmem:[%s8264_s2 + $0xc8] sm:$0xff]  ;;  %v544_v31 = vld [vmem:[%s8264_s2 + $0xd8] sm:$0xff]  ;;  %v905_v32 = vld [vmem:[%s8264_s2 + $0xc20] sm:$0xf] }
  0xfd   : > { %5001 = vmatpush1.bf16.msra.mxu1 %v5000_v43  ;;  %5049 = vmatpush1.bf16.msra.mxu0 %v5048_v44  ;;  %v795_v43 = vld [vmem:[%s8264_s2 + $0x8b0] sm:$0xff]  ;;  %v810_v44 = vld [vmem:[%s8264_s2 + $0x928] sm:$0xff]  ;;  %v525_v34 = vld [vmem:[%s8264_s2 + $0x40] sm:$0xff] }
  0xfe   : > { %4407 = vmatprep.mubr.msk.f32.mxu1 %vm917_vm4, %v5979_v56  ;;  %4413 = vmatprep.mubr.msk.f32.mxu0 %vm917_vm4, %v5979_v56  ;;  %v5068_v50 = vpack.c.bf16 %v795_v43, %v779_v41  ;;  %v5022_v53 = vpack.c.bf16 %v826_v45, %v810_v44  ;;  %v907_v33 = vld [vmem:[%s8264_s2 + $0xc30] sm:$0xf]  ;;  %v574_v41 = vld [vmem:[%s8264_s2 + $0x1c8] sm:$0xff]  ;;  %v560_v43 = vld [vmem:[%s8264_s2 + $0x158] sm:$0xff] }
  0xff   : > { %5003 = vmatprep.subr.bf16.mxu1 %v5002_v51  ;;  %5051 = vmatprep.subr.bf16.mxu0 %v5050_v52  ;;  %v809_v51 = vld [vmem:[%s8264_s2 + $0x920] sm:$0xff]  ;;  %v543_v37 = vld [vmem:[%s8264_s2 + $0xd0] sm:$0xff]  ;;  %v576_v44 = vld [vmem:[%s8264_s2 + $0x1d8] sm:$0xff] }
 0x100   : > { %v825_v52 = vld [vmem:[%s8264_s2 + $0x9a0] sm:$0xff] }
 0x101   : > { %5005 = vmatpush1.bf16.msra.mxu1 %v5004_v57  ;;  %5053 = vmatpush1.bf16.msra.mxu0 %v5052_v58  ;;  %v827_v57 = vld [vmem:[%s8264_s2 + $0x9b0] sm:$0xff]  ;;  %v842_v58 = vld [vmem:[%s8264_s2 + $0xa28] sm:$0xff]  ;;  %v557_v48 = vld [vmem:[%s8264_s2 + $0x140] sm:$0xff] }
 0x102   : > { %5007 = vmatprep.subr.bf16.mxu1 %v5006_v61  ;;  %5055 = vmatprep.subr.bf16.mxu0 %v5054_v62  ;;  %v860_v61 = vld [vmem:[%s8264_s2 + $0xab8] sm:$0xff]  ;;  %v5024_v62 = vpack.c.bf16 %v825_v52, %v809_v51  ;;  %v5072_v1 = vpack.c.bf16 %v827_v57, %v811_v55  ;;  %v5026_v4 = vpack.c.bf16 %v858_v59, %v842_v58  ;;  %v575_v51 = vld [vmem:[%s8264_s2 + $0x1d0] sm:$0xff]  ;;  %v606_v55 = vld [vmem:[%s8264_s2 + $0x2c8] sm:$0xff] }
 0x103   : > { %v5074_v5 = vpack.c.bf16 %v860_v61, %v844_v60  ;;  %v592_v57 = vld [vmem:[%s8264_s2 + $0x258] sm:$0xff]  ;;  %v589_v61 = vld [vmem:[%s8264_s2 + $0x240] sm:$0xff] }
 0x104   : > { %v608_v58 = vld [vmem:[%s8264_s2 + $0x2d8] sm:$0xff] }
 0x105   : > { %5009 = vmatpush1.bf16.msra.mxu1 %v5008_v8  ;;  %5057 = vmatpush1.bf16.msra.mxu0 %v5056_v9  ;;  %v859_v8 = vld [vmem:[%s8264_s2 + $0xab0] sm:$0xff]  ;;  %v874_v9 = vld [vmem:[%s8264_s2 + $0xb28] sm:$0xff] }
 0x106   : > { %5011 = vmatprep.subr.bf16.mxu1 %v5010_v13  ;;  %5059 = vmatprep.subr.bf16.mxu0 %v5058_v14  ;;  %v892_v13 = vld [vmem:[%s8264_s2 + $0xbb8] sm:$0xff]  ;;  %v5028_v14 = vpack.c.bf16 %v857_v3, %v841_v2  ;;  %v5076_v15 = vpack.c.bf16 %v859_v8, %v843_v7  ;;  %v5030_v17 = vpack.c.bf16 %v890_v10, %v874_v9  ;;  %v607_v2 = vld [vmem:[%s8264_s2 + $0x2d0] sm:$0xff]  ;;  %v638_v7 = vld [vmem:[%s8264_s2 + $0x3c8] sm:$0xff] }
 0x107   : > { %v5078_v18 = vpack.c.bf16 %v892_v13, %v876_v11  ;;  %v624_v8 = vld [vmem:[%s8264_s2 + $0x358] sm:$0xff]  ;;  %v621_v13 = vld [vmem:[%s8264_s2 + $0x340] sm:$0xff] }
 0x108   : > { %v640_v9 = vld [vmem:[%s8264_s2 + $0x3d8] sm:$0xff] }
 0x109   : > { %5013 = vmatpush1.bf16.msra.mxu1 %v5012_v21  ;;  %5061 = vmatpush1.bf16.msra.mxu0 %v5060_v22  ;;  %v891_v21 = vld [vmem:[%s8264_s2 + $0xbb0] sm:$0xff]  ;;  %v5032_v22 = vpack.c.bf16 %v889_v19, %v873_v16  ;;  %v5142_v19 = vpack.c.bf16 %v640_v9, %v624_v8 }
 0x10a   : > { %5015 = vmatprep.subr.bf16.mxu1 %v5014_v26  ;;  %5063 = vmatprep.subr.bf16.mxu0 %v5062_v27  ;;  %v5080_v23 = vpack.c.bf16 %v891_v21, %v875_v20  ;;  %v908_v26 = vld [vmem:[%s8264_s2 + $0xc38] sm:$0xf]  ;;  %v526_v27 = vld [vmem:[%s8264_s2 + $0x48] sm:$0xff]  ;;  %v639_v16 = vld [vmem:[%s8264_s2 + $0x3d0] sm:$0xff] }
 0x10b   : > { %v5082_v38 = vpack.c.bf16 %v542_v29, %v526_v27  ;;  %v670_v20 = vld [vmem:[%s8264_s2 + $0x4c8] sm:$0xff]  ;;  %v656_v21 = vld [vmem:[%s8264_s2 + $0x458] sm:$0xff]  ;;  %v669_v27 = vld [vmem:[%s8264_s2 + $0x4c0] sm:$0xff] }
 0x10c   : > { %v751_v9 = vld [vmem:[%s8264_s2 + $0x750] sm:$0xff] }
 0x10d   : > { %5017 = vmatpush1.bf16.msra.mxu1 %v5016_v35  ;;  %5065 = vmatpush1.bf16.msra.mxu0 %v5064_v36  ;;  %v541_v35 = vld [vmem:[%s8264_s2 + $0xc0] sm:$0xff]  ;;  %v527_v36 = vld [vmem:[%s8264_s2 + $0x50] sm:$0xff] }
 0x10e   : > { %5019 = vmatprep.subr.bf16.mxu1 %v5018_v39  ;;  %5067 = vmatprep.subr.bf16.mxu0 %v5066_v40  ;;  %v5130_v39 = vpack.c.bf16 %v544_v31, %v528_v30  ;;  %v558_v40 = vld [vmem:[%s8264_s2 + $0x148] sm:$0xff]  ;;  %v5084_v45 = vpack.c.bf16 %v541_v35, %v525_v34  ;;  %v5132_v46 = vpack.c.bf16 %v543_v37, %v527_v36  ;;  %v655_v31 = vld [vmem:[%s8264_s2 + $0x450] sm:$0xff]  ;;  %v688_v35 = vld [vmem:[%s8264_s2 + $0x558] sm:$0xff] }
 0x10f   : > { %v5086_v52 = vpack.c.bf16 %v574_v41, %v558_v40  ;;  %v702_v34 = vld [vmem:[%s8264_s2 + $0x5c8] sm:$0xff]  ;;  %v704_v36 = vld [vmem:[%s8264_s2 + $0x5d8] sm:$0xff]  ;;  %v701_v40 = vld [vmem:[%s8264_s2 + $0x5c0] sm:$0xff] }
 0x111   : > { %5021 = vmatpush1.bf16.msra.mxu1 %v5020_v49  ;;  %5069 = vmatpush1.bf16.msra.mxu0 %v5068_v50  ;;  %v573_v49 = vld [vmem:[%s8264_s2 + $0x1c0] sm:$0xff]  ;;  %v559_v50 = vld [vmem:[%s8264_s2 + $0x150] sm:$0xff] }
 0x112   : > { %5023 = vmatprep.subr.bf16.mxu1 %v5022_v53  ;;  %5071 = vmatprep.subr.bf16.mxu0 %v5070_v54  ;;  %v5134_v53 = vpack.c.bf16 %v576_v44, %v560_v43  ;;  %v590_v54 = vld [vmem:[%s8264_s2 + $0x248] sm:$0xff]  ;;  %v5088_v59 = vpack.c.bf16 %v573_v49, %v557_v48  ;;  %v5136_v60 = vpack.c.bf16 %v575_v51, %v559_v50  ;;  %v687_v44 = vld [vmem:[%s8264_s2 + $0x550] sm:$0xff]  ;;  %v720_v49 = vld [vmem:[%s8264_s2 + $0x658] sm:$0xff] }
 0x113   : > { %v5090_v3 = vpack.c.bf16 %v606_v55, %v590_v54  ;;  %v5150_v43 = vpack.c.bf16 %v704_v36, %v688_v35  ;;  %v734_v48 = vld [vmem:[%s8264_s2 + $0x6c8] sm:$0xff]  ;;  %v736_v50 = vld [vmem:[%s8264_s2 + $0x6d8] sm:$0xff]  ;;  %v733_v54 = vld [vmem:[%s8264_s2 + $0x6c0] sm:$0xff] }
 0x114   : > { %v815_v36 = vld [vmem:[%s8264_s2 + $0x950] sm:$0xff] }
 0x115   : > { %5025 = vmatpush1.bf16.msra.mxu1 %v5024_v62  ;;  %5073 = vmatpush1.bf16.msra.mxu0 %v5072_v1  ;;  %v605_v62 = vld [vmem:[%s8264_s2 + $0x2c0] sm:$0xff]  ;;  %v591_v1 = vld [vmem:[%s8264_s2 + $0x250] sm:$0xff] }
 0x116   : > { %5027 = vmatprep.subr.bf16.mxu1 %v5026_v4  ;;  %5075 = vmatprep.subr.bf16.mxu0 %v5074_v5  ;;  %v5138_v4 = vpack.c.bf16 %v608_v58, %v592_v57  ;;  %v622_v5 = vld [vmem:[%s8264_s2 + $0x348] sm:$0xff]  ;;  %v5092_v10 = vpack.c.bf16 %v605_v62, %v589_v61  ;;  %v5140_v11 = vpack.c.bf16 %v607_v2, %v591_v1  ;;  %v719_v58 = vld [vmem:[%s8264_s2 + $0x650] sm:$0xff]  ;;  %v752_v62 = vld [vmem:[%s8264_s2 + $0x758] sm:$0xff] }
 0x117   : > { %v5154_v57 = vpack.c.bf16 %v736_v50, %v720_v49  ;;  %v766_v61 = vld [vmem:[%s8264_s2 + $0x7c8] sm:$0xff]  ;;  %v768_v1 = vld [vmem:[%s8264_s2 + $0x7d8] sm:$0xff]  ;;  %v847_v50 = vld [vmem:[%s8264_s2 + $0xa50] sm:$0xff] }
 0x118   : > { %v5158_v8 = vpack.c.bf16 %v768_v1, %v752_v62  ;;  %v893_v62 = vld [vmem:[%s8264_s2 + $0xbc0] sm:$0xff]  ;;  %v879_v1 = vld [vmem:[%s8264_s2 + $0xb50] sm:$0xff] }
 0x119   : > { %5029 = vmatpush1.bf16.msra.mxu1 %v5028_v14  ;;  %5077 = vmatpush1.bf16.msra.mxu0 %v5076_v15  ;;  %v637_v14 = vld [vmem:[%s8264_s2 + $0x3c0] sm:$0xff]  ;;  %v623_v15 = vld [vmem:[%s8264_s2 + $0x350] sm:$0xff] }
 0x11a   : > { %5031 = vmatprep.subr.bf16.mxu1 %v5030_v17  ;;  %5079 = vmatprep.subr.bf16.mxu0 %v5078_v18  ;;  %v654_v17 = vld [vmem:[%s8264_s2 + $0x448] sm:$0xff]  ;;  %v5094_v18 = vpack.c.bf16 %v638_v7, %v622_v5  ;;  %v765_v5 = vld [vmem:[%s8264_s2 + $0x7c0] sm:$0xff] }
 0x11b   : > { %v5098_v29 = vpack.c.bf16 %v670_v20, %v654_v17 }
 0x11d   : > { %5033 = vmatpush1.bf16.msra.mxu1 %v5032_v22  ;;  %5081 = vmatpush1.bf16.msra.mxu0 %v5080_v23  ;;  %v672_v22 = vld [vmem:[%s8264_s2 + $0x4d8] sm:$0xff]  ;;  %v5096_v23 = vpack.c.bf16 %v637_v14, %v621_v13  ;;  %v798_v13 = vld [vmem:[%s8264_s2 + $0x8c8] sm:$0xff] }
 0x11e   : > { %4405 = vmatprep.subr.msk.mxu1 %vm930_vm1, %v906_v25  ;;  %4411 = vmatprep.subr.msk.mxu0 %vm930_vm1, %v908_v26  ;;  %v5144_v25 = vpack.c.bf16 %v639_v16, %v623_v15  ;;  %v653_v26 = vld [vmem:[%s8264_s2 + $0x440] sm:$0xff]  ;;  %v5146_v30 = vpack.c.bf16 %v672_v22, %v656_v21  ;;  %v784_v14 = vld [vmem:[%s8264_s2 + $0x858] sm:$0xff]  ;;  %v783_v22 = vld [vmem:[%s8264_s2 + $0x850] sm:$0xff] }
 0x11f   : > { %v5100_v37 = vpack.c.bf16 %v669_v27, %v653_v26  ;;  %v800_v15 = vld [vmem:[%s8264_s2 + $0x8d8] sm:$0xff]  ;;  %v830_v26 = vld [vmem:[%s8264_s2 + $0x9c8] sm:$0xff] }
 0x120   : > { %v5162_v21 = vpack.c.bf16 %v800_v15, %v784_v14  ;;  %v816_v27 = vld [vmem:[%s8264_s2 + $0x958] sm:$0xff]  ;;  %v911_v14 = vld [vmem:[%s8264_s2 + $0xc50] sm:$0xf]  ;;  %v529_v15 = vld [vmem:[%s8264_s2 + $0x60] sm:$0xff] }
 0x121   : > { %4406 = vmatpush1.msk.msra.mxu1 %vm930_vm1, %v905_v32  ;;  %4412 = vmatpush1.msk.msra.mxu0 %vm930_vm1, %v907_v33  ;;  %v671_v32 = vld [vmem:[%s8264_s2 + $0x4d0] sm:$0xff]  ;;  %v686_v33 = vld [vmem:[%s8264_s2 + $0x548] sm:$0xff] }
 0x122   : > { %1222 = vmatmul.mubr.f32.vlgmr.msra.gmra.mrb[8].mxu1 %v5991_v63  ;;  %1311 = vmatmul.mubr.f32.vlgmr.msra.gmra.mrb[16].mxu0 %v5991_v63  ;;  %v5102_v41 = vpack.c.bf16 %v702_v34, %v686_v33  ;;  %v829_v33 = vld [vmem:[%s8264_s2 + $0x9c0] sm:$0xff] }
 0x123   : > { %5083 = vmatprep.subr.bf16.mxu1 %v5082_v38  ;;  %5131 = vmatprep.subr.bf16.mxu0 %v5130_v39  ;;  %v5148_v38 = vpack.c.bf16 %v671_v32, %v655_v31  ;;  %v685_v39 = vld [vmem:[%s8264_s2 + $0x540] sm:$0xff] }
 0x124   : > { %4408 = vmatprep.mubr.msk.f32.mxu1 %vm917_vm4, %v6016_v12  ;;  %4414 = vmatprep.mubr.msk.f32.mxu0 %vm917_vm4, %v6016_v12  ;;  %v5104_v51 = vpack.c.bf16 %v701_v40, %v685_v39  ;;  %v813_v32 = vld [vmem:[%s8264_s2 + $0x940] sm:$0xff]  ;;  %v862_v39 = vld [vmem:[%s8264_s2 + $0xac8] sm:$0xff]  ;;  %v848_v40 = vld [vmem:[%s8264_s2 + $0xa58] sm:$0xff] }
 0x125   : > { %5085 = vmatpush1.bf16.msra.mxu1 %v5084_v45  ;;  %5133 = vmatpush1.bf16.msra.mxu0 %v5132_v46  ;;  %v703_v45 = vld [vmem:[%s8264_s2 + $0x5d0] sm:$0xff]  ;;  %v718_v46 = vld [vmem:[%s8264_s2 + $0x648] sm:$0xff] }
 0x126   : > { %1228 = vmatmul.mubr.f32.gmra.mrb[10].mxu1 %v6005_v6  ;;  %1317 = vmatmul.mubr.f32.gmra.mrb[18].mxu0 %v6005_v6  ;;  %v5106_v55 = vpack.c.bf16 %v734_v48, %v718_v46  ;;  %v861_v46 = vld [vmem:[%s8264_s2 + $0xac0] sm:$0xff] }
 0x127   : > { %5087 = vmatprep.subr.bf16.mxu1 %v5086_v52  ;;  %5135 = vmatprep.subr.bf16.mxu0 %v5134_v53  ;;  %v5152_v52 = vpack.c.bf16 %v703_v45, %v687_v44  ;;  %v717_v53 = vld [vmem:[%s8264_s2 + $0x640] sm:$0xff] }
 0x128   : > { %4409 = vmatprep.mubr.msk.f32.mxu1 %vm917_vm4, %v6044_v28  ;;  %4415 = vmatprep.mubr.msk.f32.mxu0 %vm917_vm4, %v6044_v28  ;;  %v5108_v2 = vpack.c.bf16 %v733_v54, %v717_v53  ;;  %v845_v45 = vld [vmem:[%s8264_s2 + $0xa40] sm:$0xff]  ;;  %v894_v53 = vld [vmem:[%s8264_s2 + $0xbc8] sm:$0xff]  ;;  %v880_v54 = vld [vmem:[%s8264_s2 + $0xb58] sm:$0xff] }
 0x129   : > { %5089 = vmatpush1.bf16.msra.mxu1 %v5088_v59  ;;  %5137 = vmatpush1.bf16.msra.mxu0 %v5136_v60  ;;  %v735_v59 = vld [vmem:[%s8264_s2 + $0x6d0] sm:$0xff]  ;;  %v750_v60 = vld [vmem:[%s8264_s2 + $0x748] sm:$0xff] }
 0x12a   : > { %1234 = vmatmul.mubr.f32.gmra.mrb[12].mxu1 %v6039_v24  ;;  %1323 = vmatmul.mubr.f32.gmra.mrb[20].mxu0 %v6039_v24  ;;  %v5110_v7 = vpack.c.bf16 %v766_v61, %v750_v60 }
 0x12b   : > { %5091 = vmatprep.subr.bf16.mxu1 %v5090_v3  ;;  %5139 = vmatprep.subr.bf16.mxu0 %v5138_v4  ;;  %v5156_v3 = vpack.c.bf16 %v735_v59, %v719_v58  ;;  %v749_v4 = vld [vmem:[%s8264_s2 + $0x740] sm:$0xff] }
 0x12c   : > { %4410 = vmatprep.mubr.msk.f32.mxu1 %vm917_vm4, %v6081_v47  ;;  %4416 = vmatprep.mubr.msk.f32.mxu0 %vm917_vm4, %v6081_v47  ;;  %v5112_v16 = vpack.c.bf16 %v765_v5, %v749_v4  ;;  %v877_v59 = vld [vmem:[%s8264_s2 + $0xb40] sm:$0xff]  ;;  %v910_v5 = vld [vmem:[%s8264_s2 + $0xc48] sm:$0xf] }
 0x12d   : > { %5093 = vmatpush1.bf16.msra.mxu1 %v5092_v10  ;;  %5141 = vmatpush1.bf16.msra.mxu0 %v5140_v11  ;;  %v767_v10 = vld [vmem:[%s8264_s2 + $0x7d0] sm:$0xff]  ;;  %v782_v11 = vld [vmem:[%s8264_s2 + $0x848] sm:$0xff] }
 0x12e   : > { %1240 = vmatmul.mubr.f32.gmra.mrb[14].mxu1 %v6073_v42  ;;  %1329 = vmatmul.mubr.f32.gmra.mrb[22].mxu0 %v6073_v42  ;;  %v5160_v17 = vpack.c.bf16 %v767_v10, %v751_v9  ;;  %v5114_v20 = vpack.c.bf16 %v798_v13, %v782_v11  ;;  %v546_v9 = vld [vmem:[%s8264_s2 + $0xe8] sm:$0xff]  ;;  %v532_v10 = vld [vmem:[%s8264_s2 + $0x78] sm:$0xff]  ;;  %v909_v13 = vld [vmem:[%s8264_s2 + $0xc40] sm:$0xf] }
 0x12f   : > { %5095 = vmatprep.subr.bf16.mxu1 %v5094_v18  ;;  %5143 = vmatprep.subr.bf16.mxu0 %v5142_v19  ;;  %v781_v18 = vld [vmem:[%s8264_s2 + $0x840] sm:$0xff]  ;;  %v548_v11 = vld [vmem:[%s8264_s2 + $0xf8] sm:$0xff] }
 0x130   : > { %4419 = vmatprep.mubr.msk.f32.mxu1 %vm917_vm4, %v5979_v56  ;;  %4425 = vmatprep.mubr.msk.f32.mxu0 %vm917_vm4, %v5979_v56  ;;  %v797_v19 = vld [vmem:[%s8264_s2 + $0x8c0] sm:$0xff] }
 0x131   : > { %5097 = vmatpush1.bf16.msra.mxu1 %v5096_v23  ;;  %5145 = vmatpush1.bf16.msra.mxu0 %v5144_v25  ;;  %v799_v23 = vld [vmem:[%s8264_s2 + $0x8d0] sm:$0xff]  ;;  %v814_v25 = vld [vmem:[%s8264_s2 + $0x948] sm:$0xff] }
 0x132   : > { %5099 = vmatprep.subr.bf16.mxu1 %v5098_v29  ;;  %5147 = vmatprep.subr.bf16.mxu0 %v5146_v30  ;;  %v832_v29 = vld [vmem:[%s8264_s2 + $0x9d8] sm:$0xff]  ;;  %v5116_v30 = vpack.c.bf16 %v797_v19, %v781_v18  ;;  %v5164_v31 = vpack.c.bf16 %v799_v23, %v783_v22  ;;  %v5118_v34 = vpack.c.bf16 %v830_v26, %v814_v25  ;;  %v547_v18 = vld [vmem:[%s8264_s2 + $0xf0] sm:$0xff]  ;;  %v578_v22 = vld [vmem:[%s8264_s2 + $0x1e8] sm:$0xff] }
 0x133   : > { %v5166_v35 = vpack.c.bf16 %v832_v29, %v816_v27  ;;  %v564_v23 = vld [vmem:[%s8264_s2 + $0x178] sm:$0xff]  ;;  %v561_v29 = vld [vmem:[%s8264_s2 + $0x160] sm:$0xff] }
 0x134   : > { %v580_v25 = vld [vmem:[%s8264_s2 + $0x1f8] sm:$0xff] }
 0x135   : > { %5101 = vmatpush1.bf16.msra.mxu1 %v5100_v37  ;;  %5149 = vmatpush1.bf16.msra.mxu0 %v5148_v38  ;;  %v831_v37 = vld [vmem:[%s8264_s2 + $0x9d0] sm:$0xff]  ;;  %v846_v38 = vld [vmem:[%s8264_s2 + $0xa48] sm:$0xff] }
 0x136   : > { %5103 = vmatprep.subr.bf16.mxu1 %v5102_v41  ;;  %5151 = vmatprep.subr.bf16.mxu0 %v5150_v43  ;;  %v864_v41 = vld [vmem:[%s8264_s2 + $0xad8] sm:$0xff]  ;;  %v5120_v43 = vpack.c.bf16 %v829_v33, %v813_v32  ;;  %v5168_v44 = vpack.c.bf16 %v831_v37, %v815_v36  ;;  %v5122_v48 = vpack.c.bf16 %v862_v39, %v846_v38  ;;  %v579_v32 = vld [vmem:[%s8264_s2 + $0x1f0] sm:$0xff]  ;;  %v610_v36 = vld [vmem:[%s8264_s2 + $0x2e8] sm:$0xff] }
 0x137   : > { %v5170_v49 = vpack.c.bf16 %v864_v41, %v848_v40  ;;  %v596_v37 = vld [vmem:[%s8264_s2 + $0x278] sm:$0xff]  ;;  %v593_v41 = vld [vmem:[%s8264_s2 + $0x260] sm:$0xff] }
 0x138   : > { %v612_v38 = vld [vmem:[%s8264_s2 + $0x2f8] sm:$0xff] }
 0x139   : > { %5105 = vmatpush1.bf16.msra.mxu1 %v5104_v51  ;;  %5153 = vmatpush1.bf16.msra.mxu0 %v5152_v52  ;;  %v863_v51 = vld [vmem:[%s8264_s2 + $0xad0] sm:$0xff]  ;;  %v878_v52 = vld [vmem:[%s8264_s2 + $0xb48] sm:$0xff] }
 0x13a   : > { %5107 = vmatprep.subr.bf16.mxu1 %v5106_v55  ;;  %5155 = vmatprep.subr.bf16.mxu0 %v5154_v57  ;;  %v896_v55 = vld [vmem:[%s8264_s2 + $0xbd8] sm:$0xff]  ;;  %v5124_v57 = vpack.c.bf16 %v861_v46, %v845_v45  ;;  %v5172_v58 = vpack.c.bf16 %v863_v51, %v847_v50  ;;  %v5126_v60 = vpack.c.bf16 %v894_v53, %v878_v52  ;;  %v611_v45 = vld [vmem:[%s8264_s2 + $0x2f0] sm:$0xff]  ;;  %v642_v50 = vld [vmem:[%s8264_s2 + $0x3e8] sm:$0xff] }
 0x13b   : > { %v5174_v61 = vpack.c.bf16 %v896_v55, %v880_v54  ;;  %v628_v51 = vld [vmem:[%s8264_s2 + $0x378] sm:$0xff]  ;;  %v625_v55 = vld [vmem:[%s8264_s2 + $0x360] sm:$0xff] }
 0x13c   : > { %v644_v52 = vld [vmem:[%s8264_s2 + $0x3f8] sm:$0xff] }
 0x13d   : > { %5109 = vmatpush1.bf16.msra.mxu1 %v5108_v2  ;;  %5157 = vmatpush1.bf16.msra.mxu0 %v5156_v3  ;;  %v895_v2 = vld [vmem:[%s8264_s2 + $0xbd0] sm:$0xff]  ;;  %v5128_v3 = vpack.c.bf16 %v893_v62, %v877_v59  ;;  %v5238_v62 = vpack.c.bf16 %v644_v52, %v628_v51 }
 0x13e   : > { %5111 = vmatprep.subr.bf16.mxu1 %v5110_v7  ;;  %5159 = vmatprep.subr.bf16.mxu0 %v5158_v8  ;;  %v5176_v4 = vpack.c.bf16 %v895_v2, %v879_v1  ;;  %v912_v7 = vld [vmem:[%s8264_s2 + $0xc58] sm:$0xf]  ;;  %v530_v8 = vld [vmem:[%s8264_s2 + $0x68] sm:$0xff]  ;;  %v643_v59 = vld [vmem:[%s8264_s2 + $0x3f0] sm:$0xff] }
 0x13f   : > { %v5178_v19 = vpack.c.bf16 %v546_v9, %v530_v8  ;;  %v674_v1 = vld [vmem:[%s8264_s2 + $0x4e8] sm:$0xff]  ;;  %v660_v2 = vld [vmem:[%s8264_s2 + $0x478] sm:$0xff]  ;;  %v673_v8 = vld [vmem:[%s8264_s2 + $0x4e0] sm:$0xff] }
 0x140   : > { %v755_v51 = vld [vmem:[%s8264_s2 + $0x770] sm:$0xff] }
 0x141   : > { %5113 = vmatpush1.bf16.msra.mxu1 %v5112_v16  ;;  %5161 = vmatpush1.bf16.msra.mxu0 %v5160_v17  ;;  %v545_v16 = vld [vmem:[%s8264_s2 + $0xe0] sm:$0xff]  ;;  %v531_v17 = vld [vmem:[%s8264_s2 + $0x70] sm:$0xff] }
 0x142   : > { %5115 = vmatprep.subr.bf16.mxu1 %v5114_v20  ;;  %5163 = vmatprep.subr.bf16.mxu0 %v5162_v21  ;;  %v5226_v20 = vpack.c.bf16 %v548_v11, %v532_v10  ;;  %v562_v21 = vld [vmem:[%s8264_s2 + $0x168] sm:$0xff]  ;;  %v5180_v26 = vpack.c.bf16 %v545_v16, %v529_v15  ;;  %v5228_v27 = vpack.c.bf16 %v547_v18, %v531_v17  ;;  %v659_v11 = vld [vmem:[%s8264_s2 + $0x470] sm:$0xff]  ;;  %v692_v16 = vld [vmem:[%s8264_s2 + $0x578] sm:$0xff] }
 0x143   : > { %v5182_v33 = vpack.c.bf16 %v578_v22, %v562_v21  ;;  %v706_v15 = vld [vmem:[%s8264_s2 + $0x5e8] sm:$0xff]  ;;  %v708_v17 = vld [vmem:[%s8264_s2 + $0x5f8] sm:$0xff]  ;;  %v705_v21 = vld [vmem:[%s8264_s2 + $0x5e0] sm:$0xff] }
 0x144   : > { %v771_v52 = vld [vmem:[%s8264_s2 + $0x7f0] sm:$0xff] }
 0x145   : > { %5117 = vmatpush1.bf16.msra.mxu1 %v5116_v30  ;;  %5165 = vmatpush1.bf16.msra.mxu0 %v5164_v31  ;;  %v577_v30 = vld [vmem:[%s8264_s2 + $0x1e0] sm:$0xff]  ;;  %v563_v31 = vld [vmem:[%s8264_s2 + $0x170] sm:$0xff] }
 0x146   : > { %5119 = vmatprep.subr.bf16.mxu1 %v5118_v34  ;;  %5167 = vmatprep.subr.bf16.mxu0 %v5166_v35  ;;  %v5230_v34 = vpack.c.bf16 %v580_v25, %v564_v23  ;;  %v594_v35 = vld [vmem:[%s8264_s2 + $0x268] sm:$0xff]  ;;  %v5184_v39 = vpack.c.bf16 %v577_v30, %v561_v29  ;;  %v5232_v40 = vpack.c.bf16 %v579_v32, %v563_v31  ;;  %v707_v25 = vld [vmem:[%s8264_s2 + $0x5f0] sm:$0xff]  ;;  %v724_v29 = vld [vmem:[%s8264_s2 + $0x678] sm:$0xff] }
 0x147   : > { %v5186_v46 = vpack.c.bf16 %v610_v36, %v594_v35  ;;  %v5246_v23 = vpack.c.bf16 %v708_v17, %v692_v16  ;;  %v740_v30 = vld [vmem:[%s8264_s2 + $0x6f8] sm:$0xff]  ;;  %v819_v16 = vld [vmem:[%s8264_s2 + $0x970] sm:$0xff] }
 0x148   : > { %v5250_v36 = vpack.c.bf16 %v740_v30, %v724_v29  ;;  %v835_v17 = vld [vmem:[%s8264_s2 + $0x9f0] sm:$0xff] }
 0x149   : > { %5121 = vmatpush1.bf16.msra.mxu1 %v5120_v43  ;;  %5169 = vmatpush1.bf16.msra.mxu0 %v5168_v44  ;;  %v609_v43 = vld [vmem:[%s8264_s2 + $0x2e0] sm:$0xff]  ;;  %v595_v44 = vld [vmem:[%s8264_s2 + $0x270] sm:$0xff] }
 0x14a   : > { %5123 = vmatprep.subr.bf16.mxu1 %v5122_v48  ;;  %5171 = vmatprep.subr.bf16.mxu0 %v5170_v49  ;;  %v5234_v48 = vpack.c.bf16 %v612_v38, %v596_v37  ;;  %v626_v49 = vld [vmem:[%s8264_s2 + $0x368] sm:$0xff]  ;;  %v5188_v53 = vpack.c.bf16 %v609_v43, %v593_v41  ;;  %v5236_v54 = vpack.c.bf16 %v611_v45, %v595_v44  ;;  %v723_v37 = vld [vmem:[%s8264_s2 + $0x670] sm:$0xff]  ;;  %v756_v41 = vld [vmem:[%s8264_s2 + $0x778] sm:$0xff] }
 0x14b   : > { %v739_v38 = vld [vmem:[%s8264_s2 + $0x6f0] sm:$0xff]  ;;  %v772_v43 = vld [vmem:[%s8264_s2 + $0x7f8] sm:$0xff] }
 0x14c   : > { %v5252_v45 = vpack.c.bf16 %v739_v38, %v723_v37  ;;  %v851_v29 = vld [vmem:[%s8264_s2 + $0xa70] sm:$0xff]  ;;  %v881_v37 = vld [vmem:[%s8264_s2 + $0xb60] sm:$0xff] }
 0x14d   : > { %5125 = vmatpush1.bf16.msra.mxu1 %v5124_v57  ;;  %5173 = vmatpush1.bf16.msra.mxu0 %v5172_v58  ;;  %v641_v57 = vld [vmem:[%s8264_s2 + $0x3e0] sm:$0xff]  ;;  %v627_v58 = vld [vmem:[%s8264_s2 + $0x370] sm:$0xff] }
 0x14e   : > { %5127 = vmatprep.subr.bf16.mxu1 %v5126_v60  ;;  %5175 = vmatprep.subr.bf16.mxu0 %v5174_v61  ;;  %v658_v60 = vld [vmem:[%s8264_s2 + $0x468] sm:$0xff]  ;;  %v5190_v61 = vpack.c.bf16 %v642_v50, %v626_v49  ;;  %v5254_v50 = vpack.c.bf16 %v772_v43, %v756_v41  ;;  %v867_v30 = vld [vmem:[%s8264_s2 + $0xaf0] sm:$0xff] }
 0x14f   : > { %v5194_v9 = vpack.c.bf16 %v674_v1, %v658_v60  ;;  %v785_v60 = vld [vmem:[%s8264_s2 + $0x860] sm:$0xff]  ;;  %v883_v41 = vld [vmem:[%s8264_s2 + $0xb70] sm:$0xff] }
 0x150   : > { %v899_v43 = vld [vmem:[%s8264_s2 + $0xbf0] sm:$0xff] }
 0x151   : > { %5129 = vmatpush1.bf16.msra.mxu1 %v5128_v3  ;;  %5177 = vmatpush1.bf16.msra.mxu0 %v5176_v4  ;;  %v676_v3 = vld [vmem:[%s8264_s2 + $0x4f8] sm:$0xff]  ;;  %v5192_v4 = vpack.c.bf16 %v641_v57, %v625_v55 }
 0x152   : > { %4417 = vmatprep.subr.msk.mxu1 %vm930_vm1, %v910_v5  ;;  %4423 = vmatprep.subr.msk.mxu0 %vm930_vm1, %v912_v7  ;;  %v5240_v5 = vpack.c.bf16 %v643_v59, %v627_v58  ;;  %v657_v7 = vld [vmem:[%s8264_s2 + $0x460] sm:$0xff]  ;;  %v5242_v10 = vpack.c.bf16 %v676_v3, %v660_v2  ;;  %v788_v55 = vld [vmem:[%s8264_s2 + $0x878] sm:$0xff]  ;;  %v5256_v59 = vpack.c.bf16 %v771_v52, %v755_v51  ;;  %v787_v2 = vld [vmem:[%s8264_s2 + $0x870] sm:$0xff] }
 0x153   : > { %v5196_v18 = vpack.c.bf16 %v673_v8, %v657_v7  ;;  %v804_v57 = vld [vmem:[%s8264_s2 + $0x8f8] sm:$0xff]  ;;  %v803_v3 = vld [vmem:[%s8264_s2 + $0x8f0] sm:$0xff] }
 0x154   : > { %v5258_v1 = vpack.c.bf16 %v804_v57, %v788_v55  ;;  %v820_v7 = vld [vmem:[%s8264_s2 + $0x978] sm:$0xff] }
 0x155   : > { %4418 = vmatpush1.msk.msra.mxu1 %vm930_vm1, %v909_v13  ;;  %4424 = vmatpush1.msk.msra.mxu0 %vm930_vm1, %v911_v14  ;;  %v675_v13 = vld [vmem:[%s8264_s2 + $0x4f0] sm:$0xff]  ;;  %v690_v14 = vld [vmem:[%s8264_s2 + $0x568] sm:$0xff]  ;;  %v836_v8 = vld [vmem:[%s8264_s2 + $0x9f8] sm:$0xff] }
 0x156   : > { %1400 = vmatmul.mubr.f32.vlgmr.msra.gmra.mrb[16].mxu1 %v5991_v63  ;;  %1489 = vmatmul.mubr.f32.vlgmr.msra.gmra.mrb[24].mxu0 %v5991_v63  ;;  %v5198_v22 = vpack.c.bf16 %v706_v15, %v690_v14  ;;  %v5262_v15 = vpack.c.bf16 %v836_v8, %v820_v7 }
 0x157   : > { %5179 = vmatprep.subr.bf16.mxu1 %v5178_v19  ;;  %5227 = vmatprep.subr.bf16.mxu0 %v5226_v20  ;;  %v5244_v19 = vpack.c.bf16 %v675_v13, %v659_v11  ;;  %v689_v20 = vld [vmem:[%s8264_s2 + $0x560] sm:$0xff] }
 0x158   : > { %4420 = vmatprep.mubr.msk.f32.mxu1 %vm917_vm4, %v6016_v12  ;;  %4426 = vmatprep.mubr.msk.f32.mxu0 %vm917_vm4, %v6016_v12  ;;  %v5200_v31 = vpack.c.bf16 %v705_v21, %v689_v20  ;;  %v817_v11 = vld [vmem:[%s8264_s2 + $0x960] sm:$0xff]  ;;  %v852_v20 = vld [vmem:[%s8264_s2 + $0xa78] sm:$0xff] }
 0x159   : > { %5181 = vmatpush1.bf16.msra.mxu1 %v5180_v26  ;;  %5229 = vmatpush1.bf16.msra.mxu0 %v5228_v27  ;;  %v722_v26 = vld [vmem:[%s8264_s2 + $0x668] sm:$0xff]  ;;  %v833_v13 = vld [vmem:[%s8264_s2 + $0x9e0] sm:$0xff]  ;;  %v868_v21 = vld [vmem:[%s8264_s2 + $0xaf8] sm:$0xff] }
 0x15a   : > { %1406 = vmatmul.mubr.f32.gmra.mrb[18].mxu1 %v6005_v6  ;;  %1495 = vmatmul.mubr.f32.gmra.mrb[26].mxu0 %v6005_v6  ;;  %v738_v27 = vld [vmem:[%s8264_s2 + $0x6e8] sm:$0xff] }
 0x15b   : > { %5183 = vmatprep.subr.bf16.mxu1 %v5182_v33  ;;  %5231 = vmatprep.subr.bf16.mxu0 %v5230_v34  ;;  %v721_v33 = vld [vmem:[%s8264_s2 + $0x660] sm:$0xff]  ;;  %v5202_v35 = vpack.c.bf16 %v738_v27, %v722_v26  ;;  %v5266_v27 = vpack.c.bf16 %v868_v21, %v852_v20 }
 0x15c   : > { %4421 = vmatprep.mubr.msk.f32.mxu1 %vm917_vm4, %v6044_v28  ;;  %4427 = vmatprep.mubr.msk.f32.mxu0 %vm917_vm4, %v6044_v28  ;;  %v737_v34 = vld [vmem:[%s8264_s2 + $0x6e0] sm:$0xff] }
 0x15d   : > { %5185 = vmatpush1.bf16.msra.mxu1 %v5184_v39  ;;  %5233 = vmatpush1.bf16.msra.mxu0 %v5232_v40  ;;  %v754_v39 = vld [vmem:[%s8264_s2 + $0x768] sm:$0xff]  ;;  %v5204_v44 = vpack.c.bf16 %v737_v34, %v721_v33  ;;  %v884_v33 = vld [vmem:[%s8264_s2 + $0xb78] sm:$0xff] }
 0x15e   : > { %1412 = vmatmul.mubr.f32.gmra.mrb[20].mxu1 %v6039_v24  ;;  %1501 = vmatmul.mubr.f32.gmra.mrb[28].mxu0 %v6039_v24  ;;  %v770_v40 = vld [vmem:[%s8264_s2 + $0x7e8] sm:$0xff]  ;;  %v900_v34 = vld [vmem:[%s8264_s2 + $0xbf8] sm:$0xff] }
 0x15f   : > { %5187 = vmatprep.subr.bf16.mxu1 %v5186_v46  ;;  %5235 = vmatprep.subr.bf16.mxu0 %v5234_v48  ;;  %v753_v46 = vld [vmem:[%s8264_s2 + $0x760] sm:$0xff]  ;;  %v5206_v49 = vpack.c.bf16 %v770_v40, %v754_v39  ;;  %v5270_v39 = vpack.c.bf16 %v900_v34, %v884_v33  ;;  %v1756_v34 = vld [vmem:[%s8265_s3 + $0x8] sm:$0xff] }
 0x160   : > { %4422 = vmatprep.mubr.msk.f32.mxu1 %vm917_vm4, %v6081_v47  ;;  %4428 = vmatprep.mubr.msk.f32.mxu0 %vm917_vm4, %v6081_v47  ;;  %v769_v48 = vld [vmem:[%s8264_s2 + $0x7e0] sm:$0xff] }
 0x161   : > { %5189 = vmatpush1.bf16.msra.mxu1 %v5188_v53  ;;  %5237 = vmatpush1.bf16.msra.mxu0 %v5236_v54  ;;  %v786_v53 = vld [vmem:[%s8264_s2 + $0x868] sm:$0xff]  ;;  %v5208_v58 = vpack.c.bf16 %v769_v48, %v753_v46  ;;  %v897_v40 = vld [vmem:[%s8264_s2 + $0xbe0] sm:$0xff]  ;;  %v916_v48 = vld [vmem:[%s8264_s2 + $0xc78] sm:$0xf] }
 0x162   : > { %1418 = vmatmul.mubr.f32.gmra.mrb[22].mxu1 %v6073_v42  ;;  %1507 = vmatmul.mubr.f32.gmra.mrb[30].mxu0 %v6073_v42  ;;  %v802_v54 = vld [vmem:[%s8264_s2 + $0x8e8] sm:$0xff] }
 0x163   : > { %5191 = vmatprep.subr.bf16.mxu1 %v5190_v61  ;;  %5239 = vmatprep.subr.bf16.mxu0 %v5238_v62  ;;  %v801_v61 = vld [vmem:[%s8264_s2 + $0x8e0] sm:$0xff]  ;;  %v5210_v62 = vpack.c.bf16 %v802_v54, %v786_v53  ;;  %v914_v46 = vld [vmem:[%s8264_s2 + $0xc68] sm:$0xf] }
 0x164   : > { %4431 = vmatprep.mubr.msk.f32.mxu1 %vm917_vm4, %v5979_v56  ;;  %4437 = vmatprep.mubr.msk.f32.mxu0 %vm917_vm4, %v5979_v56  ;;  %v691_v56 = vld [vmem:[%s8264_s2 + $0x570] sm:$0xff] }
 0x165   : > { %5193 = vmatpush1.bf16.msra.mxu1 %v5192_v4  ;;  %5241 = vmatpush1.bf16.msra.mxu0 %v5240_v5  ;;  %v5248_v32 = vpack.c.bf16 %v707_v25, %v691_v56  ;;  %v818_v4 = vld [vmem:[%s8264_s2 + $0x968] sm:$0xff]  ;;  %v849_v56 = vld [vmem:[%s8264_s2 + $0xa60] sm:$0xff] }
 0x166   : > { %5195 = vmatprep.subr.bf16.mxu1 %v5194_v9  ;;  %5243 = vmatprep.subr.bf16.mxu0 %v5242_v10  ;;  %v834_v5 = vld [vmem:[%s8264_s2 + $0x9e8] sm:$0xff]  ;;  %v5212_v9 = vpack.c.bf16 %v801_v61, %v785_v60  ;;  %v5260_v10 = vpack.c.bf16 %v803_v3, %v787_v2  ;;  %v865_v25 = vld [vmem:[%s8264_s2 + $0xae0] sm:$0xff] }
 0x167   : > { %v5214_v14 = vpack.c.bf16 %v834_v5, %v818_v4 }
 0x169   : > { %5197 = vmatpush1.bf16.msra.mxu1 %v5196_v18  ;;  %5245 = vmatpush1.bf16.msra.mxu0 %v5244_v19  ;;  %v850_v18 = vld [vmem:[%s8264_s2 + $0xa68] sm:$0xff] }
 0x16a   : > { %5199 = vmatprep.subr.bf16.mxu1 %v5198_v22  ;;  %5247 = vmatprep.subr.bf16.mxu0 %v5246_v23  ;;  %v866_v19 = vld [vmem:[%s8264_s2 + $0xae8] sm:$0xff]  ;;  %v5216_v22 = vpack.c.bf16 %v833_v13, %v817_v11  ;;  %v5264_v23 = vpack.c.bf16 %v835_v17, %v819_v16 }
 0x16b   : > { %v5218_v26 = vpack.c.bf16 %v866_v19, %v850_v18 }
 0x16d   : > { %5201 = vmatpush1.bf16.msra.mxu1 %v5200_v31  ;;  %5249 = vmatpush1.bf16.msra.mxu0 %v5248_v32  ;;  %v882_v31 = vld [vmem:[%s8264_s2 + $0xb68] sm:$0xff] }
 0x16e   : > { %5203 = vmatprep.subr.bf16.mxu1 %v5202_v35  ;;  %5251 = vmatprep.subr.bf16.mxu0 %v5250_v36  ;;  %v898_v32 = vld [vmem:[%s8264_s2 + $0xbe8] sm:$0xff]  ;;  %v5220_v35 = vpack.c.bf16 %v865_v25, %v849_v56  ;;  %v5268_v36 = vpack.c.bf16 %v867_v30, %v851_v29 }
 0x16f   : > { %v5222_v38 = vpack.c.bf16 %v898_v32, %v882_v31 }
 0x171   : > { %5205 = vmatpush1.bf16.msra.mxu1 %v5204_v44  ;;  %5253 = vmatpush1.bf16.msra.mxu0 %v5252_v45  ;;  %v5224_v44 = vpack.c.bf16 %v897_v40, %v881_v37  ;;  %v5272_v45 = vpack.c.bf16 %v899_v43, %v883_v41  ;;  %v1760_v37 = vld [vmem:[%s8265_s3 + $0x28] sm:$0xff]  ;;  %v2069_v40 = vld [vmem:[%s8267_s5] sm:$0xff]  ;;  %v5535_v43 = vmov 0  }
 0x172   : > { %5207 = vmatprep.subr.bf16.mxu1 %v5206_v49  ;;  %5255 = vmatprep.subr.bf16.mxu0 %v5254_v50  ;;  %v913_v49 = vld [vmem:[%s8264_s2 + $0xc60] sm:$0xf]  ;;  %v915_v50 = vld [vmem:[%s8264_s2 + $0xc70] sm:$0xf] }
 0x173   : > { %v1763_v41 = vld [vmem:[%s8265_s3 + $0x40] sm:$0xff]  ;;  %5489 = vset.pattern.permute.xlu0 %v5535_v43  ;;  %5488 = vset.pattern.permute.xlu1 %v5535_v43 }
 0x174   : > { %2232 = vperm.xlu0 %5489, %v2069_v40  }
 0x175   : > { %5209 = vmatpush1.bf16.msra.mxu1 %v5208_v58  ;;  %5257 = vmatpush1.bf16.msra.mxu0 %v5256_v59 }
 0x176   : > { %5211 = vmatprep.subr.bf16.mxu1 %v5210_v62  ;;  %5259 = vmatprep.subr.bf16.mxu0 %v5258_v1 }
 0x179   : > { %5213 = vmatpush1.bf16.msra.mxu1 %v5212_v9  ;;  %5261 = vmatpush1.bf16.msra.mxu0 %v5260_v10 }
 0x17a   : > { %5215 = vmatprep.subr.bf16.mxu1 %v5214_v14  ;;  %5263 = vmatprep.subr.bf16.mxu0 %v5262_v15 }
 0x17d   : > { %5217 = vmatpush1.bf16.msra.mxu1 %v5216_v22  ;;  %5265 = vmatpush1.bf16.msra.mxu0 %v5264_v23 }
 0x17e   : > { %5219 = vmatprep.subr.bf16.mxu1 %v5218_v26  ;;  %5267 = vmatprep.subr.bf16.mxu0 %v5266_v27 }
 0x181   : > { %5221 = vmatpush1.bf16.msra.mxu1 %v5220_v35  ;;  %5269 = vmatpush1.bf16.msra.mxu0 %v5268_v36  ;;  %v1758_v35 = vld [vmem:[%s8265_s3 + $0x18] sm:$0xff]  ;;  %v1755_v36 = vld [vmem:[%s8265_s3] sm:$0xff] }
 0x182   : > { %5223 = vmatprep.subr.bf16.mxu1 %v5222_v38  ;;  %5271 = vmatprep.subr.bf16.mxu0 %v5270_v39  ;;  %v1759_v38 = vld [vmem:[%s8265_s3 + $0x20] sm:$0xff]  ;;  %v1764_v39 = vld [vmem:[%s8265_s3 + $0x48] sm:$0xff] }
 0x185   : > { %5225 = vmatpush1.bf16.msra.mxu1 %v5224_v44  ;;  %5273 = vmatpush1.bf16.msra.mxu0 %v5272_v45  ;;  %v1768_v44 = vld [vmem:[%s8265_s3 + $0x68] sm:$0xff]  ;;  %v2061_v45 = vld [vmem:[%s8266_s4] sm:$0xff] }
 0x186   : > { %4429 = vmatprep.subr.msk.mxu1 %vm930_vm1, %v914_v46  ;;  %4435 = vmatprep.subr.msk.mxu0 %vm930_vm1, %v916_v48  ;;  %v2062_v46 = vld [vmem:[%s8266_s4 + $0x8] sm:$0xff]  ;;  %v2063_v48 = vld [vmem:[%s8266_s4 + $0x10] sm:$0xff] }
 0x187   : > { %2184 = vperm.xlu1 %5488, %v2061_v45   ;;  %2189 = vperm.xlu0 %5489, %v2062_v46  }
 0x189   : > { %4430 = vmatpush1.msk.msra.mxu1 %vm930_vm1, %v913_v49  ;;  %4436 = vmatpush1.msk.msra.mxu0 %vm930_vm1, %v915_v50 }
 0x18a   : > { %1578 = vmatmul.mubr.f32.vlgmr.msra.gmra.mrb[24].mxu1 %v5991_v63  ;;  %1667 = vmatmul.mubr.f32.vlgmr.msra.gmra.mrb[32].mxu0 %v5991_v63 }
 0x18b   : > { %4432 = vmatprep.mubr.msk.f32.mxu1 %vm917_vm4, %v6016_v12  ;;  %4438 = vmatprep.mubr.msk.f32.mxu0 %vm917_vm4, %v6016_v12 }
 0x18c   : > { %2194 = vperm.xlu1 %5488, %v2063_v48  }
 0x18e   : > { %1584 = vmatmul.mubr.f32.gmra.mrb[26].mxu1 %v6005_v6  ;;  %1673 = vmatmul.mubr.f32.gmra.mrb[34].mxu0 %v6005_v6 }
 0x18f   : > { %4433 = vmatprep.mubr.msk.f32.mxu1 %vm917_vm4, %v6044_v28  ;;  %4439 = vmatprep.mubr.msk.f32.mxu0 %vm917_vm4, %v6044_v28 }
 0x192   : > { %1590 = vmatmul.mubr.f32.gmra.mrb[28].mxu1 %v6039_v24  ;;  %1679 = vmatmul.mubr.f32.gmra.mrb[36].mxu0 %v6039_v24 }
 0x193   : > { %4434 = vmatprep.mubr.msk.f32.mxu1 %vm917_vm4, %v6081_v47  ;;  %4440 = vmatprep.mubr.msk.f32.mxu0 %vm917_vm4, %v6081_v47 }
 0x196   : > { %1596 = vmatmul.mubr.f32.gmra.mrb[30].mxu1 %v6073_v42  ;;  %1685 = vmatmul.mubr.f32.gmra.mrb[38].mxu0 %v6073_v42 }
 0x197   : > { %1915 = vmatprep.mubr.f32.mxu1 %v1756_v34  ;;  %2020 = vmatprep.mubr.f32.mxu0 %v1758_v35 }
 0x1c3   : > { %v1045_v63 = vpop.f32.mrb[0].mxu1  ;;  %v1134_v6 = vpop.f32.mrb[8].mxu0 }
 0x1c4   : > { %v1047_v12 = vpop.f32.mrb[1].mxu1  ;;  %v1136_v51 = vpop.f32.mrb[9].mxu0 }
 0x1c7   : > { %v1051_v52 = vpop.f32.mrb[2].mxu1  ;;  %v1140_v28 = vpop.f32.mrb[10].mxu0 }
 0x1c8   : > { %v5276_v53 = vpack.c.bf16 %v1051_v52, %v1045_v63  ;;  %v5292_v54 = vpack.c.bf16 %v1140_v28, %v1134_v6  ;;  %v1053_v55 = vpop.f32.mrb[3].mxu1  ;;  %v1142_v24 = vpop.f32.mrb[11].mxu0  ;;  %v1767_v63 = vld [vmem:[%s8265_s3 + $0x60] sm:$0xff]  ;;  %v2070_v52 = vld [vmem:[%s8267_s5 + $0x8] sm:$0xff] }
 0x1c9   : > { %v5284_v57 = vpack.c.bf16 %v1053_v55, %v1047_v12  ;;  %v5300_v58 = vpack.c.bf16 %v1142_v24, %v1136_v51  ;;  %v1772_v51 = vld [vmem:[%s8265_s3 + $0x88] sm:$0xff]  ;;  %v2073_v28 = vld [vmem:[%s8267_s5 + $0x20] sm:$0xff]  ;;  %2237 = vperm.xlu0 %5489, %v2070_v52   ;;  %v1769_v52 = vld [vmem:[%s8265_s3 + $0x70] sm:$0xff] }
 0x1ca   : > { %v1771_v55 = vld [vmem:[%s8265_s3 + $0x80] sm:$0xff]  ;;  %2252 = vperm.xlu1 %5488, %v2073_v28   ;;  %v1774_v28 = vld [vmem:[%s8265_s3 + $0x98] sm:$0xff] }
 0x1cb   : > { %v1057_v59 = vpop.f32.mrb[4].mxu1  ;;  %v1146_v60 = vpop.f32.mrb[12].mxu0 }
 0x1cc   : > { %v1059_v61 = vpop.f32.mrb[5].mxu1  ;;  %v1148_v47 = vpop.f32.mrb[13].mxu0 }
 0x1cf   : > { %v1063_v62 = vpop.f32.mrb[6].mxu1  ;;  %v1152_v1 = vpop.f32.mrb[14].mxu0 }
 0x1d0   : > { %v5280_v2 = vpack.c.bf16 %v1063_v62, %v1057_v59  ;;  %v5296_v42 = vpack.c.bf16 %v1152_v1, %v1146_v60  ;;  %v1065_v3 = vpop.f32.mrb[7].mxu1  ;;  %v1154_v4 = vpop.f32.mrb[15].mxu0  ;;  %v1776_v60 = vld [vmem:[%s8265_s3 + $0xa8] sm:$0xff]  ;;  %v2071_v62 = vld [vmem:[%s8267_s5 + $0x10] sm:$0xff] }
 0x1d1   : > { %v5288_v5 = vpack.c.bf16 %v1065_v3, %v1059_v61  ;;  %v5304_v7 = vpack.c.bf16 %v1154_v4, %v1148_v47  ;;  %2242 = vperm.xlu0 %5489, %v2071_v62  }
 0x1f5   : > { %v1223_v8 = vpop.f32.mrb[8].mxu1  ;;  %v1312_v9 = vpop.f32.mrb[16].mxu0 }
 0x1f6   : > { %v1225_v10 = vpop.f32.mrb[9].mxu1  ;;  %v1314_v11 = vpop.f32.mrb[17].mxu0 }
 0x1f9   : > { %v1229_v13 = vpop.f32.mrb[10].mxu1  ;;  %v1318_v14 = vpop.f32.mrb[18].mxu0 }
 0x1fa   : > { %v5274_v15 = vpack.c.bf16 %v1229_v13, %v1223_v8  ;;  %v5290_v16 = vpack.c.bf16 %v1318_v14, %v1312_v9  ;;  %v1231_v17 = vpop.f32.mrb[11].mxu1  ;;  %v1320_v18 = vpop.f32.mrb[19].mxu0 }
 0x1fb   : > { %v5282_v19 = vpack.c.bf16 %v1231_v17, %v1225_v10  ;;  %v5298_v20 = vpack.c.bf16 %v1320_v18, %v1314_v11  ;;  %v1779_v10 = vld [vmem:[%s8265_s3 + $0xc0] sm:$0xff] }
 0x1fc   : > { %5275 = vmatprep.subr.bf16.mxu1 %v5274_v15 }
 0x1fd   : > { %v1235_v21 = vpop.f32.mrb[12].mxu1  ;;  %v1324_v22 = vpop.f32.mrb[20].mxu0  ;;  %5277 = vmatpush3.bf16.msra.mxu1 %v5276_v53 }
 0x1fe   : > { %v1237_v23 = vpop.f32.mrb[13].mxu1  ;;  %v1326_v56 = vpop.f32.mrb[21].mxu0 }
 0x201   : > { %v1241_v25 = vpop.f32.mrb[14].mxu1  ;;  %v1330_v26 = vpop.f32.mrb[22].mxu0 }
 0x202   : > { %v5278_v27 = vpack.c.bf16 %v1241_v25, %v1235_v21  ;;  %v5294_v29 = vpack.c.bf16 %v1330_v26, %v1324_v22  ;;  %v1243_v30 = vpop.f32.mrb[15].mxu1  ;;  %v1332_v31 = vpop.f32.mrb[23].mxu0  ;;  %v2065_v21 = vld [vmem:[%s8266_s4 + $0x20] sm:$0xff] }
 0x203   : > { %v5286_v32 = vpack.c.bf16 %v1243_v30, %v1237_v23  ;;  %v5302_v33 = vpack.c.bf16 %v1332_v31, %v1326_v56 }
 0x204   : > { %5279 = vmatprep.subr.bf16.mxu1 %v5278_v27 }
 0x205   : > { %5281 = vmatpush3.bf16.msra.mxu1 %v5280_v2 }
 0x206   : > { %5283 = vmatprep.subr.bf16.mxu1 %v5282_v19  ;;  %v2072_v19 = vld [vmem:[%s8267_s5 + $0x18] sm:$0xff] }
 0x209   : > { %5285 = vmatpush3.bf16.msra.mxu1 %v5284_v57 }
 0x20a   : > { %5287 = vmatprep.subr.bf16.mxu1 %v5286_v32 }
 0x20d   : > { %5289 = vmatpush3.bf16.msra.mxu1 %v5288_v5  ;;  %v1780_v5 = vld [vmem:[%s8265_s3 + $0xc8] sm:$0xff] }
 0x20e   : > { %5291 = vmatprep.subr.bf16.mxu1 %v5290_v16  ;;  %v1784_v16 = vld [vmem:[%s8265_s3 + $0xe8] sm:$0xff] }
 0x211   : > { %5293 = vmatpush3.bf16.msra.mxu1 %v5292_v54 }
 0x212   : > { %5295 = vmatprep.subr.bf16.mxu1 %v5294_v29 }
 0x215   : > { %5297 = vmatpush3.bf16.msra.mxu1 %v5296_v42  ;;  %v1775_v42 = vld [vmem:[%s8265_s3 + $0xa0] sm:$0xff] }
 0x216   : > { %5299 = vmatprep.subr.bf16.mxu1 %v5298_v20  ;;  %v1783_v20 = vld [vmem:[%s8265_s3 + $0xe0] sm:$0xff] }
 0x219   : > { %5301 = vmatpush3.bf16.msra.mxu1 %v5300_v58 }
 0x21a   : > { %5303 = vmatprep.subr.bf16.mxu1 %v5302_v33 }
 0x21d   : > { %5305 = vmatpush3.bf16.msra.mxu1 %v5304_v7  ;;  %v2064_v7 = vld [vmem:[%s8266_s4 + $0x18] sm:$0xff] }
 0x21e   : > { %2199 = vperm.xlu0 %5489, %v2064_v7  }
 0x220   : > { %1916 = vmatmul.mubr.f32.vlgmr.msra.gmra.mrb[32].mxu1 %v1755_v36 }
 0x221   : > { %1920 = vmatprep.mubr.f32.mxu1 %v1760_v37 }
 0x222   : > { %2247 = vperm.xlu0 %5489, %v2072_v19  }
 0x224   : > { %1921 = vmatmul.mubr.f32.gmra.mrb[34].mxu1 %v1759_v38 }
 0x225   : > { %1925 = vmatprep.mubr.f32.mxu1 %v1764_v39 }
 0x226   : > { %2204 = vperm.xlu0 %5489, %v2065_v21  }
 0x228   : > { %1926 = vmatmul.mubr.f32.gmra.mrb[36].mxu1 %v1763_v41 }
 0x229   : > { %v6995_v49 = vpop.f32.mrb[16].mxu1  ;;  %v6997_v50 = vpop.f32.mrb[24].mxu0  ;;  %1930 = vmatprep.mubr.f32.mxu1 %v1768_v44 }
 0x22a   : > { %v7002_v6 = vpop.f32.mrb[17].mxu1  ;;  %v7004_v12 = vpop.f32.mrb[25].mxu0 }
 0x22c   : > { %1931 = vmatmul.mubr.f32.gmra.mrb[38].mxu1 %v1767_v63  ;;  %v1762_v63 = vld [vmem:[%s8265_s3 + $0x38] sm:$0xff] }
 0x22d   : > { %v1407_v53 = vpop.f32.mrb[18].mxu1  ;;  %v7015_v54 = vpop.f32.mrb[26].mxu0  ;;  %1935 = vmatprep.mubr.f32.mxu1 %v1772_v51  ;;  %v1770_v51 = vld [vmem:[%s8265_s3 + $0x78] sm:$0xff] }
 0x22e   : > { %v5308_v24 = vpack.c.bf16 %v1407_v53, %v6995_v49  ;;  %v5324_v57 = vpack.c.bf16 %v7015_v54, %v6997_v50  ;;  %v7023_v58 = vpop.f32.mrb[19].mxu1  ;;  %v7025_v59 = vpop.f32.mrb[27].mxu0  ;;  %v1757_v49 = vld [vmem:[%s8265_s3 + $0x10] sm:$0xff]  ;;  %v1778_v54 = vld [vmem:[%s8265_s3 + $0xb8] sm:$0xff] }
 0x22f   : > { %v5316_v61 = vpack.c.bf16 %v7023_v58, %v7002_v6  ;;  %v5332_v47 = vpack.c.bf16 %v7025_v59, %v7004_v12  ;;  %v1761_v50 = vld [vmem:[%s8265_s3 + $0x30] sm:$0xff]  ;;  %v1766_v6 = vld [vmem:[%s8265_s3 + $0x58] sm:$0xff] }
 0x230   : > { %1936 = vmatmul.mubr.f32.gmra.mrb[40].mxu1 %v1771_v55  ;;  %v1765_v12 = vld [vmem:[%s8265_s3 + $0x50] sm:$0xff]  ;;  %v1786_v58 = vld [vmem:[%s8265_s3 + $0xf8] sm:$0xff] }
 0x231   : > { %v1413_v1 = vpop.f32.mrb[20].mxu1  ;;  %v7037_v2 = vpop.f32.mrb[28].mxu0  ;;  %1940 = vmatprep.mubr.f32.mxu1 %v1776_v60  ;;  %v1773_v53 = vld [vmem:[%s8265_s3 + $0x90] sm:$0xff] }
 0x232   : > { %v1415_v3 = vpop.f32.mrb[21].mxu1  ;;  %v7042_v4 = vpop.f32.mrb[29].mxu0  ;;  %v1777_v55 = vld [vmem:[%s8265_s3 + $0xb0] sm:$0xff] }
 0x233   : > { %v1785_v59 = vld [vmem:[%s8265_s3 + $0xf0] sm:$0xff] }
 0x234   : > { %1941 = vmatmul.mubr.f32.gmra.mrb[42].mxu1 %v1775_v42 }
 0x235   : > { %v1419_v8 = vpop.f32.mrb[22].mxu1  ;;  %v1508_v9 = vpop.f32.mrb[30].mxu0  ;;  %1945 = vmatprep.mubr.f32.mxu1 %v1780_v5 }
 0x236   : > { %v5312_v11 = vpack.c.bf16 %v1419_v8, %v1413_v1  ;;  %v5328_v13 = vpack.c.bf16 %v1508_v9, %v7037_v2  ;;  %v1421_v14 = vpop.f32.mrb[23].mxu1  ;;  %v1510_v15 = vpop.f32.mrb[31].mxu0 }
 0x237   : > { %v5320_v17 = vpack.c.bf16 %v1421_v14, %v1415_v3  ;;  %v5336_v18 = vpack.c.bf16 %v1510_v15, %v7042_v4 }
 0x238   : > { %1946 = vmatmul.mubr.f32.gmra.mrb[44].mxu1 %v1779_v10 }
 0x239   : > { %1950 = vmatprep.mubr.f32.mxu1 %v1784_v16 }
 0x23c   : > { %1951 = vmatmul.mubr.f32.gmra.mrb[46].mxu1 %v1783_v20 }
 0x23d   : > { %2481 = vmatprep.mubr.f32.mxu1 %v5534_v0 }
 0x25d   : > { %v1579_v22 = vpop.f32.mrb[24].mxu1  ;;  %v1668_v23 = vpop.f32.mrb[32].mxu0 }
 0x25e   : > { %v1581_v56 = vpop.f32.mrb[25].mxu1  ;;  %v1670_v25 = vpop.f32.mrb[33].mxu0 }
 0x261   : > { %v1585_v26 = vpop.f32.mrb[26].mxu1  ;;  %v1674_v27 = vpop.f32.mrb[34].mxu0 }
 0x262   : > { %v5306_v29 = vpack.c.bf16 %v1585_v26, %v1579_v22  ;;  %v5322_v30 = vpack.c.bf16 %v1674_v27, %v1668_v23  ;;  %v1587_v31 = vpop.f32.mrb[27].mxu1  ;;  %v1676_v32 = vpop.f32.mrb[35].mxu0 }
 0x263   : > { %v5314_v33 = vpack.c.bf16 %v1587_v31, %v1581_v56  ;;  %v5330_v34 = vpack.c.bf16 %v1676_v32, %v1670_v25 }
 0x264   : > { %5307 = vmatprep.subr.bf16.mxu0 %v5306_v29 }
 0x265   : > { %v1591_v35 = vpop.f32.mrb[28].mxu1  ;;  %v1680_v36 = vpop.f32.mrb[36].mxu0  ;;  %5309 = vmatpush3.bf16.msra.mxu0 %v5308_v24  ;;  %v1782_v24 = vld [vmem:[%s8265_s3 + $0xd8] sm:$0xff] }
 0x266   : > { %v1593_v37 = vpop.f32.mrb[29].mxu1  ;;  %v1682_v38 = vpop.f32.mrb[37].mxu0 }
 0x269   : > { %v1597_v39 = vpop.f32.mrb[30].mxu1  ;;  %v1686_v40 = vpop.f32.mrb[38].mxu0 }
 0x26a   : > { %v5310_v41 = vpack.c.bf16 %v1597_v39, %v1591_v35  ;;  %v5326_v43 = vpack.c.bf16 %v1686_v40, %v1680_v36  ;;  %v1599_v44 = vpop.f32.mrb[31].mxu1  ;;  %v1688_v45 = vpop.f32.mrb[39].mxu0 }
 0x26b   : > { %v5318_v46 = vpack.c.bf16 %v1599_v44, %v1593_v37  ;;  %v5334_v48 = vpack.c.bf16 %v1688_v45, %v1682_v38 }
 0x26c   : > { %5311 = vmatprep.subr.bf16.mxu0 %v5310_v41 }
 0x26d   : > { %5313 = vmatpush3.bf16.msra.mxu0 %v5312_v11 }
 0x26e   : > { %5315 = vmatprep.subr.bf16.mxu0 %v5314_v33 }
 0x271   : > { %5317 = vmatpush3.bf16.msra.mxu0 %v5316_v61 }
 0x272   : > { %5319 = vmatprep.subr.bf16.mxu0 %v5318_v46 }
 0x275   : > { %5321 = vmatpush3.bf16.msra.mxu0 %v5320_v17 }
 0x276   : > { %5323 = vmatprep.subr.bf16.mxu0 %v5322_v30 }
 0x279   : > { %5325 = vmatpush3.bf16.msra.mxu0 %v5324_v57  ;;  %v1781_v57 = vld [vmem:[%s8265_s3 + $0xd0] sm:$0xff] }
 0x27a   : > { %5327 = vmatprep.subr.bf16.mxu0 %v5326_v43 }
 0x27d   : > { %5329 = vmatpush3.bf16.msra.mxu0 %v5328_v13 }
 0x27e   : > { %5331 = vmatprep.subr.bf16.mxu0 %v5330_v34 }
 0x281   : > { %5333 = vmatpush3.bf16.msra.mxu0 %v5332_v47 }
 0x282   : > { %5335 = vmatprep.subr.bf16.mxu0 %v5334_v48 }
 0x285   : > { %5337 = vmatpush3.bf16.msra.mxu0 %v5336_v18 }
 0x288   : > { %2021 = vmatmul.mubr.f32.vlgmr.msra.gmra.mrb[40].mxu0 %v1757_v49 }
 0x289   : > { %2025 = vmatprep.mubr.f32.mxu0 %v1762_v63 }
 0x28c   : > { %2026 = vmatmul.mubr.f32.gmra.mrb[42].mxu0 %v1761_v50 }
 0x28d   : > { %2030 = vmatprep.mubr.f32.mxu0 %v1766_v6 }
 0x290   : > { %2031 = vmatmul.mubr.f32.gmra.mrb[44].mxu0 %v1765_v12 }
 0x291   : > { %2035 = vmatprep.mubr.f32.mxu0 %v1770_v51 }
 0x294   : > { %2036 = vmatmul.mubr.f32.gmra.mrb[46].mxu0 %v1769_v52 }
 0x295   : > { %2040 = vmatprep.mubr.f32.mxu0 %v1774_v28 }
 0x298   : > { %2041 = vmatmul.mubr.f32.gmra.mrb[48].mxu0 %v1773_v53 }
 0x299   : > { %2045 = vmatprep.mubr.f32.mxu0 %v1778_v54 }
 0x29c   : > { %2046 = vmatmul.mubr.f32.gmra.mrb[50].mxu0 %v1777_v55 }
 0x29d   : > { %2050 = vmatprep.mubr.f32.mxu0 %v1782_v24 }
 0x2a0   : > { %2051 = vmatmul.mubr.f32.gmra.mrb[52].mxu0 %v1781_v57 }
 0x2a1   : > { %2055 = vmatprep.mubr.f32.mxu0 %v1786_v58 }
 0x2a4   : > { %2056 = vmatmul.mubr.f32.gmra.mrb[54].mxu0 %v1785_v59 }
 0x2a5   : > { %2594 = vmatprep.mubr.f32.mxu0 %v5534_v0 }
 0x2f3   : > { %v4541_v60 = vpop.f32.mrb[32].mxu1 }
 0x2f4   : > { %v4542_v61 = vpop.f32.mrb[33].mxu1 }
 0x2f5   : > { %v4543_v47 = vadd.f32 %v4542_v61, %v4541_v60  ;;  %v2074_v61 = vld [vmem:[%s8267_s5 + $0x28] sm:$0xff] }
 0x2f7   : > { %v4544_v62 = vpop.f32.mrb[34].mxu1 }
 0x2f8   : > { %v4545_v1 = vpop.f32.mrb[35].mxu1 }
 0x2f9   : > { %v4546_v2 = vadd.f32 %v4545_v1, %v4544_v62  ;;  %v7146_v62 = vpop.permute.xlu0 %2232 }
 0x2fb   : > { %v4547_v42 = vpop.f32.mrb[36].mxu1 }
 0x2fc   : > { %v4548_v3 = vpop.f32.mrb[37].mxu1 }
 0x2fd   : > { %v4549_v4 = vadd.f32 %v4548_v3, %v4547_v42  ;;  %v7148_v1 = vpop.permute.xlu0 %2189 }
 0x2ff   : > { %v4550_v5 = vpop.f32.mrb[38].mxu1 }
 0x300   : > { %v4551_v7 = vpop.f32.mrb[39].mxu1 }
 0x301   : > { %v4552_v8 = vadd.f32 %v4551_v7, %v4550_v5  ;;  %v7158_v5 = vpop.permute.xlu1 %2184 }
 0x303   : > { %v4553_v9 = vpop.f32.mrb[40].mxu1 }
 0x304   : > { %v4554_v10 = vpop.f32.mrb[41].mxu1 }
 0x305   : > { %v4555_v11 = vadd.f32 %v4554_v10, %v4553_v9 }
 0x307   : > { %v4556_v13 = vpop.f32.mrb[42].mxu1 }
 0x308   : > { %v4557_v14 = vpop.f32.mrb[43].mxu1 }
 0x309   : > { %v4558_v15 = vadd.f32 %v4557_v14, %v4556_v13 }
 0x30b   : > { %v4559_v16 = vpop.f32.mrb[44].mxu1 }
 0x30c   : > { %v4560_v17 = vpop.f32.mrb[45].mxu1 }
 0x30d   : > { %v4561_v18 = vadd.f32 %v4560_v17, %v4559_v16 }
 0x30f   : > { %v4562_v19 = vpop.f32.mrb[46].mxu1 }
 0x310   : > { %v4563_v20 = vpop.f32.mrb[47].mxu1 }
 0x311   : > { %v4564_v21 = vadd.f32 %v4563_v20, %v4562_v19 }
 0x35b   : > { %v4597_v22 = vpop.f32.mrb[40].mxu0 }
 0x35c   : > { %v4598_v23 = vpop.f32.mrb[41].mxu0 }
 0x35d   : > { %v4599_v56 = vadd.f32 %v4598_v23, %v4597_v22 }
 0x35f   : > { %v4600_v25 = vpop.f32.mrb[42].mxu0  ;;  %v2023_v26 = vadd.f32 %v4599_v56, %v4543_v47  ;;  %v2066_v47 = vld [vmem:[%s8266_s4 + $0x28] sm:$0xff] }
 0x360   : > { %v4601_v27 = vpop.f32.mrb[43].mxu0 }
 0x361   : > { %v4602_v29 = vadd.f32 %v4601_v27, %v4600_v25  ;;  %v2078_v30 = vsel %vm2077_vm11, %v2023_v26, 0.0 }
 0x362   : > { %2079 = vadd.xlane.f32.xlu0 %v2078_v30 }
 0x363   : > { %v4603_v31 = vpop.f32.mrb[44].mxu0  ;;  %v2028_v32 = vadd.f32 %v4602_v29, %v4546_v2  ;;  %v7150_v2 = vpop.permute.xlu0 %2237 }
 0x364   : > { %v4604_v33 = vpop.f32.mrb[45].mxu0 }
 0x365   : > { %v4605_v34 = vadd.f32 %v4604_v33, %v4603_v31  ;;  %v2081_v35 = vsel %vm2077_vm11, %v2028_v32, 0.0 }
 0x366   : > { %2082 = vadd.xlane.f32.xlu0 %v2081_v35 }
 0x367   : > { %v4606_v36 = vpop.f32.mrb[46].mxu0  ;;  %v2033_v37 = vadd.f32 %v4605_v34, %v4549_v4  ;;  %v7152_v42 = vpop.permute.xlu0 %2242 }
 0x368   : > { %v4607_v38 = vpop.f32.mrb[47].mxu0 }
 0x369   : > { %v4608_v39 = vadd.f32 %v4607_v38, %v4606_v36  ;;  %v2084_v40 = vsel %vm2077_vm11, %v2033_v37, 0.0  ;;  %v2312_v38 = vld [vmem:[%s8268_s6 + $0x50] sm:$0xff] }
 0x36a   : > { %2085 = vadd.xlane.f32.xlu1 %v2084_v40 }
 0x36b   : > { %v4609_v41 = vpop.f32.mrb[48].mxu0  ;;  %v2038_v43 = vadd.f32 %v4608_v39, %v4552_v8  ;;  %v7154_v3 = vpop.permute.xlu0 %2199  ;;  %v2305_v39 = vld [vmem:[%s8268_s6 + $0x18] sm:$0xff] }
 0x36c   : > { %v4610_v44 = vpop.f32.mrb[49].mxu0  ;;  %v7162_v8 = vpop.permute.xlu1 %2194 }
 0x36d   : > { %v4611_v45 = vadd.f32 %v4610_v44, %v4609_v41  ;;  %v2087_v46 = vsel %vm2077_vm11, %v2038_v43, 0.0  ;;  %v2314_v41 = vld [vmem:[%s8268_s6 + $0x60] sm:$0xff]  ;;  %v2311_v44 = vld [vmem:[%s8268_s6 + $0x48] sm:$0xff] }
 0x36e   : > { %2088 = vadd.xlane.f32.xlu1 %v2087_v46 }
 0x36f   : > { %v4612_v48 = vpop.f32.mrb[50].mxu0  ;;  %v2043_v49 = vadd.f32 %v4611_v45, %v4555_v11  ;;  %v7156_v4 = vpop.permute.xlu0 %2247  ;;  %v5350_v45 = vpack.c.bf16 %v2314_v41, %v2305_v39 }
 0x370   : > { %v4613_v63 = vpop.f32.mrb[51].mxu0  ;;  %v7166_v13 = vpop.permute.xlu1 %2252 }
 0x371   : > { %v4614_v50 = vadd.f32 %v4613_v63, %v4612_v48  ;;  %v2090_v6 = vsel %vm2077_vm11, %v2043_v49, 0.0  ;;  %v2304_v48 = vld [vmem:[%s8268_s6 + $0x10] sm:$0xff]  ;;  %5351 = vmatprep.subr.bf16.mxu0 %v5350_v45 }
 0x372   : > { %2091 = vadd.xlane.f32.xlu0 %v2090_v6  ;;  %v2075_v63 = vld [vmem:[%s8267_s5 + $0x30] sm:$0xff]  ;;  %v2321_v6 = vld [vmem:[%s8268_s6 + $0x98] sm:$0xff] }
 0x373   : > { %v4615_v12 = vpop.f32.mrb[52].mxu0  ;;  %v7128_v51 = vadd.f32 %v4614_v50, %v4558_v15  ;;  %v7160_v7 = vpop.permute.xlu0 %2204 }
 0x374   : > { %v4616_v52 = vpop.f32.mrb[53].mxu0 }
 0x375   : > { %v4617_v28 = vadd.f32 %v4616_v52, %v4615_v12  ;;  %v2093_v53 = vsel %vm2077_vm11, %v7128_v51, 0.0  ;;  %v2330_v12 = vld [vmem:[%s8268_s6 + $0xe0] sm:$0xff]  ;;  %v2323_v52 = vld [vmem:[%s8268_s6 + $0xa8] sm:$0xff] }
 0x376   : > { %2094 = vadd.xlane.f32.xlu1 %v2093_v53  ;;  %v2332_v53 = vld [vmem:[%s8268_s6 + $0xf0] sm:$0xff] }
 0x377   : > { %v4618_v54 = vpop.f32.mrb[54].mxu0  ;;  %v7132_v55 = vadd.f32 %v4617_v28, %v4561_v18  ;;  %v5342_v28 = vpack.c.bf16 %v2330_v12, %v2321_v6  ;;  %v2309_v6 = vld [vmem:[%s8268_s6 + $0x38] sm:$0xff] }
 0x378   : > { %v4619_v24 = vpop.f32.mrb[55].mxu0 }
 0x379   : > { %v4620_v57 = vadd.f32 %v4619_v24, %v4618_v54  ;;  %v2096_v58 = vsel %vm2077_vm11, %v7132_v55, 0.0  ;;  %v2320_v54 = vld [vmem:[%s8268_s6 + $0x90] sm:$0xff]  ;;  %v2329_v24 = vld [vmem:[%s8268_s6 + $0xd8] sm:$0xff] }
 0x37a   : > { %2097 = vadd.xlane.f32.xlu0 %v2096_v58  ;;  %v5344_v58 = vpack.c.bf16 %v2329_v24, %v2320_v54 }
 0x37b   : > { %v7136_v59 = vadd.f32 %v4620_v57, %v4564_v21  ;;  %v5354_v57 = vpack.c.bf16 %v2332_v53, %v2323_v52  ;;  %v2318_v52 = vld [vmem:[%s8268_s6 + $0x80] sm:$0xff] }
 0x37d   : > { %v2099_v60 = vsel %vm2077_vm11, %v7136_v59, 0.0 }
 0x37e   : > { %2100 = vadd.xlane.f32.xlu1 %v2099_v60  ;;  %v2322_v60 = vld [vmem:[%s8268_s6 + $0xa0] sm:$0xff] }
 0x38f   : > { %2257 = vperm.xlu1 %5488, %v2074_v61   ;;  %v2331_v61 = vld [vmem:[%s8268_s6 + $0xe8] sm:$0xff] }
 0x390   : > { %2209 = vperm.xlu0 %5489, %v2066_v47   ;;  %v5356_v47 = vpack.c.bf16 %v2331_v61, %v2322_v60 }
 0x3ef   : > { %v2080_v9 = vpop.xlane.xlu0 %2079 }
 0x3f0   : > { %v2102_v10 = vmul.f32 0.020408163, %v2080_v9  ;;  %v2339_v9 = vld [vmem:[%s8268_s6 + $0x128] sm:$0xff] }
 0x3f2   : > { %v7164_v11 = vsub.f32 %v2023_v26, %v2102_v10  ;;  %v2348_v10 = vld [vmem:[%s8268_s6 + $0x170] sm:$0xff] }
 0x3f3   : > { %v2083_v14 = vpop.xlane.xlu0 %2082 }
 0x3f4   : > { %v2103_v15 = vmul.f32 0.020408163, %v2083_v14  ;;  %v2118_v16 = vmul.f32 %v7164_v11, %v7164_v11  ;;  %v2341_v14 = vld [vmem:[%s8268_s6 + $0x138] sm:$0xff] }
 0x3f6   : > { %v7170_v17 = vsub.f32 %v2028_v32, %v2103_v15  ;;  %v2126_v18 = vsel %vm2077_vm11, %v2118_v16, 0.0  ;;  %v5346_v15 = vpack.c.bf16 %v2348_v10, %v2339_v9  ;;  %v2350_v16 = vld [vmem:[%s8268_s6 + $0x180] sm:$0xff] }
 0x3f7   : > { %v2086_v19 = vpop.xlane.xlu1 %2085  ;;  %2127 = vadd.xlane.f32.xlu0 %v2126_v18  ;;  %v2338_v18 = vld [vmem:[%s8268_s6 + $0x120] sm:$0xff] }
 0x3f8   : > { %v2104_v20 = vmul.f32 0.020408163, %v2086_v19  ;;  %v2119_v21 = vmul.f32 %v7170_v17, %v7170_v17  ;;  %v2347_v19 = vld [vmem:[%s8268_s6 + $0x168] sm:$0xff] }
 0x3fa   : > { %v7175_v22 = vsub.f32 %v2033_v37, %v2104_v20  ;;  %v2129_v23 = vsel %vm2077_vm11, %v2119_v21, 0.0  ;;  %v2303_v37 = vld [vmem:[%s8268_s6 + $0x8] sm:$0xff]  ;;  %v5358_v20 = vpack.c.bf16 %v2350_v16, %v2341_v14  ;;  %v5348_v21 = vpack.c.bf16 %v2347_v19, %v2338_v18 }
 0x3fb   : > { %v2089_v56 = vpop.xlane.xlu1 %2088  ;;  %2130 = vadd.xlane.f32.xlu1 %v2129_v23  ;;  %v5338_v40 = vpack.c.bf16 %v2312_v38, %v2303_v37  ;;  %v2340_v23 = vld [vmem:[%s8268_s6 + $0x130] sm:$0xff] }
 0x3fc   : > { %v2105_v25 = vmul.f32 0.020408163, %v2089_v56  ;;  %v2120_v26 = vmul.f32 %v7175_v22, %v7175_v22  ;;  %v2349_v56 = vld [vmem:[%s8268_s6 + $0x178] sm:$0xff] }
 0x3fd   : > { %5339 = vmatprep.subr.bf16.mxu1 %v5338_v40 }
 0x3fe   : > { %v7180_v27 = vsub.f32 %v2038_v43, %v2105_v25  ;;  %v2132_v29 = vsel %vm2077_vm11, %v2120_v26, 0.0  ;;  %v2302_v43 = vld [vmem:[%s8268_s6] sm:$0xff]  ;;  %v5360_v25 = vpack.c.bf16 %v2349_v56, %v2340_v23  ;;  %v2067_v26 = vld [vmem:[%s8266_s4 + $0x30] sm:$0xff] }
 0x3ff   : > { %2133 = vadd.xlane.f32.xlu0 %v2132_v29  ;;  %v2092_v30 = vpop.xlane.xlu0 %2091  ;;  %v5340_v46 = vpack.c.bf16 %v2311_v44, %v2302_v43  ;;  %v2357_v29 = vld [vmem:[%s8268_s6 + $0x1b8] sm:$0x1] }
 0x400   : > { %v2106_v31 = vmul.f32 0.020408163, %v2092_v30  ;;  %v2121_v32 = vmul.f32 %v7180_v27, %v7180_v27  ;;  %v2359_v30 = vld [vmem:[%s8268_s6 + $0x1c8] sm:$0x1] }
 0x401   : > { %5341 = vmatpush1.bf16.msra.mxu1 %v5340_v46 }
 0x402   : > { %v7185_v33 = vsub.f32 %v2043_v49, %v2106_v31  ;;  %v2135_v34 = vsel %vm2077_vm11, %v2121_v32, 0.0  ;;  %v2313_v49 = vld [vmem:[%s8268_s6 + $0x58] sm:$0xff]  ;;  %5343 = vmatprep.subr.bf16.mxu1 %v5342_v28  ;;  %v2356_v31 = vld [vmem:[%s8268_s6 + $0x1b0] sm:$0x1]  ;;  %v2358_v32 = vld [vmem:[%s8268_s6 + $0x1c0] sm:$0x1]  ;;  %v5374_v28 = vpack.c.bf16 %v2318_v52, %v2309_v6 }
 0x403   : > { %2136 = vadd.xlane.f32.xlu1 %v2135_v34  ;;  %v5352_v50 = vpack.c.bf16 %v2313_v49, %v2304_v48  ;;  %v2095_v34 = vpop.xlane.xlu1 %2094  ;;  %v2068_v49 = vld [vmem:[%s8266_s4 + $0x38] sm:$0xff]  ;;  %v2352_v6 = vld [vmem:[%s8268_s6 + $0x190] sm:$0xff]  ;;  %v2354_v52 = vld [vmem:[%s8268_s6 + $0x1a0] sm:$0xff] }
 0x404   : > { %v2122_v35 = vmul.f32 %v7185_v33, %v7185_v33 }
 0x405   : > { %5353 = vmatpush1.bf16.msra.mxu0 %v5352_v50  ;;  %5345 = vmatpush1.bf16.msra.mxu1 %v5344_v58  ;;  %v2316_v50 = vld [vmem:[%s8268_s6 + $0x70] sm:$0xff] }
 0x406   : > { %v2138_v36 = vsel %vm2077_vm11, %v2122_v35, 0.0  ;;  %5355 = vmatprep.subr.bf16.mxu0 %v5354_v57  ;;  %5347 = vmatprep.subr.bf16.mxu1 %v5346_v15  ;;  %v2107_v35 = vmul.f32 0.020408163, %v2095_v34  ;;  %v2325_v34 = vld [vmem:[%s8268_s6 + $0xb8] sm:$0xff] }
 0x407   : > { %2139 = vadd.xlane.f32.xlu0 %v2138_v36  ;;  %v2098_v36 = vpop.xlane.xlu0 %2097 }
 0x408   : > { %v7286_v38 = vsub.f32 %v7128_v51, %v2107_v35  ;;  %v2108_v39 = vmul.f32 0.020408163, %v2098_v36  ;;  %v2334_v35 = vld [vmem:[%s8268_s6 + $0x100] sm:$0xff]  ;;  %v2327_v36 = vld [vmem:[%s8268_s6 + $0xc8] sm:$0xff] }
 0x409   : > { %5357 = vmatpush1.bf16.msra.mxu0 %v5356_v47  ;;  %5349 = vmatpush1.bf16.msra.mxu1 %v5348_v21 }
 0x40a   : > { %5359 = vmatprep.subr.bf16.mxu0 %v5358_v20  ;;  %4441 = vmatprep.subr.msk.mxu1 %vm2389_vm12, %v2357_v29  ;;  %v7289_v41 = vsub.f32 %v7132_v55, %v2108_v39  ;;  %v2123_v44 = vmul.f32 %v7286_v38, %v7286_v38  ;;  %v2306_v29 = vld [vmem:[%s8268_s6 + $0x20] sm:$0xff]  ;;  %v2324_v39 = vld [vmem:[%s8268_s6 + $0xb0] sm:$0xff] }
 0x40b   : > { %v2101_v37 = vpop.xlane.xlu1 %2100 }
 0x40c   : > { %v2109_v40 = vmul.f32 0.020408163, %v2101_v37  ;;  %v2141_v45 = vsel %vm2077_vm11, %v2123_v44, 0.0  ;;  %v2124_v51 = vmul.f32 %v7289_v41, %v7289_v41 }
 0x40d   : > { %5361 = vmatpush1.bf16.msra.mxu0 %v5360_v25  ;;  %4442 = vmatpush1.msk.msra.mxu1 %vm2389_vm12, %v2356_v31  ;;  %v2308_v31 = vld [vmem:[%s8268_s6 + $0x30] sm:$0xff] }
 0x40e   : > { %4451 = vmatprep.subr.msk.mxu0 %vm2389_vm12, %v2359_v30  ;;  %v7292_v43 = vsub.f32 %v7136_v59, %v2109_v40  ;;  %v2144_v55 = vsel %vm2077_vm11, %v2124_v51, 0.0  ;;  %v2076_v59 = vld [vmem:[%s8267_s5 + $0x38] sm:$0xff]  ;;  %v2315_v30 = vld [vmem:[%s8268_s6 + $0x68] sm:$0xff]  ;;  %v5366_v51 = vpack.c.bf16 %v2334_v35, %v2325_v34 }
 0x40f   : > { %v7321_v53 = vpop.permute.xlu0 %2209  ;;  %v7323_v54 = vpop.permute.xlu1 %2257  ;;  %v2333_v40 = vld [vmem:[%s8268_s6 + $0xf8] sm:$0xff] }
 0x410   : > { %v2125_v46 = vmul.f32 %v7292_v43, %v7292_v43 }
 0x411   : > { %4452 = vmatpush1.msk.msra.mxu0 %vm2389_vm12, %v2358_v32 }
 0x412   : > { %v2147_v48 = vsel %vm2077_vm11, %v2125_v46, 0.0  ;;  %5375 = vmatprep.subr.bf16.mxu0 %v5374_v28  ;;  %v5368_v28 = vpack.c.bf16 %v2333_v40, %v2324_v39 }
 0x414   : > { %2262 = vperm.xlu1 %5488, %v2075_v63   ;;  %v2307_v63 = vld [vmem:[%s8268_s6 + $0x28] sm:$0xff] }
 0x415   : > { %v5362_v12 = vpack.c.bf16 %v2316_v50, %v2307_v63 }
 0x417   : > { %5363 = vmatprep.subr.bf16.mxu1 %v5362_v12  ;;  %v2345_v12 = vld [vmem:[%s8268_s6 + $0x158] sm:$0xff] }
 0x41d   : > { %2214 = vperm.xlu0 %5489, %v2067_v26  }
 0x438   : > { %2142 = vadd.xlane.f32.xlu1 %v2141_v45  ;;  %v5364_v45 = vpack.c.bf16 %v2315_v30, %v2306_v29 }
 0x43c   : > { %2148 = vadd.xlane.f32.xlu1 %v2147_v48  ;;  %2145 = vadd.xlane.f32.xlu0 %v2144_v55  ;;  %v2326_v48 = vld [vmem:[%s8268_s6 + $0xc0] sm:$0xff]  ;;  %v2343_v55 = vld [vmem:[%s8268_s6 + $0x148] sm:$0xff] }
 0x44d   : > { %2267 = vperm.xlu1 %5488, %v2076_v59  }
 0x452   : > { %2219 = vperm.xlu0 %5489, %v2068_v49  }
 0x484   : > { %v2128_v24 = vpop.xlane.xlu0 %2127 }
 0x485   : > { %v2150_v57 = vmul.f32 0.020408163, %v2128_v24 }
 0x487   : > { %v2158_v58 = vadd.f32 1e-05, %v2150_v57 }
 0x488   : > { %v2131_v60 = vpop.xlane.xlu1 %2130 }
 0x489   : > { %5490 = vrsqrt.f32 %v2158_v58  ;;  %v2151_v61 = vmul.f32 0.020408163, %v2131_v60  ;;  %v5370_v58 = vpack.c.bf16 %v2352_v6, %v2343_v55  ;;  %v5382_v60 = vpack.c.bf16 %v2354_v52, %v2345_v12 }
 0x48b   : > { %v2159_v47 = vadd.f32 1e-05, %v2151_v61  ;;  %v2342_v61 = vld [vmem:[%s8268_s6 + $0x140] sm:$0xff] }
 0x48c   : > { %v2134_v9 = vpop.xlane.xlu0 %2133 }
 0x48d   : > { %5492 = vrsqrt.f32 %v2159_v47  ;;  %v2152_v10 = vmul.f32 0.020408163, %v2134_v9 }
 0x48f   : > { %v2160_v14 = vadd.f32 1e-05, %v2152_v10 }
 0x490   : > { %v2137_v15 = vpop.xlane.xlu1 %2136 }
 0x491   : > { %5494 = vrsqrt.f32 %v2160_v14  ;;  %v2153_v16 = vmul.f32 0.020408163, %v2137_v15  ;;  %v2344_v14 = vld [vmem:[%s8268_s6 + $0x150] sm:$0xff]  ;;  %v2353_v15 = vld [vmem:[%s8268_s6 + $0x198] sm:$0xff] }
 0x493   : > { %v5491_v18 = vpop.eup %5490  ;;  %v2161_v19 = vadd.f32 1e-05, %v2153_v16 }
 0x494   : > { %v2174_v20 = vmul.f32 %v5491_v18, %v7164_v11  ;;  %v2140_v21 = vpop.xlane.xlu0 %2139 }
 0x495   : > { %5496 = vrsqrt.f32 %v2161_v19  ;;  %v2154_v23 = vmul.f32 0.020408163, %v2140_v21  ;;  %v5384_v19 = vpack.c.bf16 %v2353_v15, %v2344_v14 }
 0x496   : > { %v2222_v56 = vmul.f32 %v7158_v5, %v2174_v20  ;;  %v2317_v5 = vld [vmem:[%s8268_s6 + $0x78] sm:$0xff] }
 0x497   : > { %v5493_v25 = vpop.eup %5492  ;;  %v2162_v26 = vadd.f32 1e-05, %v2154_v23  ;;  %v5376_v46 = vpack.c.bf16 %v2317_v5, %v2308_v31  ;;  %v2360_v31 = vld [vmem:[%s8268_s6 + $0x1d0] sm:$0x1]  ;;  %v2263_v5 = vpop.permute.xlu1 %2262 }
 0x498   : > { %v2175_v11 = vmul.f32 %v5493_v25, %v7170_v17  ;;  %v2270_v32 = vadd.f32 %v7146_v62, %v2222_v56  ;;  %v2336_v62 = vld [vmem:[%s8268_s6 + $0x110] sm:$0xff]  ;;  %v2361_v56 = vld [vmem:[%s8268_s6 + $0x1d8] sm:$0x1] }
 0x499   : > { %5498 = vrsqrt.f32 %v2162_v26  ;;  %v5378_v50 = vpack.c.bf16 %v2336_v62, %v2327_v36 }
 0x49a   : > { %vm2278_vm13 = vcmp.gt.f32.partialorder %v2270_v32, 0.0  ;;  %v2286_v17 = vmul.f32 0.2, %v2270_v32  ;;  %v2223_v37 = vmul.f32 %v7148_v1, %v2175_v11  ;;  %v2335_v1 = vld [vmem:[%s8268_s6 + $0x108] sm:$0xff]  ;;  %v2362_v11 = vld [vmem:[%s8268_s6 + $0x1e0] sm:$0x1] }
 0x49b   : > { %v5495_v44 = vpop.eup %5494  ;;  %v5380_v57 = vpack.c.bf16 %v2335_v1, %v2326_v48 }
 0x49c   : > { %v2176_v59 = vmul.f32 %v5495_v44, %v7175_v22  ;;  %v7370_v49 = vsel %vm2278_vm13, %v2270_v32, %v2286_v17  ;;  %v2271_v63 = vadd.f32 %v7150_v2, %v2223_v37  ;;  %v2215_v34 = vpop.permute.xlu0 %2214 }
 0x49d   : > { %4443 = vmatmul.mubr.msk.f32.vlgmr.msra.gmra.mrb[48].mxu1 %vm2077_vm11, %v7370_v49  ;;  %4453 = vmatmul.mubr.msk.f32.vlgmr.msra.gmra.mrb[56].mxu0 %vm2077_vm11, %v7370_v49 }
 0x49e   : > { %2487 = vmatprep.mubr.f32.mxu1 %v5534_v0  ;;  %2600 = vmatprep.mubr.f32.mxu0 %v5534_v0  ;;  %vm2279_vm14 = vcmp.gt.f32.partialorder %v2271_v63, 0.0  ;;  %v2287_v2 = vmul.f32 0.2, %v2271_v63  ;;  %v2224_v22 = vmul.f32 %v7162_v8, %v2176_v59  ;;  %v2351_v8 = vld [vmem:[%s8268_s6 + $0x188] sm:$0xff] }
 0x49f   : > { %v5497_v24 = vpop.eup %5496  ;;  %5365 = vmatpush1.bf16.msra.mxu1 %v5364_v45  ;;  %5377 = vmatpush1.bf16.msra.mxu0 %v5376_v46  ;;  %v5372_v18 = vpack.c.bf16 %v2351_v8, %v2342_v61  ;;  %v2346_v61 = vld [vmem:[%s8268_s6 + $0x160] sm:$0xff]  ;;  %v2364_v8 = vld [vmem:[%s8268_s6 + $0x1f0] sm:$0x1] }
 0x4a0   : > { %v2177_v47 = vmul.f32 %v5497_v24, %v7180_v27  ;;  %v7393_v9 = vsel %vm2279_vm14, %v2271_v63, %v2287_v2  ;;  %v2272_v10 = vadd.f32 %v7152_v42, %v2224_v22  ;;  %5367 = vmatprep.subr.bf16.mxu1 %v5366_v51  ;;  %5379 = vmatprep.subr.bf16.mxu0 %v5378_v50 }
 0x4a1   : > { %4444 = vmatmul.mubr.msk.f32.gmra.mrb[50].mxu1 %vm2077_vm11, %v7393_v9  ;;  %4454 = vmatmul.mubr.msk.f32.gmra.mrb[58].mxu0 %vm2077_vm11, %v7393_v9 }
 0x4a2   : > { %2493 = vmatprep.mubr.f32.mxu1 %v5534_v0  ;;  %2606 = vmatprep.mubr.f32.mxu0 %v5534_v0  ;;  %vm2280_vm15 = vcmp.gt.f32.partialorder %v2272_v10, 0.0  ;;  %v2288_v42 = vmul.f32 0.2, %v2272_v10  ;;  %v2225_v27 = vmul.f32 %v7154_v3, %v2177_v47  ;;  %v2363_v3 = vld [vmem:[%s8268_s6 + $0x1e8] sm:$0x1] }
 0x4a3   : > { %v5499_v16 = vpop.eup %5498  ;;  %5369 = vmatpush1.bf16.msra.mxu1 %v5368_v28  ;;  %5381 = vmatpush1.bf16.msra.mxu0 %v5380_v57  ;;  %v2328_v57 = vld [vmem:[%s8268_s6 + $0xd0] sm:$0xff]  ;;  %v2355_v47 = vld [vmem:[%s8268_s6 + $0x1a8] sm:$0xff] }
 0x4a4   : > { %v2178_v20 = vmul.f32 %v5499_v16, %v7185_v33  ;;  %v7413_v21 = vsel %vm2280_vm15, %v2272_v10, %v2288_v42  ;;  %v2273_v23 = vadd.f32 %v7156_v4, %v2225_v27  ;;  %5371 = vmatprep.subr.bf16.mxu1 %v5370_v58  ;;  %5383 = vmatprep.subr.bf16.mxu0 %v5382_v60  ;;  %v2310_v4 = vld [vmem:[%s8268_s6 + $0x40] sm:$0xff]  ;;  %v2319_v33 = vld [vmem:[%s8268_s6 + $0x88] sm:$0xff]  ;;  %v2337_v58 = vld [vmem:[%s8268_s6 + $0x118] sm:$0xff] }
 0x4a5   : > { %4445 = vmatmul.mubr.msk.f32.gmra.mrb[52].mxu1 %vm2077_vm11, %v7413_v21  ;;  %4455 = vmatmul.mubr.msk.f32.gmra.mrb[60].mxu0 %vm2077_vm11, %v7413_v21  ;;  %v7446_v32 = vpack.c.bf16 %v2319_v33, %v2310_v4  ;;  %v5390_v60 = vpack.c.bf16 %v2337_v58, %v2328_v57  ;;  %v5394_v10 = vpack.c.bf16 %v2355_v47, %v2346_v61 }
 0x4a6   : > { %2499 = vmatprep.mubr.f32.mxu1 %v5534_v0  ;;  %2612 = vmatprep.mubr.f32.mxu0 %v5534_v0  ;;  %vm2281_vm1 = vcmp.gt.f32.partialorder %v2273_v23, 0.0  ;;  %v2289_v25 = vmul.f32 0.2, %v2273_v23  ;;  %v2226_v26 = vmul.f32 %v7160_v7, %v2178_v20 }
 0x4a7   : > { %5373 = vmatpush1.bf16.msra.mxu1 %v5372_v18  ;;  %5385 = vmatpush1.bf16.msra.mxu0 %v5384_v19 }
 0x4a8   : > { %v7435_v29 = vsel %vm2281_vm1, %v2273_v23, %v2289_v25  ;;  %v2274_v30 = vadd.f32 %v7166_v13, %v2226_v26  ;;  %4461 = vmatprep.subr.msk.mxu1 %vm2389_vm12, %v2361_v56  ;;  %4471 = vmatprep.subr.msk.mxu0 %vm2389_vm12, %v2363_v3 }
 0x4a9   : > { %4446 = vmatmul.mubr.msk.f32.gmra.mrb[54].mxu1 %vm2077_vm11, %v7435_v29  ;;  %4456 = vmatmul.mubr.msk.f32.gmra.mrb[62].mxu0 %vm2077_vm11, %v7435_v29 }
 0x4aa   : > { %2505 = vmatprep.mubr.f32.mxu1 %v5534_v0  ;;  %2618 = vmatprep.mubr.f32.mxu0 %v5534_v0  ;;  %vm2282_vm2 = vcmp.gt.f32.partialorder %v2274_v30, 0.0  ;;  %v2290_v7 = vmul.f32 0.2, %v2274_v30 }
 0x4ab   : > { %4462 = vmatpush1.msk.msra.mxu1 %vm2389_vm12, %v2360_v31  ;;  %4472 = vmatpush1.msk.msra.mxu0 %vm2389_vm12, %v2362_v11 }
 0x4ac   : > { %v7456_v13 = vsel %vm2282_vm2, %v2274_v30, %v2290_v7  ;;  %5387 = vmatprep.subr.bf16.mxu1 %v7446_v32 }
 0x4ad   : > { %4447 = vmatmul.mubr.msk.f32.gmra.mrb[56].mxu1 %vm2077_vm11, %v7456_v13  ;;  %4457 = vmatmul.mubr.msk.f32.gmra.mrb[64].mxu0 %vm2077_vm11, %v7456_v13 }
 0x4ae   : > { %2511 = vmatprep.mubr.f32.mxu1 %v5534_v0  ;;  %2624 = vmatprep.mubr.f32.mxu0 %v5534_v0 }
 0x4c5   : > { %v2143_v35 = vpop.xlane.xlu1 %2142 }
 0x4c6   : > { %v2155_v36 = vmul.f32 0.020408163, %v2143_v35 }
 0x4c8   : > { %v2163_v62 = vadd.f32 1e-05, %v2155_v36 }
 0x4c9   : > { %v2149_v17 = vpop.xlane.xlu1 %2148  ;;  %v2146_v37 = vpop.xlane.xlu0 %2145 }
 0x4ca   : > { %5500 = vrsqrt.f32 %v2163_v62  ;;  %v2157_v39 = vmul.f32 0.020408163, %v2149_v17  ;;  %v2156_v40 = vmul.f32 0.020408163, %v2146_v37 }
 0x4cc   : > { %v2165_v44 = vadd.f32 1e-05, %v2157_v39  ;;  %v2164_v45 = vadd.f32 1e-05, %v2156_v40 }
 0x4cd   : > { %v2268_v22 = vpop.permute.xlu1 %2267 }
 0x4ce   : > { %5502 = vrsqrt.f32 %v2165_v44 }
 0x4cf   : > { %5504 = vrsqrt.f32 %v2164_v45 }
 0x4d1   : > { %v2220_v6 = vpop.permute.xlu0 %2219 }
 0x4d4   : > { %v5501_v46 = vpop.eup %5500 }
 0x4d5   : > { %v2179_v51 = vmul.f32 %v5501_v46, %v7286_v38 }
 0x4d7   : > { %v2227_v48 = vmul.f32 %v7321_v53, %v2179_v51 }
 0x4d8   : > { %v5503_v1 = vpop.eup %5502 }
 0x4d9   : > { %v5505_v55 = vpop.eup %5504  ;;  %v2181_v59 = vmul.f32 %v5503_v1, %v7292_v43  ;;  %v2275_v63 = vadd.f32 %v7323_v54, %v2227_v48 }
 0x4da   : > { %v2180_v50 = vmul.f32 %v5505_v55, %v7289_v41 }
 0x4db   : > { %v2229_v12 = vmul.f32 %v2220_v6, %v2181_v59  ;;  %vm2283_vm3 = vcmp.gt.f32.partialorder %v2275_v63, 0.0  ;;  %v2291_v52 = vmul.f32 0.2, %v2275_v63 }
 0x4dc   : > { %v2228_v2 = vmul.f32 %v2215_v34, %v2180_v50 }
 0x4dd   : > { %v7470_v28 = vsel %vm2283_vm3, %v2275_v63, %v2291_v52  ;;  %v2277_v24 = vadd.f32 %v2268_v22, %v2229_v12 }
 0x4de   : > { %4448 = vmatmul.mubr.msk.f32.gmra.mrb[58].mxu1 %vm2077_vm11, %v7470_v28  ;;  %4458 = vmatmul.mubr.msk.f32.gmra.mrb[66].mxu0 %vm2077_vm11, %v7470_v28  ;;  %v2276_v38 = vadd.f32 %v2263_v5, %v2228_v2 }
 0x4df   : > { %2517 = vmatprep.mubr.f32.mxu1 %v5534_v0  ;;  %2630 = vmatprep.mubr.f32.mxu0 %v5534_v0  ;;  %v2293_v43 = vmul.f32 0.2, %v2277_v24  ;;  %vm2285_vm5 = vcmp.gt.f32.partialorder %v2277_v24, 0.0 }
 0x4e0   : > { %vm2284_vm4 = vcmp.gt.f32.partialorder %v2276_v38, 0.0  ;;  %v2292_v41 = vmul.f32 0.2, %v2276_v38 }
 0x4e1   : > { %v2301_v54 = vsel %vm2285_vm5, %v2277_v24, %v2293_v43 }
 0x4e2   : > { %v2300_v53 = vsel %vm2284_vm4, %v2276_v38, %v2292_v41 }
 0x4e3   : > { %4449 = vmatmul.mubr.msk.f32.gmra.mrb[60].mxu1 %vm2077_vm11, %v2300_v53  ;;  %4459 = vmatmul.mubr.msk.f32.gmra.mrb[68].mxu0 %vm2077_vm11, %v2300_v53 }
 0x4e4   : > { %2523 = vmatprep.mubr.f32.mxu1 %v5534_v0  ;;  %2636 = vmatprep.mubr.f32.mxu0 %v5534_v0 }
 0x4e7   : > { %4450 = vmatmul.mubr.msk.f32.gmra.mrb[62].mxu1 %vm2077_vm11, %v2301_v54  ;;  %4460 = vmatmul.mubr.msk.f32.gmra.mrb[70].mxu0 %vm2077_vm11, %v2301_v54 }
 0x4e8   : > { %2707 = vmatprep.mubr.f32.mxu1 %v5534_v0  ;;  %2820 = vmatprep.mubr.f32.mxu0 %v5534_v0 }
 0x4eb   : > { %4463 = vmatmul.mubr.msk.f32.vlgmr.msra.gmra.mrb[64].mxu1 %vm2077_vm11, %v7370_v49  ;;  %4473 = vmatmul.mubr.msk.f32.vlgmr.msra.gmra.mrb[72].mxu0 %vm2077_vm11, %v7370_v49 }
 0x4ec   : > { %2713 = vmatprep.mubr.f32.mxu1 %v5534_v0  ;;  %2826 = vmatprep.mubr.f32.mxu0 %v5534_v0 }
 0x4ed   : > { %5389 = vmatpush3.bf16.msra.mxu1 %v7446_v32 }
 0x4ee   : > { %5391 = vmatprep.subr.bf16.mxu1 %v5390_v60 }
 0x4ef   : > { %4464 = vmatmul.mubr.msk.f32.gmra.mrb[66].mxu1 %vm2077_vm11, %v7393_v9  ;;  %4474 = vmatmul.mubr.msk.f32.gmra.mrb[74].mxu0 %vm2077_vm11, %v7393_v9 }
 0x4f0   : > { %2719 = vmatprep.mubr.f32.mxu1 %v5534_v0  ;;  %2832 = vmatprep.mubr.f32.mxu0 %v5534_v0 }
 0x4f1   : > { %5393 = vmatpush3.bf16.msra.mxu1 %v5390_v60 }
 0x4f2   : > { %5395 = vmatprep.subr.bf16.mxu1 %v5394_v10 }
 0x4f3   : > { %4465 = vmatmul.mubr.msk.f32.gmra.mrb[68].mxu1 %vm2077_vm11, %v7413_v21  ;;  %4475 = vmatmul.mubr.msk.f32.gmra.mrb[76].mxu0 %vm2077_vm11, %v7413_v21 }
 0x4f4   : > { %2725 = vmatprep.mubr.f32.mxu1 %v5534_v0  ;;  %2838 = vmatprep.mubr.f32.mxu0 %v5534_v0 }
 0x4f5   : > { %5397 = vmatpush3.bf16.msra.mxu1 %v5394_v10 }
 0x4f6   : > { %4832 = vmatprep.subr.msk.mxu1 %vm2389_vm12, %v2364_v8 }
 0x4f7   : > { %4466 = vmatmul.mubr.msk.f32.gmra.mrb[70].mxu1 %vm2077_vm11, %v7435_v29  ;;  %4476 = vmatmul.mubr.msk.f32.gmra.mrb[78].mxu0 %vm2077_vm11, %v7435_v29 }
 0x4f8   : > { %2731 = vmatprep.mubr.f32.mxu1 %v5534_v0  ;;  %2844 = vmatprep.mubr.f32.mxu0 %v5534_v0 }
 0x4f9   : > { %4833 = vmatpush3.msk.msra.mxu1 %vm2389_vm12, %v2364_v8 }
 0x4fb   : > { %4467 = vmatmul.mubr.msk.f32.gmra.mrb[72].mxu1 %vm2077_vm11, %v7456_v13  ;;  %4477 = vmatmul.mubr.msk.f32.gmra.mrb[80].mxu0 %vm2077_vm11, %v7456_v13 }
 0x4fc   : > { %2737 = vmatprep.mubr.f32.mxu1 %v5534_v0  ;;  %2850 = vmatprep.mubr.f32.mxu0 %v5534_v0 }
 0x4ff   : > { %4468 = vmatmul.mubr.msk.f32.gmra.mrb[74].mxu1 %vm2077_vm11, %v7470_v28  ;;  %4478 = vmatmul.mubr.msk.f32.gmra.mrb[82].mxu0 %vm2077_vm11, %v7470_v28 }
 0x500   : > { %2743 = vmatprep.mubr.f32.mxu1 %v5534_v0  ;;  %2856 = vmatprep.mubr.f32.mxu0 %v5534_v0 }
 0x503   : > { %4469 = vmatmul.mubr.msk.f32.gmra.mrb[76].mxu1 %vm2077_vm11, %v2300_v53  ;;  %4479 = vmatmul.mubr.msk.f32.gmra.mrb[84].mxu0 %vm2077_vm11, %v2300_v53 }
 0x504   : > { %2749 = vmatprep.mubr.f32.mxu1 %v5534_v0  ;;  %2862 = vmatprep.mubr.f32.mxu0 %v5534_v0  ;;  %v3047_v0 = vld [vmem:[%s8269_s7 + $0x8] sm:$0xff] }
 0x507   : > { %4470 = vmatmul.mubr.msk.f32.gmra.mrb[78].mxu1 %vm2077_vm11, %v2301_v54  ;;  %4480 = vmatmul.mubr.msk.f32.gmra.mrb[86].mxu0 %vm2077_vm11, %v2301_v54 }
 0x508   : > { %4834 = vmatprep.mubr.msk.f32.mxu1 %vm2077_vm11, %v7370_v49  ;;  %3311 = vmatprep.mubr.f32.mxu0 %v3047_v0  ;;  %v3049_v49 = vld [vmem:[%s8269_s7 + $0x18] sm:$0xff] }
 0x50b   : > { %4835 = vmatmul.mubr.msk.f32.vlgmr.msra.gmra.mrb[80].mxu1 %vm2077_vm11, %v7393_v9 }
 0x50c   : > { %4837 = vmatprep.mubr.msk.f32.mxu1 %vm2077_vm11, %v7413_v21 }
 0x50f   : > { %4838 = vmatmul.mubr.msk.f32.gmra.mrb[82].mxu1 %vm2077_vm11, %v7435_v29 }
 0x510   : > { %4840 = vmatprep.mubr.msk.f32.mxu1 %vm2077_vm11, %v7456_v13 }
 0x513   : > { %4841 = vmatmul.mubr.msk.f32.gmra.mrb[84].mxu1 %vm2077_vm11, %v7470_v28 }
 0x514   : > { %4843 = vmatprep.mubr.msk.f32.mxu1 %vm2077_vm11, %v2300_v53 }
 0x517   : > { %4844 = vmatmul.mubr.msk.f32.gmra.mrb[86].mxu1 %vm2077_vm11, %v2301_v54 }
 0x518   : > { %3456 = vmatprep.mubr.f32.mxu1 %v3049_v49 }
 0x570   : > { %v2483_v9 = vpop.f32.mrb[48].mxu1  ;;  %v2596_v14 = vpop.f32.mrb[56].mxu0 }
 0x571   : > { %v2485_v15 = vpop.f32.mrb[49].mxu1  ;;  %v2598_v42 = vpop.f32.mrb[57].mxu0 }
 0x574   : > { %v2489_v27 = vpop.f32.mrb[50].mxu1  ;;  %v2602_v16 = vpop.f32.mrb[58].mxu0 }
 0x575   : > { %v5400_v18 = vpack.c.bf16 %v2489_v27, %v2483_v9  ;;  %v5398_v19 = vpack.c.bf16 %v2602_v16, %v2596_v14  ;;  %v2491_v20 = vpop.f32.mrb[51].mxu1  ;;  %v2604_v21 = vpop.f32.mrb[59].mxu0 }
 0x576   : > { %v5416_v23 = vpack.c.bf16 %v2491_v20, %v2485_v15  ;;  %v5414_v56 = vpack.c.bf16 %v2604_v21, %v2598_v42 }
 0x577   : > { %5399 = vmatprep.subr.bf16.mxu0 %v5398_v19 }
 0x578   : > { %v2495_v3 = vpop.f32.mrb[52].mxu1  ;;  %v2608_v4 = vpop.f32.mrb[60].mxu0  ;;  %5401 = vmatpush3.bf16.msra.mxu0 %v5400_v18 }
 0x579   : > { %v2497_v33 = vpop.f32.mrb[53].mxu1  ;;  %v2610_v25 = vpop.f32.mrb[61].mxu0 }
 0x57c   : > { %v2501_v26 = vpop.f32.mrb[54].mxu1  ;;  %v2614_v29 = vpop.f32.mrb[62].mxu0 }
 0x57d   : > { %v5404_v30 = vpack.c.bf16 %v2501_v26, %v2495_v3  ;;  %v5402_v31 = vpack.c.bf16 %v2614_v29, %v2608_v4  ;;  %v2503_v11 = vpop.f32.mrb[55].mxu1  ;;  %v2616_v32 = vpop.f32.mrb[63].mxu0  ;;  %v3052_v4 = vld [vmem:[%s8269_s7 + $0x30] sm:$0xff]  ;;  %v3051_v26 = vld [vmem:[%s8269_s7 + $0x28] sm:$0xff] }
 0x57e   : > { %v5420_v7 = vpack.c.bf16 %v2503_v11, %v2497_v33  ;;  %v5418_v13 = vpack.c.bf16 %v2616_v32, %v2610_v25  ;;  %v3057_v32 = vld [vmem:[%s8269_s7 + $0x58] sm:$0xff] }
 0x57f   : > { %5403 = vmatprep.subr.bf16.mxu0 %v5402_v31 }
 0x580   : > { %v2507_v5 = vpop.f32.mrb[56].mxu1  ;;  %v2620_v34 = vpop.f32.mrb[64].mxu0  ;;  %5405 = vmatpush3.bf16.msra.mxu0 %v5404_v30 }
 0x581   : > { %v2509_v35 = vpop.f32.mrb[57].mxu1  ;;  %v2622_v36 = vpop.f32.mrb[65].mxu0 }
 0x5b1   : > { %v2513_v62 = vpop.f32.mrb[58].mxu1  ;;  %v2626_v17 = vpop.f32.mrb[66].mxu0 }
 0x5b2   : > { %v5408_v37 = vpack.c.bf16 %v2513_v62, %v2507_v5  ;;  %v5406_v39 = vpack.c.bf16 %v2626_v17, %v2620_v34  ;;  %v2515_v40 = vpop.f32.mrb[59].mxu1  ;;  %v2628_v44 = vpop.f32.mrb[67].mxu0  ;;  %v3062_v17 = vld [vmem:[%s8269_s7 + $0x80] sm:$0xff] }
 0x5b3   : > { %v5424_v45 = vpack.c.bf16 %v2515_v40, %v2509_v35  ;;  %v5422_v46 = vpack.c.bf16 %v2628_v44, %v2622_v36  ;;  %v3056_v35 = vld [vmem:[%s8269_s7 + $0x50] sm:$0xff]  ;;  %v3061_v40 = vld [vmem:[%s8269_s7 + $0x78] sm:$0xff] }
 0x5b4   : > { %5407 = vmatprep.subr.bf16.mxu0 %v5406_v39 }
 0x5b5   : > { %5409 = vmatpush3.bf16.msra.mxu0 %v5408_v37 }
 0x5b6   : > { %v2519_v51 = vpop.f32.mrb[60].mxu1  ;;  %v2632_v48 = vpop.f32.mrb[68].mxu0 }
 0x5b7   : > { %v2521_v1 = vpop.f32.mrb[61].mxu1  ;;  %v2634_v55 = vpop.f32.mrb[69].mxu0 }
 0x5ba   : > { %v2525_v59 = vpop.f32.mrb[62].mxu1  ;;  %v2638_v63 = vpop.f32.mrb[70].mxu0 }
 0x5bb   : > { %v5412_v50 = vpack.c.bf16 %v2525_v59, %v2519_v51  ;;  %v5410_v6 = vpack.c.bf16 %v2638_v63, %v2632_v48  ;;  %v2527_v12 = vpop.f32.mrb[63].mxu1  ;;  %v2640_v52 = vpop.f32.mrb[71].mxu0  ;;  %v3067_v48 = vld [vmem:[%s8269_s7 + $0xa8] sm:$0xff]  ;;  %v3066_v63 = vld [vmem:[%s8269_s7 + $0xa0] sm:$0xff] }
 0x5bc   : > { %v5428_v2 = vpack.c.bf16 %v2527_v12, %v2521_v1  ;;  %v5426_v22 = vpack.c.bf16 %v2640_v52, %v2634_v55  ;;  %v3072_v12 = vld [vmem:[%s8269_s7 + $0xd0] sm:$0xff] }
 0x5bd   : > { %5411 = vmatprep.subr.bf16.mxu0 %v5410_v6 }
 0x5be   : > { %v2709_v28 = vpop.f32.mrb[64].mxu1  ;;  %v2822_v24 = vpop.f32.mrb[72].mxu0  ;;  %5413 = vmatpush3.bf16.msra.mxu0 %v5412_v50 }
 0x5bf   : > { %v7566_v38 = vpop.f32.mrb[65].mxu1  ;;  %v7568_v41 = vpop.f32.mrb[73].mxu0  ;;  %5415 = vmatprep.subr.bf16.mxu0 %v5414_v56 }
 0x5c2   : > { %v2715_v43 = vpop.f32.mrb[66].mxu1  ;;  %v2828_v53 = vpop.f32.mrb[74].mxu0  ;;  %5417 = vmatpush3.bf16.msra.mxu0 %v5416_v23  ;;  %v3046_v23 = vld [vmem:[%s8269_s7] sm:$0xff] }
 0x5c3   : > { %v5432_v54 = vpack.c.bf16 %v2715_v43, %v2709_v28  ;;  %v5430_v57 = vpack.c.bf16 %v2828_v53, %v2822_v24  ;;  %v7570_v58 = vpop.f32.mrb[67].mxu1  ;;  %v7572_v60 = vpop.f32.mrb[75].mxu0  ;;  %5419 = vmatprep.subr.bf16.mxu0 %v5418_v13  ;;  %v3077_v24 = vld [vmem:[%s8269_s7 + $0xf8] sm:$0xff] }
 0x5c4   : > { %v5448_v61 = vpack.c.bf16 %v7570_v58, %v7566_v38  ;;  %v5446_v47 = vpack.c.bf16 %v7572_v60, %v7568_v41  ;;  %v3076_v38 = vld [vmem:[%s8269_s7 + $0xf0] sm:$0xff]  ;;  %v3081_v58 = vld [vmem:[%s8269_s7 + $0x118] sm:$0xff] }
 0x5c5   : > { %5431 = vmatprep.subr.bf16.mxu1 %v5430_v57 }
 0x5c6   : > { %v2721_v10 = vpop.f32.mrb[68].mxu1  ;;  %v2834_v8 = vpop.f32.mrb[76].mxu0  ;;  %5421 = vmatpush3.bf16.msra.mxu0 %v5420_v7  ;;  %5433 = vmatpush3.bf16.msra.mxu1 %v5432_v54  ;;  %v3082_v54 = vld [vmem:[%s8269_s7 + $0x120] sm:$0xff] }
 0x5c7   : > { %v7578_v0 = vpop.f32.mrb[69].mxu1  ;;  %v7580_v49 = vpop.f32.mrb[77].mxu0  ;;  %5423 = vmatprep.subr.bf16.mxu0 %v5422_v46 }
 0x5ca   : > { %v2727_v9 = vpop.f32.mrb[70].mxu1  ;;  %v2840_v14 = vpop.f32.mrb[78].mxu0  ;;  %5425 = vmatpush3.bf16.msra.mxu0 %v5424_v45 }
 0x5cb   : > { %v5436_v15 = vpack.c.bf16 %v2727_v9, %v2721_v10  ;;  %v5434_v42 = vpack.c.bf16 %v2840_v14, %v2834_v8  ;;  %v7582_v27 = vpop.f32.mrb[71].mxu1  ;;  %v7584_v16 = vpop.f32.mrb[79].mxu0  ;;  %5427 = vmatprep.subr.bf16.mxu0 %v5426_v22  ;;  %v3086_v10 = vld [vmem:[%s8269_s7 + $0x140] sm:$0xff]  ;;  %v3048_v8 = vld [vmem:[%s8269_s7 + $0x10] sm:$0xff]  ;;  %v3091_v9 = vld [vmem:[%s8269_s7 + $0x168] sm:$0xff] }
 0x5cc   : > { %v5452_v18 = vpack.c.bf16 %v7582_v27, %v7578_v0  ;;  %v5450_v19 = vpack.c.bf16 %v7584_v16, %v7580_v49  ;;  %v3092_v0 = vld [vmem:[%s8269_s7 + $0x170] sm:$0xff]  ;;  %v3054_v49 = vld [vmem:[%s8269_s7 + $0x40] sm:$0xff]  ;;  %v3053_v14 = vld [vmem:[%s8269_s7 + $0x38] sm:$0xff] }
 0x5cd   : > { %5435 = vmatprep.subr.bf16.mxu1 %v5434_v42  ;;  %v3059_v42 = vld [vmem:[%s8269_s7 + $0x68] sm:$0xff]  ;;  %v3096_v27 = vld [vmem:[%s8269_s7 + $0x190] sm:$0xff]  ;;  %v3058_v16 = vld [vmem:[%s8269_s7 + $0x60] sm:$0xff] }
 0x5ce   : > { %v2733_v20 = vpop.f32.mrb[72].mxu1  ;;  %v2846_v21 = vpop.f32.mrb[80].mxu0  ;;  %5429 = vmatpush3.bf16.msra.mxu0 %v5428_v2  ;;  %5437 = vmatpush3.bf16.msra.mxu1 %v5436_v15  ;;  %v3071_v2 = vld [vmem:[%s8269_s7 + $0xc8] sm:$0xff]  ;;  %v3097_v15 = vld [vmem:[%s8269_s7 + $0x198] sm:$0xff] }
 0x5cf   : > { %v7593_v56 = vpop.f32.mrb[73].mxu1  ;;  %v7595_v3 = vpop.f32.mrb[81].mxu0 }
 0x5d1   : > { %3312 = vmatmul.mubr.f32.vlgmr.msra.gmra.mrb[88].mxu0 %v3046_v23  ;;  %v3107_v23 = vld [vmem:[%s8269_s7 + $0x1e8] sm:$0xff] }
 0x5d2   : > { %v2739_v33 = vpop.f32.mrb[74].mxu1  ;;  %v2852_v25 = vpop.f32.mrb[82].mxu0  ;;  %3316 = vmatprep.mubr.f32.mxu0 %v3052_v4  ;;  %v3068_v4 = vld [vmem:[%s8269_s7 + $0xb0] sm:$0xff] }
 0x5d3   : > { %v5440_v29 = vpack.c.bf16 %v2739_v33, %v2733_v20  ;;  %v5438_v30 = vpack.c.bf16 %v2852_v25, %v2846_v21  ;;  %v2741_v31 = vpop.f32.mrb[75].mxu1  ;;  %v2854_v11 = vpop.f32.mrb[83].mxu0  ;;  %v3101_v20 = vld [vmem:[%s8269_s7 + $0x1b8] sm:$0xff]  ;;  %v3063_v21 = vld [vmem:[%s8269_s7 + $0x88] sm:$0xff]  ;;  %v3112_v33 = vld [vmem:[%s8269_s7 + $0x210] sm:$0xff] }
 0x5d4   : > { %v5456_v7 = vpack.c.bf16 %v2741_v31, %v7593_v56  ;;  %v5454_v13 = vpack.c.bf16 %v2854_v11, %v7595_v3  ;;  %v3069_v56 = vld [vmem:[%s8269_s7 + $0xb8] sm:$0xff]  ;;  %v3106_v3 = vld [vmem:[%s8269_s7 + $0x1e0] sm:$0xff]  ;;  %v3079_v31 = vld [vmem:[%s8269_s7 + $0x108] sm:$0xff] }
 0x5d5   : > { %3317 = vmatmul.mubr.f32.gmra.mrb[90].mxu0 %v3051_v26  ;;  %5439 = vmatprep.subr.bf16.mxu1 %v5438_v30  ;;  %v3074_v25 = vld [vmem:[%s8269_s7 + $0xe0] sm:$0xff]  ;;  %v3111_v26 = vld [vmem:[%s8269_s7 + $0x208] sm:$0xff]  ;;  %v3117_v30 = vld [vmem:[%s8269_s7 + $0x238] sm:$0xff] }
 0x5d6   : > { %v2745_v5 = vpop.f32.mrb[76].mxu1  ;;  %v2858_v34 = vpop.f32.mrb[84].mxu0  ;;  %5441 = vmatpush3.bf16.msra.mxu1 %v5440_v29  ;;  %3321 = vmatprep.mubr.f32.mxu0 %v3057_v32  ;;  %v3073_v29 = vld [vmem:[%s8269_s7 + $0xd8] sm:$0xff]  ;;  %v3116_v11 = vld [vmem:[%s8269_s7 + $0x230] sm:$0xff]  ;;  %v3078_v32 = vld [vmem:[%s8269_s7 + $0x100] sm:$0xff] }
 0x5d7   : > { %v2747_v36 = vpop.f32.mrb[77].mxu1  ;;  %v2860_v62 = vpop.f32.mrb[85].mxu0 }
 0x5d9   : > { %3322 = vmatmul.mubr.f32.gmra.mrb[92].mxu0 %v3056_v35  ;;  %v3089_v35 = vld [vmem:[%s8269_s7 + $0x158] sm:$0xff] }
 0x5da   : > { %v2751_v37 = vpop.f32.mrb[78].mxu1  ;;  %v2864_v39 = vpop.f32.mrb[86].mxu0  ;;  %3326 = vmatprep.mubr.f32.mxu0 %v3062_v17  ;;  %v3055_v17 = vld [vmem:[%s8269_s7 + $0x48] sm:$0xff] }
 0x5db   : > { %v5444_v44 = vpack.c.bf16 %v2751_v37, %v2745_v5  ;;  %v5442_v45 = vpack.c.bf16 %v2864_v39, %v2858_v34  ;;  %v2753_v46 = vpop.f32.mrb[79].mxu1  ;;  %v2866_v51 = vpop.f32.mrb[87].mxu0  ;;  %v3121_v5 = vld [vmem:[%s8269_s7 + $0x258] sm:$0xff]  ;;  %v3083_v34 = vld [vmem:[%s8269_s7 + $0x128] sm:$0xff]  ;;  %v3094_v37 = vld [vmem:[%s8269_s7 + $0x180] sm:$0xff] }
 0x5dc   : > { %v5460_v1 = vpack.c.bf16 %v2753_v46, %v2747_v36  ;;  %v5458_v55 = vpack.c.bf16 %v2866_v51, %v2860_v62  ;;  %v3050_v36 = vld [vmem:[%s8269_s7 + $0x20] sm:$0xff]  ;;  %v3088_v62 = vld [vmem:[%s8269_s7 + $0x150] sm:$0xff] }
 0x5dd   : > { %3327 = vmatmul.mubr.f32.gmra.mrb[94].mxu0 %v3061_v40  ;;  %5443 = vmatprep.subr.bf16.mxu1 %v5442_v45  ;;  %v3060_v39 = vld [vmem:[%s8269_s7 + $0x70] sm:$0xff]  ;;  %v3093_v40 = vld [vmem:[%s8269_s7 + $0x178] sm:$0xff]  ;;  %v3099_v45 = vld [vmem:[%s8269_s7 + $0x1a8] sm:$0xff] }
 0x5de   : > { %v4836_v59 = vpop.f32.mrb[80].mxu1  ;;  %5445 = vmatpush3.bf16.msra.mxu1 %v5444_v44  ;;  %3331 = vmatprep.mubr.f32.mxu0 %v3067_v48  ;;  %v3065_v44 = vld [vmem:[%s8269_s7 + $0x98] sm:$0xff]  ;;  %v3070_v46 = vld [vmem:[%s8269_s7 + $0xc0] sm:$0xff]  ;;  %v3075_v48 = vld [vmem:[%s8269_s7 + $0xe8] sm:$0xff] }
 0x5df   : > { %v2935_v50 = vpop.f32.mrb[81].mxu1  ;;  %5447 = vmatprep.subr.bf16.mxu1 %v5446_v47  ;;  %v3087_v47 = vld [vmem:[%s8269_s7 + $0x148] sm:$0xff]  ;;  %v3098_v51 = vld [vmem:[%s8269_s7 + $0x1a0] sm:$0xff] }
 0x5e0   : > { %v5462_v6 = vpack.c.bf16 %v4836_v59, %v2935_v50  ;;  %v3103_v59 = vld [vmem:[%s8269_s7 + $0x1c8] sm:$0xff]  ;;  %v3109_v50 = vld [vmem:[%s8269_s7 + $0x1f8] sm:$0xff] }
 0x5e1   : > { %3332 = vmatmul.mubr.f32.gmra.mrb[96].mxu0 %v3066_v63  ;;  %v3085_v63 = vld [vmem:[%s8269_s7 + $0x138] sm:$0xff] }
 0x5e2   : > { %v4839_v52 = vpop.f32.mrb[82].mxu1  ;;  %5449 = vmatpush3.bf16.msra.mxu1 %v5448_v61  ;;  %5463 = vmatprep.subr.bf16.mxu0 %v5462_v6 }
 0x5e3   : > { %v2945_v22 = vpop.f32.mrb[83].mxu1  ;;  %5451 = vmatprep.subr.bf16.mxu1 %v5450_v19  ;;  %5465 = vmatpush3.bf16.msra.mxu0 %v5462_v6  ;;  %v3064_v19 = vld [vmem:[%s8269_s7 + $0x90] sm:$0xff]  ;;  %v3090_v6 = vld [vmem:[%s8269_s7 + $0x160] sm:$0xff] }
 0x5e4   : > { %v5466_v28 = vpack.c.bf16 %v4839_v52, %v2945_v22  ;;  %3336 = vmatprep.mubr.f32.mxu0 %v3072_v12  ;;  %v3108_v12 = vld [vmem:[%s8269_s7 + $0x1f0] sm:$0xff]  ;;  %v3095_v52 = vld [vmem:[%s8269_s7 + $0x188] sm:$0xff] }
 0x5e5   : > { %3337 = vmatmul.mubr.f32.gmra.mrb[98].mxu0 %v3071_v2  ;;  %v3114_v2 = vld [vmem:[%s8269_s7 + $0x220] sm:$0xff]  ;;  %v3100_v22 = vld [vmem:[%s8269_s7 + $0x1b0] sm:$0xff] }
 0x5e6   : > { %v4842_v41 = vpop.f32.mrb[84].mxu1  ;;  %5453 = vmatpush3.bf16.msra.mxu1 %v5452_v18  ;;  %5467 = vmatprep.subr.bf16.mxu0 %v5466_v28  ;;  %v3102_v18 = vld [vmem:[%s8269_s7 + $0x1c0] sm:$0xff] }
 0x5e7   : > { %v2955_v43 = vpop.f32.mrb[85].mxu1  ;;  %5455 = vmatprep.subr.bf16.mxu1 %v5454_v13  ;;  %5469 = vmatpush3.bf16.msra.mxu0 %v5466_v28  ;;  %v3084_v13 = vld [vmem:[%s8269_s7 + $0x130] sm:$0xff]  ;;  %v3113_v28 = vld [vmem:[%s8269_s7 + $0x218] sm:$0xff] }
 0x5e8   : > { %v5470_v53 = vpack.c.bf16 %v4842_v41, %v2955_v43  ;;  %3341 = vmatprep.mubr.f32.mxu0 %v3077_v24  ;;  %v3105_v24 = vld [vmem:[%s8269_s7 + $0x1d8] sm:$0xff]  ;;  %v3119_v41 = vld [vmem:[%s8269_s7 + $0x248] sm:$0xff]  ;;  %v3118_v43 = vld [vmem:[%s8269_s7 + $0x240] sm:$0xff] }
 0x5e9   : > { %3342 = vmatmul.mubr.f32.gmra.mrb[100].mxu0 %v3076_v38  ;;  %v3110_v38 = vld [vmem:[%s8269_s7 + $0x200] sm:$0xff] }
 0x5ea   : > { %v4845_v57 = vpop.f32.mrb[86].mxu1  ;;  %5457 = vmatpush3.bf16.msra.mxu1 %v5456_v7  ;;  %5471 = vmatprep.subr.bf16.mxu0 %v5470_v53  ;;  %v3122_v7 = vld [vmem:[%s8269_s7 + $0x260] sm:$0xff] }
 0x5eb   : > { %v2965_v60 = vpop.f32.mrb[87].mxu1  ;;  %5459 = vmatprep.subr.bf16.mxu1 %v5458_v55  ;;  %5473 = vmatpush3.bf16.msra.mxu0 %v5470_v53  ;;  %v3080_v55 = vld [vmem:[%s8269_s7 + $0x110] sm:$0xff]  ;;  %v3115_v53 = vld [vmem:[%s8269_s7 + $0x228] sm:$0xff] }
 0x5ec   : > { %v5474_v61 = vpack.c.bf16 %v4845_v57, %v2965_v60  ;;  %3346 = vmatprep.mubr.f32.mxu0 %v3082_v54  ;;  %v3124_v54 = vld [vmem:[%s8269_s7 + $0x270] sm:$0xff]  ;;  %v3125_v60 = vld [vmem:[%s8269_s7 + $0x278] sm:$0xff] }
 0x5ed   : > { %3347 = vmatmul.mubr.f32.gmra.mrb[102].mxu0 %v3081_v58  ;;  %v3120_v57 = vld [vmem:[%s8269_s7 + $0x250] sm:$0xff]  ;;  %v3123_v58 = vld [vmem:[%s8269_s7 + $0x268] sm:$0xff] }
 0x5ee   : > { %5461 = vmatpush3.bf16.msra.mxu1 %v5460_v1  ;;  %5475 = vmatprep.subr.bf16.mxu0 %v5474_v61  ;;  %v3104_v1 = vld [vmem:[%s8269_s7 + $0x1d0] sm:$0xff] }
 0x5ef   : > { %5477 = vmatpush3.bf16.msra.mxu0 %v5474_v61  ;;  %3351 = vmatprep.mubr.f32.mxu0 %v3087_v47 }
 0x5f1   : > { %3352 = vmatmul.mubr.f32.gmra.mrb[104].mxu0 %v3086_v10  ;;  %3457 = vmatmul.mubr.f32.vlgmr.msra.gmra.mrb[88].mxu1 %v3048_v8 }
 0x5f2   : > { %3356 = vmatprep.mubr.f32.mxu0 %v3092_v0  ;;  %3461 = vmatprep.mubr.f32.mxu1 %v3054_v49 }
 0x5f5   : > { %3357 = vmatmul.mubr.f32.gmra.mrb[106].mxu0 %v3091_v9  ;;  %3462 = vmatmul.mubr.f32.gmra.mrb[90].mxu1 %v3053_v14 }
 0x5f6   : > { %3361 = vmatprep.mubr.f32.mxu0 %v3097_v15  ;;  %3466 = vmatprep.mubr.f32.mxu1 %v3059_v42 }
 0x5f9   : > { %3362 = vmatmul.mubr.f32.gmra.mrb[108].mxu0 %v3096_v27  ;;  %3467 = vmatmul.mubr.f32.gmra.mrb[92].mxu1 %v3058_v16 }
 0x5fa   : > { %3366 = vmatprep.mubr.f32.mxu0 %v3102_v18  ;;  %3471 = vmatprep.mubr.f32.mxu1 %v3064_v19 }
 0x5fd   : > { %3367 = vmatmul.mubr.f32.gmra.mrb[110].mxu0 %v3101_v20  ;;  %3472 = vmatmul.mubr.f32.gmra.mrb[94].mxu1 %v3063_v21 }
 0x5fe   : > { %3371 = vmatprep.mubr.f32.mxu0 %v3107_v23  ;;  %3476 = vmatprep.mubr.f32.mxu1 %v3069_v56 }
 0x601   : > { %3372 = vmatmul.mubr.f32.gmra.mrb[112].mxu0 %v3106_v3  ;;  %3477 = vmatmul.mubr.f32.gmra.mrb[96].mxu1 %v3068_v4 }
 0x602   : > { %3376 = vmatprep.mubr.f32.mxu0 %v3112_v33  ;;  %3481 = vmatprep.mubr.f32.mxu1 %v3074_v25 }
 0x605   : > { %3377 = vmatmul.mubr.f32.gmra.mrb[114].mxu0 %v3111_v26  ;;  %3482 = vmatmul.mubr.f32.gmra.mrb[98].mxu1 %v3073_v29 }
 0x606   : > { %3381 = vmatprep.mubr.f32.mxu0 %v3117_v30  ;;  %3486 = vmatprep.mubr.f32.mxu1 %v3079_v31 }
 0x609   : > { %3382 = vmatmul.mubr.f32.gmra.mrb[116].mxu0 %v3116_v11  ;;  %3487 = vmatmul.mubr.f32.gmra.mrb[100].mxu1 %v3078_v32 }
 0x60a   : > { %3386 = vmatprep.mubr.f32.mxu0 %v3122_v7  ;;  %3491 = vmatprep.mubr.f32.mxu1 %v3084_v13 }
 0x60d   : > { %3387 = vmatmul.mubr.f32.gmra.mrb[118].mxu0 %v3121_v5  ;;  %3492 = vmatmul.mubr.f32.gmra.mrb[102].mxu1 %v3083_v34 }
 0x60e   : > { %3496 = vmatprep.mubr.f32.mxu1 %v3089_v35  ;;  %4862 = vmatprep.mubr.msk.f32.mxu0 %vm3198_vm6, %v3050_v36 }
 0x611   : > { %3497 = vmatmul.mubr.f32.gmra.mrb[104].mxu1 %v3088_v62  ;;  %4863 = vmatmul.mubr.msk.f32.vlgmr.msra.gmra.mrb[120].mxu0 %vm3198_vm6, %v3055_v17 }
 0x612   : > { %3501 = vmatprep.mubr.f32.mxu1 %v3094_v37  ;;  %4865 = vmatprep.mubr.msk.f32.mxu0 %vm3198_vm6, %v3060_v39 }
 0x615   : > { %3502 = vmatmul.mubr.f32.gmra.mrb[106].mxu1 %v3093_v40  ;;  %4866 = vmatmul.mubr.msk.f32.gmra.mrb[122].mxu0 %vm3198_vm6, %v3065_v44 }
 0x616   : > { %3506 = vmatprep.mubr.f32.mxu1 %v3099_v45  ;;  %4868 = vmatprep.mubr.msk.f32.mxu0 %vm3198_vm6, %v3070_v46 }
 0x619   : > { %3507 = vmatmul.mubr.f32.gmra.mrb[108].mxu1 %v3098_v51  ;;  %4869 = vmatmul.mubr.msk.f32.gmra.mrb[124].mxu0 %vm3198_vm6, %v3075_v48 }
 0x61a   : > { %3511 = vmatprep.mubr.f32.mxu1 %v3104_v1  ;;  %4871 = vmatprep.mubr.msk.f32.mxu0 %vm3198_vm6, %v3080_v55 }
 0x61d   : > { %3512 = vmatmul.mubr.f32.gmra.mrb[110].mxu1 %v3103_v59  ;;  %4872 = vmatmul.mubr.msk.f32.gmra.mrb[126].mxu0 %vm3198_vm6, %v3085_v63 }
 0x61e   : > { %3516 = vmatprep.mubr.f32.mxu1 %v3109_v50  ;;  %4874 = vmatprep.mubr.msk.f32.mxu0 %vm3198_vm6, %v3090_v6 }
 0x621   : > { %3517 = vmatmul.mubr.f32.gmra.mrb[112].mxu1 %v3108_v12  ;;  %4875 = vmatmul.mubr.msk.f32.gmra.mrb[128].mxu0 %vm3198_vm6, %v3095_v52 }
 0x622   : > { %3521 = vmatprep.mubr.f32.mxu1 %v3114_v2  ;;  %4877 = vmatprep.mubr.msk.f32.mxu0 %vm3198_vm6, %v3100_v22 }
 0x625   : > { %3522 = vmatmul.mubr.f32.gmra.mrb[114].mxu1 %v3113_v28  ;;  %4878 = vmatmul.mubr.msk.f32.gmra.mrb[130].mxu0 %vm3198_vm6, %v3105_v24 }
 0x626   : > { %3526 = vmatprep.mubr.f32.mxu1 %v3119_v41  ;;  %4880 = vmatprep.mubr.msk.f32.mxu0 %vm3198_vm6, %v3110_v38 }
 0x629   : > { %3527 = vmatmul.mubr.f32.gmra.mrb[116].mxu1 %v3118_v43  ;;  %4881 = vmatmul.mubr.msk.f32.gmra.mrb[132].mxu0 %vm3198_vm6, %v3115_v53 }
 0x62a   : > { %3531 = vmatprep.mubr.f32.mxu1 %v3124_v54  ;;  %4883 = vmatprep.mubr.msk.f32.mxu0 %vm3198_vm6, %v3120_v57 }
 0x62d   : > { %3532 = vmatmul.mubr.f32.gmra.mrb[118].mxu1 %v3123_v58  ;;  %4884 = vmatmul.mubr.msk.f32.gmra.mrb[134].mxu0 %vm3198_vm6, %v3125_v60 }
 0x6a4   : > { %v4668_v61 = vpop.f32.mrb[88].mxu0 }
 0x6a5   : > { %v4669_v47 = vpop.f32.mrb[89].mxu0 }
 0x6a6   : > { %v4670_v10 = vadd.f32 %v4669_v47, %v4668_v61 }
 0x6a8   : > { %v4671_v8 = vpop.f32.mrb[90].mxu0 }
 0x6a9   : > { %v4672_v0 = vpop.f32.mrb[91].mxu0 }
 0x6aa   : > { %v4673_v49 = vadd.f32 %v4672_v0, %v4671_v8 }
 0x6ac   : > { %v4674_v9 = vpop.f32.mrb[92].mxu0 }
 0x6ad   : > { %v4675_v14 = vpop.f32.mrb[93].mxu0 }
 0x6ae   : > { %v4676_v15 = vadd.f32 %v4675_v14, %v4674_v9 }
 0x6b0   : > { %v4677_v42 = vpop.f32.mrb[94].mxu0 }
 0x6b1   : > { %v4678_v27 = vpop.f32.mrb[95].mxu0 }
 0x6b2   : > { %v4679_v16 = vadd.f32 %v4678_v27, %v4677_v42 }
 0x6b4   : > { %v4680_v18 = vpop.f32.mrb[96].mxu0 }
 0x6b5   : > { %v4681_v19 = vpop.f32.mrb[97].mxu0 }
 0x6b6   : > { %v4682_v20 = vadd.f32 %v4681_v19, %v4680_v18 }
 0x6b8   : > { %v4683_v21 = vpop.f32.mrb[98].mxu0 }
 0x6b9   : > { %v4684_v23 = vpop.f32.mrb[99].mxu0 }
 0x6ba   : > { %v4685_v56 = vadd.f32 %v4684_v23, %v4683_v21 }
 0x6bc   : > { %v4686_v3 = vpop.f32.mrb[100].mxu0 }
 0x6bd   : > { %v4687_v4 = vpop.f32.mrb[101].mxu0 }
 0x6be   : > { %v4688_v33 = vadd.f32 %v4687_v4, %v4686_v3 }
 0x6c0   : > { %v4689_v25 = vpop.f32.mrb[102].mxu0 }
 0x6c1   : > { %v4690_v26 = vpop.f32.mrb[103].mxu0 }
 0x6c2   : > { %v4691_v29 = vadd.f32 %v4690_v26, %v4689_v25 }
 0x6c4   : > { %v4748_v30 = vpop.f32.mrb[88].mxu1  ;;  %v4692_v31 = vpop.f32.mrb[104].mxu0 }
 0x6c5   : > { %v4749_v11 = vpop.f32.mrb[89].mxu1  ;;  %v4693_v32 = vpop.f32.mrb[105].mxu0 }
 0x6c6   : > { %v4750_v7 = vadd.f32 %v4749_v11, %v4748_v30  ;;  %v7855_v13 = vadd.f32 %v4693_v32, %v4692_v31 }
 0x6c8   : > { %v4751_v5 = vpop.f32.mrb[90].mxu1  ;;  %v4695_v34 = vpop.f32.mrb[106].mxu0  ;;  %v3459_v35 = vadd.f32 %v4750_v7, %v4670_v10 }
 0x6c9   : > { %v4752_v36 = vpop.f32.mrb[91].mxu1  ;;  %v4696_v62 = vpop.f32.mrb[107].mxu0 }
 0x6ca   : > { %v4753_v17 = vadd.f32 %v4752_v36, %v4751_v5  ;;  %v7857_v37 = vadd.f32 %v4696_v62, %v4695_v34 }
 0x6cc   : > { %v4754_v39 = vpop.f32.mrb[92].mxu1  ;;  %v4698_v40 = vpop.f32.mrb[108].mxu0  ;;  %v3464_v44 = vadd.f32 %v4753_v17, %v4673_v49 }
 0x6cd   : > { %v4755_v45 = vpop.f32.mrb[93].mxu1  ;;  %v4699_v46 = vpop.f32.mrb[109].mxu0 }
 0x6ce   : > { %v4756_v51 = vadd.f32 %v4755_v45, %v4754_v39  ;;  %v7859_v48 = vadd.f32 %v4699_v46, %v4698_v40 }
 0x6d0   : > { %v4757_v1 = vpop.f32.mrb[94].mxu1  ;;  %v4701_v55 = vpop.f32.mrb[110].mxu0  ;;  %v3469_v59 = vadd.f32 %v4756_v51, %v4676_v15 }
 0x6d1   : > { %v4758_v63 = vpop.f32.mrb[95].mxu1  ;;  %v4702_v50 = vpop.f32.mrb[111].mxu0 }
 0x6d2   : > { %v4759_v6 = vadd.f32 %v4758_v63, %v4757_v1  ;;  %v7861_v12 = vadd.f32 %v4702_v50, %v4701_v55 }
 0x6d4   : > { %v4760_v52 = vpop.f32.mrb[96].mxu1  ;;  %v4704_v2 = vpop.f32.mrb[112].mxu0  ;;  %v3474_v22 = vadd.f32 %v4759_v6, %v4679_v16 }
 0x6d5   : > { %v4761_v28 = vpop.f32.mrb[97].mxu1  ;;  %v4705_v24 = vpop.f32.mrb[113].mxu0 }
 0x6d6   : > { %v4762_v41 = vadd.f32 %v4761_v28, %v4760_v52  ;;  %v7863_v38 = vadd.f32 %v4705_v24, %v4704_v2 }
 0x6d8   : > { %v4763_v43 = vpop.f32.mrb[98].mxu1  ;;  %v4707_v53 = vpop.f32.mrb[114].mxu0  ;;  %v3479_v54 = vadd.f32 %v4762_v41, %v4682_v20 }
 0x6d9   : > { %v4764_v57 = vpop.f32.mrb[99].mxu1  ;;  %v4708_v58 = vpop.f32.mrb[115].mxu0 }
 0x6da   : > { %v4765_v60 = vadd.f32 %v4764_v57, %v4763_v43  ;;  %v7865_v61 = vadd.f32 %v4708_v58, %v4707_v53 }
 0x6dc   : > { %v4766_v47 = vpop.f32.mrb[100].mxu1  ;;  %v4710_v10 = vpop.f32.mrb[116].mxu0  ;;  %v3484_v8 = vadd.f32 %v4765_v60, %v4685_v56 }
 0x6dd   : > { %v4767_v0 = vpop.f32.mrb[101].mxu1  ;;  %v4711_v49 = vpop.f32.mrb[117].mxu0 }
 0x6de   : > { %v4768_v9 = vadd.f32 %v4767_v0, %v4766_v47  ;;  %v7867_v14 = vadd.f32 %v4711_v49, %v4710_v10 }
 0x6e0   : > { %v4769_v15 = vpop.f32.mrb[102].mxu1  ;;  %v4713_v42 = vpop.f32.mrb[118].mxu0  ;;  %v3489_v27 = vadd.f32 %v4768_v9, %v4688_v33 }
 0x6e1   : > { %v4770_v16 = vpop.f32.mrb[103].mxu1  ;;  %v4714_v18 = vpop.f32.mrb[119].mxu0 }
 0x6e2   : > { %v4771_v19 = vadd.f32 %v4770_v16, %v4769_v15  ;;  %v7869_v20 = vadd.f32 %v4714_v18, %v4713_v42 }
 0x6e4   : > { %v4772_v21 = vpop.f32.mrb[104].mxu1  ;;  %v4864_v23 = vpop.f32.mrb[120].mxu0  ;;  %v3494_v3 = vadd.f32 %v4771_v19, %v4691_v29 }
 0x6e5   : > { %v7871_v4 = vadd.f32 %v4864_v23, %v3464_v44  ;;  %v4773_v25 = vpop.f32.mrb[105].mxu1  ;;  %v3603_v56 = vpop.f32.mrb[121].mxu0 }
 0x6e6   : > { %v4774_v26 = vadd.f32 %v4773_v25, %v4772_v21  ;;  %v7873_v30 = vadd.f32 %v3603_v56, %v3459_v35 }
 0x6e7   : > { %v3717_v31 = vsel %vm391_vm0, %v7871_v4, 0.0 }
 0x6e8   : > { %v4775_v11 = vpop.f32.mrb[106].mxu1  ;;  %v4867_v33 = vpop.f32.mrb[122].mxu0  ;;  %3718 = vadd.xlane.f32.xlu1 %v3717_v31  ;;  %v3714_v32 = vsel %vm391_vm0, %v7873_v30, 0.0  ;;  %v3499_v7 = vadd.f32 %v4774_v26, %v7855_v13 }
 0x6e9   : > { %v7880_v5 = vadd.f32 %v4867_v33, %v3474_v22  ;;  %v4776_v29 = vpop.f32.mrb[107].mxu1  ;;  %v3613_v34 = vpop.f32.mrb[123].mxu0  ;;  %3715 = vadd.xlane.f32.xlu0 %v3714_v32 }
 0x6ea   : > { %v4777_v36 = vadd.f32 %v4776_v29, %v4775_v11  ;;  %v7882_v62 = vadd.f32 %v3613_v34, %v3469_v59 }
 0x6eb   : > { %v3723_v35 = vsel %vm391_vm0, %v7880_v5, 0.0 }
 0x6ec   : > { %v4778_v17 = vpop.f32.mrb[108].mxu1  ;;  %v4870_v39 = vpop.f32.mrb[124].mxu0  ;;  %3724 = vadd.xlane.f32.xlu1 %v3723_v35  ;;  %v3504_v40 = vadd.f32 %v4777_v36, %v7857_v37  ;;  %v3720_v1 = vsel %vm391_vm0, %v7882_v62, 0.0 }
 0x6ed   : > { %v7887_v44 = vadd.f32 %v4870_v39, %v3484_v8  ;;  %v4779_v45 = vpop.f32.mrb[109].mxu1  ;;  %v3623_v13 = vpop.f32.mrb[125].mxu0 }
 0x6ee   : > { %v4780_v46 = vadd.f32 %v4779_v45, %v4778_v17  ;;  %v7889_v51 = vadd.f32 %v3623_v13, %v3479_v54 }
 0x6ef   : > { %v3729_v22 = vsel %vm391_vm0, %v7887_v44, 0.0 }
 0x6f0   : > { %v4781_v55 = vpop.f32.mrb[110].mxu1  ;;  %v4873_v59 = vpop.f32.mrb[126].mxu0  ;;  %3721 = vadd.xlane.f32.xlu1 %v3720_v1  ;;  %v3509_v63 = vadd.f32 %v4780_v46, %v7859_v48  ;;  %v3726_v58 = vsel %vm391_vm0, %v7889_v51, 0.0 }
 0x6f1   : > { %v7894_v50 = vadd.f32 %v4873_v59, %v3494_v3  ;;  %v4782_v6 = vpop.f32.mrb[111].mxu1  ;;  %v3633_v52 = vpop.f32.mrb[127].mxu0 }
 0x6f2   : > { %v4783_v37 = vadd.f32 %v4782_v6, %v4781_v55  ;;  %v7896_v2 = vadd.f32 %v3633_v52, %v3489_v27 }
 0x6f3   : > { %v3735_v56 = vsel %vm391_vm0, %v7894_v50, 0.0 }
 0x6f4   : > { %v4784_v28 = vpop.f32.mrb[112].mxu1  ;;  %v4876_v24 = vpop.f32.mrb[128].mxu0  ;;  %3730 = vadd.xlane.f32.xlu1 %v3729_v22  ;;  %v3514_v41 = vadd.f32 %v4783_v37, %v7861_v12  ;;  %v3732_v42 = vsel %vm391_vm0, %v7896_v2, 0.0 }
 0x6f5   : > { %v7901_v43 = vadd.f32 %v4876_v24, %v3504_v40  ;;  %v4785_v53 = vpop.f32.mrb[113].mxu1  ;;  %v3643_v54 = vpop.f32.mrb[129].mxu0 }
 0x6f6   : > { %v4786_v48 = vadd.f32 %v4785_v53, %v4784_v28  ;;  %v7903_v57 = vadd.f32 %v3643_v54, %v3499_v7 }
 0x6f7   : > { %v3741_v60 = vsel %vm391_vm0, %v7901_v43, 0.0 }
 0x6f8   : > { %v4787_v47 = vpop.f32.mrb[114].mxu1  ;;  %v4879_v10 = vpop.f32.mrb[130].mxu0  ;;  %3727 = vadd.xlane.f32.xlu1 %v3726_v58  ;;  %3742 = vadd.xlane.f32.xlu0 %v3741_v60  ;;  %v3519_v8 = vadd.f32 %v4786_v48, %v7863_v38  ;;  %v3738_v27 = vsel %vm391_vm0, %v7903_v57, 0.0 }
 0x6f9   : > { %v7910_v12 = vadd.f32 %v4879_v10, %v3514_v41  ;;  %v4788_v0 = vpop.f32.mrb[115].mxu1  ;;  %v3653_v49 = vpop.f32.mrb[131].mxu0 }
 0x6fa   : > { %v4789_v9 = vadd.f32 %v4788_v0, %v4787_v47  ;;  %v7912_v15 = vadd.f32 %v3653_v49, %v3509_v63 }
 0x6fb   : > { %v3747_v26 = vsel %vm391_vm0, %v7910_v12, 0.0 }
 0x6fc   : > { %v4790_v16 = vpop.f32.mrb[116].mxu1  ;;  %v3524_v18 = vadd.f32 %v4789_v9, %v7865_v61  ;;  %v4882_v19 = vpop.f32.mrb[132].mxu0  ;;  %3733 = vadd.xlane.f32.xlu1 %v3732_v42  ;;  %3739 = vadd.xlane.f32.xlu0 %v3738_v27  ;;  %v3744_v34 = vsel %vm391_vm0, %v7912_v15, 0.0 }
 0x6fd   : > { %v4791_v38 = vpop.f32.mrb[117].mxu1  ;;  %v3663_v21 = vpop.f32.mrb[133].mxu0 }
 0x6fe   : > { %v7919_v23 = vadd.f32 %v4882_v19, %v3524_v18  ;;  %v4792_v3 = vadd.f32 %v4791_v38, %v4790_v16  ;;  %v7921_v25 = vadd.f32 %v3663_v21, %v3519_v8 }
 0x700   : > { %v4793_v31 = vpop.f32.mrb[118].mxu1  ;;  %v4885_v11 = vpop.f32.mrb[134].mxu0  ;;  %3736 = vadd.xlane.f32.xlu1 %v3735_v56  ;;  %3748 = vadd.xlane.f32.xlu0 %v3747_v26  ;;  %v3529_v61 = vadd.f32 %v4792_v3, %v7867_v14  ;;  %v3750_v17 = vsel %vm391_vm0, %v7921_v25, 0.0  ;;  %v3753_v14 = vsel %vm391_vm0, %v7919_v23, 0.0 }
 0x701   : > { %v4794_v33 = vpop.f32.mrb[119].mxu1  ;;  %v3673_v32 = vpop.f32.mrb[135].mxu0 }
 0x702   : > { %v4795_v7 = vadd.f32 %v4794_v33, %v4793_v31  ;;  %v7928_v29 = vadd.f32 %v3673_v32, %v3529_v61 }
 0x704   : > { %v3534_v36 = vadd.f32 %v4795_v7, %v7869_v20  ;;  %3745 = vadd.xlane.f32.xlu0 %v3744_v34  ;;  %v3756_v39 = vsel %vm391_vm0, %v7928_v29, 0.0 }
 0x706   : > { %v7933_v35 = vadd.f32 %v4885_v11, %v3534_v36 }
 0x708   : > { %3751 = vadd.xlane.f32.xlu0 %v3750_v17  ;;  %v3759_v40 = vsel %vm391_vm0, %v7933_v35, 0.0 }
 0x70c   : > { %3754 = vadd.xlane.f32.xlu0 %v3753_v14 }
 0x710   : > { %3757 = vadd.xlane.f32.xlu0 %v3756_v39 }
 0x714   : > { %3760 = vadd.xlane.f32.xlu0 %v3759_v40 }
 0x775   : > { %v3719_v20 = vpop.xlane.xlu1 %3718 }
 0x776   : > { %v3716_v45 = vpop.xlane.xlu0 %3715 }
 0x779   : > { %v3725_v13 = vpop.xlane.xlu1 %3724 }
 0x77d   : > { %v3722_v59 = vpop.xlane.xlu1 %3721 }
 0x781   : > { %v3731_v22 = vpop.xlane.xlu1 %3730 }
 0x785   : > { %v3743_v46 = vpop.xlane.xlu0 %3742  ;;  %v3728_v54 = vpop.xlane.xlu1 %3727 }
 0x786   : > { %v3763_v1 = vadd.f32 %v3743_v46, %v3719_v20 }
 0x788   : > { %v3771_v55 = vmul.f32 0.03125, %v3763_v1 }
 0x789   : > { %v3740_v63 = vpop.xlane.xlu0 %3739  ;;  %v3734_v0 = vpop.xlane.xlu1 %3733 }
 0x78a   : > { %v3762_v6 = vadd.f32 %v3740_v63, %v3716_v45  ;;  %3785 = vperm.xlu0 %5489, %v3771_v55  }
 0x78c   : > { %v3770_v52 = vmul.f32 0.03125, %v3762_v6 }
 0x78d   : > { %v3749_v37 = vpop.xlane.xlu0 %3748  ;;  %v3737_v16 = vpop.xlane.xlu1 %3736 }
 0x78e   : > { %3780 = vperm.xlu1 %5488, %v3770_v52   ;;  %v3765_v41 = vadd.f32 %v3749_v37, %v3725_v13 }
 0x790   : > { %v3773_v60 = vmul.f32 0.03125, %v3765_v41 }
 0x791   : > { %v3746_v28 = vpop.xlane.xlu0 %3745 }
 0x792   : > { %v3764_v24 = vadd.f32 %v3746_v28, %v3722_v59 }
 0x794   : > { %v3772_v53 = vmul.f32 0.03125, %v3764_v24 }
 0x795   : > { %v3752_v48 = vpop.xlane.xlu0 %3751 }
 0x796   : > { %v3766_v58 = vadd.f32 %v3752_v48, %v3728_v54  ;;  %3790 = vperm.xlu1 %5488, %v3772_v53  }
 0x798   : > { %v3774_v47 = vmul.f32 0.03125, %v3766_v58 }
 0x799   : > { %v3755_v10 = vpop.xlane.xlu0 %3754 }
 0x79a   : > { %v3767_v8 = vadd.f32 %v3755_v10, %v3731_v22  ;;  %3795 = vperm.xlu1 %5488, %v3773_v60   ;;  %3800 = vperm.xlu0 %5489, %v3774_v47  }
 0x79c   : > { %v3775_v49 = vmul.f32 0.03125, %v3767_v8 }
 0x79d   : > { %v3758_v9 = vpop.xlane.xlu0 %3757 }
 0x79e   : > { %v3768_v42 = vadd.f32 %v3758_v9, %v3734_v0  ;;  %3805 = vperm.xlu1 %5488, %v3775_v49   ;;  %v3682_v49 = vld [vmem:[%s8270_s8] sm:$0xff] }
 0x79f   : > { %v3698_v9 = vld [vmem:[%s8271_s9] sm:$0xff] }
 0x7a0   : > { %v3776_v27 = vmul.f32 0.03125, %v3768_v42  ;;  %v3683_v42 = vld [vmem:[%s8270_s8 + $0x8] sm:$0xff] }
 0x7a1   : > { %v3761_v18 = vpop.xlane.xlu0 %3760 }
 0x7a2   : > { %v3769_v19 = vadd.f32 %v3761_v18, %v3737_v16  ;;  %3810 = vperm.xlu0 %5489, %v3776_v27   ;;  %v3700_v27 = vld [vmem:[%s8271_s9 + $0x10] sm:$0xff]  ;;  %v3686_v18 = vld [vmem:[%s8270_s8 + $0x20] sm:$0xff] }
 0x7a3   : > { %v3684_v16 = vld [vmem:[%s8270_s8 + $0x10] sm:$0xff] }
 0x7a4   : > { %v3777_v38 = vmul.f32 0.03125, %v3769_v19  ;;  %v3699_v19 = vld [vmem:[%s8271_s9 + $0x8] sm:$0xff] }
 0x7a6   : > { %3815 = vperm.xlu1 %5488, %v3777_v38   ;;  %v3702_v38 = vld [vmem:[%s8271_s9 + $0x20] sm:$0xff] }
 0x809   : > { %v3786_v21 = vpop.permute.xlu0 %3785 }
 0x80a   : > { %v7944_v3 = vsub.f32 %v7871_v4, %v3786_v21  ;;  %v7947_v56 = vsub.f32 %v7901_v43, %v3786_v21  ;;  %v3685_v21 = vld [vmem:[%s8270_s8 + $0x18] sm:$0xff] }
 0x80c   : > { %v3843_v26 = vmul.f32 %v7947_v56, %v7947_v56  ;;  %v3835_v31 = vmul.f32 %v7944_v3, %v7944_v3 }
 0x80d   : > { %v3781_v11 = vpop.permute.xlu1 %3780 }
 0x80e   : > { %v7954_v61 = vsub.f32 %v7873_v30, %v3781_v11  ;;  %v7957_v33 = vsub.f32 %v7903_v57, %v3781_v11  ;;  %v3877_v32 = vsel %vm391_vm0, %v3843_v26, 0.0  ;;  %v3853_v4 = vsel %vm391_vm0, %v3835_v31, 0.0  ;;  %v3688_v26 = vld [vmem:[%s8270_s8 + $0x30] sm:$0xff]  ;;  %v3701_v31 = vld [vmem:[%s8271_s9 + $0x18] sm:$0xff] }
 0x80f   : > { %3878 = vadd.xlane.f32.xlu0 %v3877_v32  ;;  %3854 = vadd.xlane.f32.xlu1 %v3853_v4  ;;  %v3689_v11 = vld [vmem:[%s8270_s8 + $0x38] sm:$0xff]  ;;  %v3687_v32 = vld [vmem:[%s8270_s8 + $0x28] sm:$0xff]  ;;  %v3690_v4 = vld [vmem:[%s8270_s8 + $0x40] sm:$0xff] }
 0x810   : > { %v3834_v43 = vmul.f32 %v7954_v61, %v7954_v61  ;;  %v3842_v34 = vmul.f32 %v7957_v33, %v7957_v33 }
 0x812   : > { %v3850_v7 = vsel %vm391_vm0, %v3834_v43, 0.0  ;;  %v3874_v36 = vsel %vm391_vm0, %v3842_v34, 0.0  ;;  %v3703_v43 = vld [vmem:[%s8271_s9 + $0x28] sm:$0xff]  ;;  %v3704_v34 = vld [vmem:[%s8271_s9 + $0x30] sm:$0xff] }
 0x813   : > { %3851 = vadd.xlane.f32.xlu0 %v3850_v7  ;;  %v3691_v7 = vld [vmem:[%s8270_s8 + $0x48] sm:$0xff] }
 0x815   : > { %v3791_v30 = vpop.permute.xlu1 %3790 }
 0x816   : > { %v7968_v57 = vsub.f32 %v7882_v62, %v3791_v30  ;;  %v7971_v17 = vsub.f32 %v7912_v15, %v3791_v30  ;;  %v3692_v30 = vld [vmem:[%s8270_s8 + $0x50] sm:$0xff] }
 0x817   : > { %3875 = vadd.xlane.f32.xlu0 %v3874_v36  ;;  %v3705_v36 = vld [vmem:[%s8271_s9 + $0x38] sm:$0xff] }
 0x818   : > { %v3844_v62 = vmul.f32 %v7971_v17, %v7971_v17  ;;  %v3836_v15 = vmul.f32 %v7968_v57, %v7968_v57 }
 0x819   : > { %v3796_v14 = vpop.permute.xlu1 %3795  ;;  %v3801_v20 = vpop.permute.xlu0 %3800 }
 0x81a   : > { %v7974_v39 = vsub.f32 %v7880_v5, %v3796_v14  ;;  %v7977_v40 = vsub.f32 %v7910_v12, %v3796_v14  ;;  %v7988_v46 = vsub.f32 %v7889_v51, %v3801_v20  ;;  %v7991_v5 = vsub.f32 %v7921_v25, %v3801_v20  ;;  %v3706_v14 = vld [vmem:[%s8271_s9 + $0x40] sm:$0xff] }
 0x81b   : > { %v3880_v6 = vsel %vm391_vm0, %v3844_v62, 0.0  ;;  %v3856_v51 = vsel %vm391_vm0, %v3836_v15, 0.0 }
 0x81c   : > { %v3845_v45 = vmul.f32 %v7977_v40, %v7977_v40  ;;  %v3837_v13 = vmul.f32 %v7974_v39, %v7974_v39  ;;  %v3846_v25 = vmul.f32 %v7991_v5, %v7991_v5  ;;  %v3838_v52 = vmul.f32 %v7988_v46, %v7988_v46 }
 0x81d   : > { %v3806_v12 = vpop.permute.xlu1 %3805 }
 0x81e   : > { %v3883_v1 = vsel %vm391_vm0, %v3845_v45, 0.0  ;;  %v3859_v55 = vsel %vm391_vm0, %v3837_v13, 0.0  ;;  %v7996_v59 = vsub.f32 %v7887_v44, %v3806_v12  ;;  %v7999_v63 = vsub.f32 %v7919_v23, %v3806_v12 }
 0x81f   : > { %3884 = vadd.xlane.f32.xlu0 %v3883_v1  ;;  %3860 = vadd.xlane.f32.xlu1 %v3859_v55  ;;  %v3886_v24 = vsel %vm391_vm0, %v3846_v25, 0.0  ;;  %v3862_v41 = vsel %vm391_vm0, %v3838_v52, 0.0 }
 0x820   : > { %v3847_v44 = vmul.f32 %v7999_v63, %v7999_v63  ;;  %v3839_v23 = vmul.f32 %v7996_v59, %v7996_v59 }
 0x821   : > { %v3811_v37 = vpop.permute.xlu0 %3810 }
 0x822   : > { %v8012_v22 = vsub.f32 %v7896_v2, %v3811_v37  ;;  %v8015_v28 = vsub.f32 %v7928_v29, %v3811_v37  ;;  %v3889_v54 = vsel %vm391_vm0, %v3847_v44, 0.0  ;;  %v3865_v48 = vsel %vm391_vm0, %v3839_v23, 0.0 }
 0x823   : > { %3881 = vadd.xlane.f32.xlu0 %v3880_v6  ;;  %3857 = vadd.xlane.f32.xlu1 %v3856_v51 }
 0x824   : > { %v3848_v29 = vmul.f32 %v8015_v28, %v8015_v28  ;;  %v3840_v60 = vmul.f32 %v8012_v22, %v8012_v22 }
 0x825   : > { %v3816_v53 = vpop.permute.xlu1 %3815 }
 0x826   : > { %v8022_v58 = vsub.f32 %v7894_v50, %v3816_v53  ;;  %v8025_v2 = vsub.f32 %v7933_v35, %v3816_v53  ;;  %v3892_v47 = vsel %vm391_vm0, %v3848_v29, 0.0  ;;  %v3868_v10 = vsel %vm391_vm0, %v3840_v60, 0.0 }
 0x827   : > { %3887 = vadd.xlane.f32.xlu0 %v3886_v24  ;;  %3863 = vadd.xlane.f32.xlu1 %v3862_v41  ;;  %v3707_v24 = vld [vmem:[%s8271_s9 + $0x48] sm:$0xff] }
 0x828   : > { %v3849_v8 = vmul.f32 %v8025_v2, %v8025_v2  ;;  %v3841_v50 = vmul.f32 %v8022_v58, %v8022_v58 }
 0x82a   : > { %v3895_v35 = vsel %vm391_vm0, %v3849_v8, 0.0  ;;  %v3871_v0 = vsel %vm391_vm0, %v3841_v50, 0.0 }
 0x82b   : > { %3890 = vadd.xlane.f32.xlu0 %v3889_v54  ;;  %3866 = vadd.xlane.f32.xlu1 %v3865_v48 }
 0x82f   : > { %3893 = vadd.xlane.f32.xlu0 %v3892_v47  ;;  %3869 = vadd.xlane.f32.xlu1 %v3868_v10 }
 0x833   : > { %3896 = vadd.xlane.f32.xlu0 %v3895_v35  ;;  %3872 = vadd.xlane.f32.xlu1 %v3871_v0 }
 0x844   : > { %3988 = vperm.xlu1 %5488, %v3682_v49  }
 0x848   : > { %4084 = vperm.xlu1 %5488, %v3698_v9  }
 0x849   : > { %3993 = vperm.xlu0 %5489, %v3683_v42  }
 0x84c   : > { %4094 = vperm.xlu1 %5488, %v3700_v27  }
 0x84d   : > { %3998 = vperm.xlu0 %5489, %v3684_v16  }
 0x850   : > { %4008 = vperm.xlu1 %5488, %v3686_v18  }
 0x851   : > { %4089 = vperm.xlu0 %5489, %v3699_v19  }
 0x854   : > { %4104 = vperm.xlu1 %5488, %v3702_v38  }
 0x855   : > { %4003 = vperm.xlu0 %5489, %v3685_v21  }
 0x858   : > { %4018 = vperm.xlu1 %5488, %v3688_v26  }
 0x859   : > { %4099 = vperm.xlu0 %5489, %v3701_v31  }
 0x85c   : > { %4023 = vperm.xlu1 %5488, %v3689_v11  }
 0x85d   : > { %4013 = vperm.xlu0 %5489, %v3687_v32  }
 0x860   : > { %4028 = vperm.xlu1 %5488, %v3690_v4  }
 0x861   : > { %4109 = vperm.xlu0 %5489, %v3703_v43  }
 0x864   : > { %4033 = vperm.xlu1 %5488, %v3691_v7  }
 0x865   : > { %4114 = vperm.xlu0 %5489, %v3704_v34  }
 0x868   : > { %4038 = vperm.xlu1 %5488, %v3692_v30  }
 0x869   : > { %4119 = vperm.xlu0 %5489, %v3705_v36  }
 0x86d   : > { %4124 = vperm.xlu0 %5489, %v3706_v14  }
 0x89c   : > { %v3855_v20 = vpop.xlane.xlu1 %3854  ;;  %v3879_v45 = vpop.xlane.xlu0 %3878 }
 0x89d   : > { %v3899_v13 = vadd.f32 %v3879_v45, %v3855_v20  ;;  %v3693_v20 = vld [vmem:[%s8270_s8 + $0x58] sm:$0xff] }
 0x89f   : > { %v3907_v62 = vmul.f32 0.03125, %v3899_v13  ;;  %v3694_v13 = vld [vmem:[%s8270_s8 + $0x60] sm:$0xff] }
 0x8a0   : > { %v3852_v15 = vpop.xlane.xlu0 %3851 }
 0x8a1   : > { %v3915_v12 = vadd.f32 1e-05, %v3907_v62  ;;  %v3708_v62 = vld [vmem:[%s8271_s9 + $0x50] sm:$0xff] }
 0x8a3   : > { %5506 = vrsqrt.f32 %v3915_v12  ;;  %v3709_v12 = vld [vmem:[%s8271_s9 + $0x58] sm:$0xff] }
 0x8a4   : > { %v3876_v1 = vpop.xlane.xlu0 %3875 }
 0x8a5   : > { %v3898_v55 = vadd.f32 %v3876_v1, %v3852_v15  ;;  %v3695_v15 = vld [vmem:[%s8270_s8 + $0x68] sm:$0xff]  ;;  %v3696_v1 = vld [vmem:[%s8270_s8 + $0x70] sm:$0xff] }
 0x8a7   : > { %v3906_v6 = vmul.f32 0.03125, %v3898_v55  ;;  %v3710_v55 = vld [vmem:[%s8271_s9 + $0x60] sm:$0xff] }
 0x8a9   : > { %v3914_v51 = vadd.f32 1e-05, %v3906_v6  ;;  %v3697_v6 = vld [vmem:[%s8270_s8 + $0x78] sm:$0xff] }
 0x8ab   : > { %5508 = vrsqrt.f32 %v3914_v51  ;;  %v3711_v51 = vld [vmem:[%s8271_s9 + $0x68] sm:$0xff] }
 0x8ac   : > { %v3861_v25 = vpop.xlane.xlu1 %3860  ;;  %v3885_v52 = vpop.xlane.xlu0 %3884 }
 0x8ad   : > { %v5507_v37 = vpop.eup %5506  ;;  %v3901_v44 = vadd.f32 %v3885_v52, %v3861_v25  ;;  %v3713_v25 = vld [vmem:[%s8271_s9 + $0x78] sm:$0xff]  ;;  %v3712_v52 = vld [vmem:[%s8271_s9 + $0x70] sm:$0xff] }
 0x8ae   : > { %3937 = vperm.xlu0 %5489, %v5507_v37  }
 0x8af   : > { %v3909_v23 = vmul.f32 0.03125, %v3901_v44 }
 0x8b0   : > { %v3858_v41 = vpop.xlane.xlu1 %3857  ;;  %v3882_v53 = vpop.xlane.xlu0 %3881 }
 0x8b1   : > { %v3917_v54 = vadd.f32 1e-05, %v3909_v23  ;;  %v3900_v48 = vadd.f32 %v3882_v53, %v3858_v41 }
 0x8b2   : > { %4129 = vperm.xlu0 %5489, %v3707_v24  }
 0x8b3   : > { %5510 = vrsqrt.f32 %v3917_v54  ;;  %v3908_v29 = vmul.f32 0.03125, %v3900_v48 }
 0x8b4   : > { %v3864_v60 = vpop.xlane.xlu1 %3863  ;;  %v3888_v47 = vpop.xlane.xlu0 %3887 }
 0x8b5   : > { %v5509_v10 = vpop.eup %5508  ;;  %v3916_v8 = vadd.f32 1e-05, %v3908_v29  ;;  %v3902_v50 = vadd.f32 %v3888_v47, %v3864_v60 }
 0x8b6   : > { %3932 = vperm.xlu1 %5488, %v5509_v10  }
 0x8b7   : > { %5512 = vrsqrt.f32 %v3916_v8  ;;  %v3910_v35 = vmul.f32 0.03125, %v3902_v50 }
 0x8b8   : > { %v3867_v0 = vpop.xlane.xlu1 %3866  ;;  %v3891_v49 = vpop.xlane.xlu0 %3890 }
 0x8b9   : > { %v3918_v9 = vadd.f32 1e-05, %v3910_v35  ;;  %v3903_v42 = vadd.f32 %v3891_v49, %v3867_v0 }
 0x8bb   : > { %5514 = vrsqrt.f32 %v3918_v9  ;;  %v3911_v27 = vmul.f32 0.03125, %v3903_v42 }
 0x8bc   : > { %v3870_v16 = vpop.xlane.xlu1 %3869  ;;  %v3894_v18 = vpop.xlane.xlu0 %3893 }
 0x8bd   : > { %v5511_v19 = vpop.eup %5510  ;;  %v3919_v38 = vadd.f32 1e-05, %v3911_v27  ;;  %v3904_v21 = vadd.f32 %v3894_v18, %v3870_v16 }
 0x8be   : > { %3947 = vperm.xlu1 %5488, %v5511_v19  }
 0x8bf   : > { %5516 = vrsqrt.f32 %v3919_v38  ;;  %v3912_v26 = vmul.f32 0.03125, %v3904_v21 }
 0x8c0   : > { %v3873_v31 = vpop.xlane.xlu1 %3872  ;;  %v3897_v11 = vpop.xlane.xlu0 %3896 }
 0x8c1   : > { %v5513_v32 = vpop.eup %5512  ;;  %v3920_v4 = vadd.f32 1e-05, %v3912_v26  ;;  %v3905_v43 = vadd.f32 %v3897_v11, %v3873_v31  ;;  %v4227_v26 = vld [vmem:[%s8272_s10 + $0x8] sm:$0xff] }
 0x8c2   : > { %3942 = vperm.xlu1 %5488, %v5513_v32  }
 0x8c3   : > { %5518 = vrsqrt.f32 %v3920_v4  ;;  %v3913_v7 = vmul.f32 0.03125, %v3905_v43 }
 0x8c4   : > { %v3989_v23 = vpop.permute.xlu1 %3988 }
 0x8c5   : > { %v5515_v34 = vpop.eup %5514  ;;  %v3921_v30 = vadd.f32 1e-05, %v3913_v7 }
 0x8c6   : > { %3952 = vperm.xlu1 %5488, %v5515_v34  }
 0x8c7   : > { %5520 = vrsqrt.f32 %v3921_v30  ;;  %v4226_v30 = vld [vmem:[%s8272_s10] sm:$0xff] }
 0x8c8   : > { %v3994_v37 = vpop.permute.xlu0 %3993  ;;  %v4085_v41 = vpop.permute.xlu1 %4084 }
 0x8c9   : > { %v5517_v36 = vpop.eup %5516 }
 0x8ca   : > { %3957 = vperm.xlu0 %5489, %v5517_v36  }
 0x8cc   : > { %v3999_v44 = vpop.permute.xlu0 %3998  ;;  %v4095_v54 = vpop.permute.xlu1 %4094 }
 0x8cd   : > { %v5519_v14 = vpop.eup %5518 }
 0x8ce   : > { %3962 = vperm.xlu1 %5488, %v5519_v14  }
 0x8d0   : > { %v4090_v24 = vpop.permute.xlu0 %4089  ;;  %v4009_v29 = vpop.permute.xlu1 %4008 }
 0x8d1   : > { %v5521_v45 = vpop.eup %5520 }
 0x8d2   : > { %4043 = vperm.xlu1 %5488, %v3693_v20   ;;  %3967 = vperm.xlu0 %5489, %v5521_v45  }
 0x8d4   : > { %v4004_v53 = vpop.permute.xlu0 %4003  ;;  %v4105_v47 = vpop.permute.xlu1 %4104 }
 0x8d6   : > { %4048 = vperm.xlu1 %5488, %v3694_v13   ;;  %4134 = vperm.xlu0 %5489, %v3708_v62  }
 0x8d8   : > { %v4100_v48 = vpop.permute.xlu0 %4099  ;;  %v8137_v8 = vpop.permute.xlu1 %4018 }
 0x8da   : > { %4053 = vperm.xlu1 %5488, %v3695_v15   ;;  %4139 = vperm.xlu0 %5489, %v3709_v12  }
 0x8dc   : > { %v4014_v60 = vpop.permute.xlu0 %4013  ;;  %v8141_v35 = vpop.permute.xlu1 %4023 }
 0x8de   : > { %4058 = vperm.xlu1 %5488, %v3696_v1   ;;  %4144 = vperm.xlu0 %5489, %v3710_v55  }
 0x8e0   : > { %v8135_v10 = vpop.permute.xlu0 %4109  ;;  %v4029_v49 = vpop.permute.xlu1 %4028 }
 0x8e2   : > { %4063 = vperm.xlu1 %5488, %v3697_v6   ;;  %4149 = vperm.xlu0 %5489, %v3711_v51  }
 0x8e4   : > { %v8139_v50 = vpop.permute.xlu0 %4114  ;;  %v4034_v42 = vpop.permute.xlu1 %4033 }
 0x8e6   : > { %4159 = vperm.xlu1 %5488, %v3713_v25   ;;  %4154 = vperm.xlu0 %5489, %v3712_v52  }
 0x8e8   : > { %v8143_v0 = vpop.permute.xlu0 %4119  ;;  %v8146_v19 = vpop.permute.xlu1 %4038 }
 0x8ec   : > { %v4125_v9 = vpop.permute.xlu0 %4124 }
 0x92d   : > { %v3938_v27 = vpop.permute.xlu0 %3937 }
 0x92e   : > { %v3971_v16 = vmul.f32 %v3938_v27, %v7944_v3 }
 0x930   : > { %v4067_v18 = vmul.f32 %v3994_v37, %v3971_v16 }
 0x931   : > { %v4130_v55 = vpop.permute.xlu0 %4129 }
 0x932   : > { %v4163_v38 = vadd.f32 %v4090_v24, %v4067_v18 }
 0x934   : > { %vm4179_vm7 = vcmp.gt.f32.partialorder %v4163_v38, 0.0  ;;  %v4195_v21 = vmul.f32 0.2, %v4163_v38 }
 0x935   : > { %v3933_v31 = vpop.permute.xlu1 %3932 }
 0x936   : > { %v3970_v11 = vmul.f32 %v3933_v31, %v7954_v61  ;;  %v4211_v32 = vsel %vm4179_vm7, %v4163_v38, %v4195_v21  ;;  %v3978_v6 = vmul.f32 %v3933_v31, %v7957_v33 }
 0x937   : > { %v4243_v4 = vmul.f32 %v4227_v26, %v4211_v32 }
 0x938   : > { %v4066_v43 = vmul.f32 %v3989_v23, %v3970_v11  ;;  %v4074_v24 = vmul.f32 %v4029_v49, %v3978_v6 }
 0x939   : > { %v4261_v7 = vsel %vm391_vm0, %v4243_v4, 0.0 }
 0x93a   : > { %v4162_v34 = vadd.f32 %v4085_v41, %v4066_v43  ;;  %4262 = vadd.xlane.f32.xlu1 %v4261_v7  ;;  %v4170_v38 = vadd.f32 %v4125_v9, %v4074_v24 }
 0x93c   : > { %vm4178_vm8 = vcmp.gt.f32.partialorder %v4162_v34, 0.0  ;;  %v4194_v3 = vmul.f32 0.2, %v4162_v34  ;;  %vm4186_vm13 = vcmp.gt.f32.partialorder %v4170_v38, 0.0 }
 0x93d   : > { %v8156_v36 = vpop.permute.xlu1 %3947 }
 0x93e   : > { %v3973_v14 = vmul.f32 %v8156_v36, %v7974_v39  ;;  %v4210_v20 = vsel %vm4178_vm8, %v4162_v34, %v4194_v3 }
 0x93f   : > { %v4242_v61 = vmul.f32 %v4226_v30, %v4210_v20 }
 0x940   : > { %v4069_v45 = vmul.f32 %v4004_v53, %v3973_v14 }
 0x941   : > { %v3943_v13 = vpop.permute.xlu1 %3942  ;;  %v4258_v62 = vsel %vm391_vm0, %v4242_v61, 0.0 }
 0x942   : > { %v4165_v15 = vadd.f32 %v4100_v48, %v4069_v45  ;;  %v3972_v12 = vmul.f32 %v3943_v13, %v7968_v57  ;;  %4259 = vadd.xlane.f32.xlu0 %v4258_v62  ;;  %v4228_v57 = vld [vmem:[%s8272_s10 + $0x10] sm:$0xff]  ;;  %v4229_v48 = vld [vmem:[%s8272_s10 + $0x18] sm:$0xff]  ;;  %v3980_v31 = vmul.f32 %v3943_v13, %v7971_v17  ;;  %v3981_v13 = vmul.f32 %v8156_v36, %v7977_v40 }
 0x944   : > { %v4068_v1 = vmul.f32 %v3999_v44, %v3972_v12  ;;  %v4197_v52 = vmul.f32 0.2, %v4165_v15  ;;  %vm4181_vm9 = vcmp.gt.f32.partialorder %v4165_v15, 0.0  ;;  %v3979_v44 = vmul.f32 %v3938_v27, %v7947_v56  ;;  %v4230_v56 = vld [vmem:[%s8272_s10 + $0x20] sm:$0xff] }
 0x945   : > { %v8163_v51 = vpop.permute.xlu1 %3952  ;;  %v4076_v3 = vmul.f32 %v8146_v19, %v3980_v31 }
 0x946   : > { %v4164_v25 = vadd.f32 %v4095_v54, %v4068_v1  ;;  %v3974_v39 = vmul.f32 %v8163_v51, %v7988_v46  ;;  %v4213_v46 = vsel %vm4181_vm9, %v4165_v15, %v4197_v52  ;;  %v4075_v49 = vmul.f32 %v4034_v42, %v3979_v44 }
 0x948   : > { %v4070_v37 = vmul.f32 %v4009_v29, %v3974_v39  ;;  %vm4180_vm10 = vcmp.gt.f32.partialorder %v4164_v25, 0.0  ;;  %v4196_v23 = vmul.f32 0.2, %v4164_v25  ;;  %v4171_v4 = vadd.f32 %v4130_v55, %v4075_v49 }
 0x949   : > { %v8171_v41 = vpop.permute.xlu0 %3957 }
 0x94a   : > { %v4166_v33 = vadd.f32 %v4105_v47, %v4070_v37  ;;  %v3975_v53 = vmul.f32 %v8171_v41, %v7996_v59  ;;  %v4212_v54 = vsel %vm4180_vm10, %v4164_v25, %v4196_v23  ;;  %v4245_v59 = vmul.f32 %v4229_v48, %v4213_v46  ;;  %v4233_v37 = vld [vmem:[%s8272_s10 + $0x38] sm:$0xff]  ;;  %v4236_v46 = vld [vmem:[%s8272_s10 + $0x50] sm:$0xff] }
 0x94b   : > { %v4244_v29 = vmul.f32 %v4228_v57, %v4212_v54  ;;  %v4203_v45 = vmul.f32 0.2, %v4171_v4  ;;  %vm4187_vm15 = vcmp.gt.f32.partialorder %v4171_v4, 0.0  ;;  %v3982_v23 = vmul.f32 %v8163_v51, %v7991_v5 }
 0x94c   : > { %v4071_v16 = vmul.f32 %v4014_v60, %v3975_v53  ;;  %vm4182_vm11 = vcmp.gt.f32.partialorder %v4166_v33, 0.0  ;;  %v4198_v18 = vmul.f32 0.2, %v4166_v33  ;;  %v4267_v9 = vsel %vm391_vm0, %v4245_v59, 0.0 }
 0x94d   : > { %v8181_v27 = vpop.permute.xlu1 %3962  ;;  %v4264_v47 = vsel %vm391_vm0, %v4244_v29, 0.0  ;;  %v4219_v24 = vsel %vm4187_vm15, %v4171_v4, %v4203_v45  ;;  %v3983_v49 = vmul.f32 %v8171_v41, %v7999_v63 }
 0x94e   : > { %v4167_v21 = vadd.f32 %v8135_v10, %v4071_v16  ;;  %v3976_v26 = vmul.f32 %v8181_v27, %v8012_v22  ;;  %4265 = vadd.xlane.f32.xlu0 %v4264_v47  ;;  %v4214_v60 = vsel %vm4182_vm11, %v4166_v33, %v4198_v18  ;;  %v4231_v22 = vld [vmem:[%s8272_s10 + $0x28] sm:$0xff]  ;;  %v3984_v63 = vmul.f32 %v8181_v27, %v8015_v28 }
 0x94f   : > { %v4246_v11 = vmul.f32 %v4230_v56, %v4214_v60  ;;  %v4235_v33 = vld [vmem:[%s8272_s10 + $0x48] sm:$0xff] }
 0x950   : > { %v4072_v32 = vmul.f32 %v8137_v8, %v3976_v26  ;;  %vm4183_vm12 = vcmp.gt.f32.partialorder %v4167_v21, 0.0  ;;  %v4199_v42 = vmul.f32 0.2, %v4167_v21  ;;  %v4202_v8 = vmul.f32 0.2, %v4170_v38  ;;  %v4237_v26 = vld [vmem:[%s8272_s10 + $0x58] sm:$0xff] }
 0x951   : > { %v4044_v43 = vpop.permute.xlu1 %4043  ;;  %v8189_v7 = vpop.permute.xlu0 %3967  ;;  %v4270_v10 = vsel %vm391_vm0, %v4246_v11, 0.0  ;;  %v4251_v56 = vmul.f32 %v4235_v33, %v4219_v24  ;;  %v4238_v11 = vld [vmem:[%s8272_s10 + $0x60] sm:$0xff]  ;;  %v4239_v28 = vld [vmem:[%s8272_s10 + $0x68] sm:$0xff] }
 0x952   : > { %v4168_v34 = vadd.f32 %v8139_v50, %v4072_v32  ;;  %v3977_v17 = vmul.f32 %v8189_v7, %v8022_v58  ;;  %4268 = vadd.xlane.f32.xlu0 %v4267_v9  ;;  %4271 = vadd.xlane.f32.xlu1 %v4270_v10  ;;  %v4215_v30 = vsel %vm4183_vm12, %v4167_v21, %v4199_v42  ;;  %v4232_v58 = vld [vmem:[%s8272_s10 + $0x30] sm:$0xff] }
 0x953   : > { %v4247_v20 = vmul.f32 %v4231_v22, %v4215_v30  ;;  %v4218_v1 = vsel %vm4186_vm13, %v4170_v38, %v4202_v8  ;;  %v4077_v55 = vmul.f32 %v4044_v43, %v3981_v13  ;;  %v3985_v41 = vmul.f32 %v8189_v7, %v8025_v2  ;;  %v4241_v13 = vld [vmem:[%s8272_s10 + $0x78] sm:$0xff] }
 0x954   : > { %v4073_v14 = vmul.f32 %v8141_v35, %v3977_v17  ;;  %vm4184_vm14 = vcmp.gt.f32.partialorder %v4168_v34, 0.0  ;;  %v4200_v61 = vmul.f32 0.2, %v4168_v34  ;;  %v4234_v35 = vld [vmem:[%s8272_s10 + $0x40] sm:$0xff]  ;;  %v4285_v4 = vsel %vm391_vm0, %v4251_v56, 0.0 }
 0x955   : > { %v4049_v50 = vpop.permute.xlu1 %4048  ;;  %v4135_v62 = vpop.permute.xlu0 %4134  ;;  %v4273_v12 = vsel %vm391_vm0, %v4247_v20, 0.0  ;;  %v4250_v52 = vmul.f32 %v4234_v35, %v4218_v1 }
 0x956   : > { %v4169_v15 = vadd.f32 %v8143_v0, %v4073_v14  ;;  %v4172_v19 = vadd.f32 %v4135_v62, %v4076_v3  ;;  %4274 = vadd.xlane.f32.xlu0 %v4273_v12  ;;  %v4216_v40 = vsel %vm4184_vm14, %v4168_v34, %v4200_v61  ;;  %v4078_v48 = vmul.f32 %v4049_v50, %v3982_v23  ;;  %v4240_v50 = vld [vmem:[%s8272_s10 + $0x70] sm:$0xff] }
 0x957   : > { %v4248_v6 = vmul.f32 %v4232_v58, %v4216_v40  ;;  %v4282_v18 = vsel %vm391_vm0, %v4250_v52, 0.0 }
 0x958   : > { %vm4188_vm1 = vcmp.gt.f32.partialorder %v4172_v19, 0.0  ;;  %v4204_v36 = vmul.f32 0.2, %v4172_v19  ;;  %vm4185_vm2 = vcmp.gt.f32.partialorder %v4169_v15, 0.0  ;;  %v4201_v0 = vmul.f32 0.2, %v4169_v15 }
 0x959   : > { %v4054_v25 = vpop.permute.xlu1 %4053  ;;  %v4140_v39 = vpop.permute.xlu0 %4139  ;;  %v4276_v44 = vsel %vm391_vm0, %v4248_v6, 0.0 }
 0x95a   : > { %v4173_v57 = vadd.f32 %v4140_v39, %v4077_v55  ;;  %4277 = vadd.xlane.f32.xlu1 %v4276_v44  ;;  %v4217_v53 = vsel %vm4185_vm2, %v4169_v15, %v4201_v0  ;;  %v4220_v54 = vsel %vm4188_vm1, %v4172_v19, %v4204_v36  ;;  %v4079_v60 = vmul.f32 %v4054_v25, %v3983_v49 }
 0x95b   : > { %v4249_v51 = vmul.f32 %v4233_v37, %v4217_v53  ;;  %v4252_v38 = vmul.f32 %v4236_v46, %v4220_v54 }
 0x95c   : > { %vm4189_vm3 = vcmp.gt.f32.partialorder %v4173_v57, 0.0  ;;  %v4205_v5 = vmul.f32 0.2, %v4173_v57 }
 0x95d   : > { %v4059_v29 = vpop.permute.xlu1 %4058  ;;  %v4145_v16 = vpop.permute.xlu0 %4144  ;;  %v4279_v59 = vsel %vm391_vm0, %v4249_v51, 0.0  ;;  %v4288_v9 = vsel %vm391_vm0, %v4252_v38, 0.0 }
 0x95e   : > { %v4174_v47 = vadd.f32 %v4145_v16, %v4078_v48  ;;  %4283 = vadd.xlane.f32.xlu1 %v4282_v18  ;;  %4280 = vadd.xlane.f32.xlu0 %v4279_v59  ;;  %v4221_v21 = vsel %vm4189_vm3, %v4173_v57, %v4205_v5  ;;  %v4080_v17 = vmul.f32 %v4059_v29, %v3984_v63 }
 0x95f   : > { %v4253_v10 = vmul.f32 %v4237_v26, %v4221_v21 }
 0x960   : > { %vm4190_vm4 = vcmp.gt.f32.partialorder %v4174_v47, 0.0  ;;  %v4206_v31 = vmul.f32 0.2, %v4174_v47 }
 0x961   : > { %v4064_v32 = vpop.permute.xlu1 %4063  ;;  %v4150_v42 = vpop.permute.xlu0 %4149  ;;  %v4291_v20 = vsel %vm391_vm0, %v4253_v10, 0.0 }
 0x962   : > { %v4175_v43 = vadd.f32 %v4150_v42, %v4079_v60  ;;  %v4222_v22 = vsel %vm4190_vm4, %v4174_v47, %v4206_v31  ;;  %4286 = vadd.xlane.f32.xlu0 %v4285_v4  ;;  %4289 = vadd.xlane.f32.xlu1 %v4288_v9  ;;  %v4081_v8 = vmul.f32 %v4064_v32, %v3985_v41 }
 0x963   : > { %v4254_v34 = vmul.f32 %v4238_v11, %v4222_v22 }
 0x964   : > { %vm4191_vm5 = vcmp.gt.f32.partialorder %v4175_v43, 0.0  ;;  %v4207_v3 = vmul.f32 0.2, %v4175_v43 }
 0x965   : > { %v4160_v2 = vpop.permute.xlu1 %4159  ;;  %v4155_v27 = vpop.permute.xlu0 %4154  ;;  %v4294_v7 = vsel %vm391_vm0, %v4254_v34, 0.0 }
 0x966   : > { %v4177_v30 = vadd.f32 %v4160_v2, %v4081_v8  ;;  %v4176_v14 = vadd.f32 %v4155_v27, %v4080_v17  ;;  %v4223_v61 = vsel %vm4191_vm5, %v4175_v43, %v4207_v3  ;;  %4292 = vadd.xlane.f32.xlu0 %v4291_v20  ;;  %4295 = vadd.xlane.f32.xlu1 %v4294_v7 }
 0x967   : > { %v4255_v45 = vmul.f32 %v4239_v28, %v4223_v61 }
 0x968   : > { %vm4193_vm6 = vcmp.gt.f32.partialorder %v4177_v30, 0.0  ;;  %v4209_v62 = vmul.f32 0.2, %v4177_v30  ;;  %vm4192_vm7 = vcmp.gt.f32.partialorder %v4176_v14, 0.0  ;;  %v4208_v58 = vmul.f32 0.2, %v4176_v14 }
 0x969   : > { %v4297_v15 = vsel %vm391_vm0, %v4255_v45, 0.0 }
 0x96a   : > { %v4225_v19 = vsel %vm4193_vm6, %v4177_v30, %v4209_v62  ;;  %v4224_v12 = vsel %vm4192_vm7, %v4176_v14, %v4208_v58  ;;  %4298 = vadd.xlane.f32.xlu0 %v4297_v15 }
 0x96b   : > { %v4257_v1 = vmul.f32 %v4241_v13, %v4225_v19  ;;  %v4256_v35 = vmul.f32 %v4240_v50, %v4224_v12 }
 0x96d   : > { %v4303_v55 = vsel %vm391_vm0, %v4257_v1, 0.0  ;;  %v4300_v40 = vsel %vm391_vm0, %v4256_v35, 0.0  ;;  %vm4333_vm0 = vcmask 0  }
 0x96e   : > { %4301 = vadd.xlane.f32.xlu1 %v4300_v40  ;;  %4304 = vadd.xlane.f32.xlu0 %v4303_v55 }
 0x9c7   : > { %v4263_v25 = vpop.xlane.xlu1 %4262 }
 0x9cf   : > { %v4260_v36 = vpop.xlane.xlu0 %4259 }
 0x9d0   : > { %v4306_v39 = vadd.f32 %v4263_v25, %v4260_v36 }
 0x9db   : > { %v4266_v6 = vpop.xlane.xlu0 %4265 }
 0x9dc   : > { %v4307_v52 = vadd.f32 %v4306_v39, %v4266_v6 }
 0x9df   : > { %v4269_v0 = vpop.xlane.xlu0 %4268  ;;  %v4272_v23 = vpop.xlane.xlu1 %4271 }
 0x9e0   : > { %v4308_v37 = vadd.f32 %v4307_v52, %v4269_v0 }
 0x9e2   : > { %v4309_v57 = vadd.f32 %v4308_v37, %v4272_v23 }
 0x9e3   : > { %v4275_v44 = vpop.xlane.xlu0 %4274 }
 0x9e4   : > { %v4310_v33 = vadd.f32 %v4309_v57, %v4275_v44 }
 0x9e7   : > { %v4278_v24 = vpop.xlane.xlu1 %4277 }
 0x9e8   : > { %v4311_v53 = vadd.f32 %v4310_v33, %v4278_v24 }
 0x9eb   : > { %v4284_v54 = vpop.xlane.xlu1 %4283  ;;  %v4281_v46 = vpop.xlane.xlu0 %4280 }
 0x9ec   : > { %v4312_v48 = vadd.f32 %v4311_v53, %v4281_v46 }
 0x9ee   : > { %v4313_v5 = vadd.f32 %v4312_v48, %v4284_v54 }
 0x9ef   : > { %v4290_v51 = vpop.xlane.xlu1 %4289  ;;  %v4287_v29 = vpop.xlane.xlu0 %4286 }
 0x9f0   : > { %v4314_v16 = vadd.f32 %v4313_v5, %v4287_v29 }
 0x9f2   : > { %v4315_v18 = vadd.f32 %v4314_v16, %v4290_v51 }
 0x9f3   : > { %v4293_v56 = vpop.xlane.xlu0 %4292  ;;  %v4296_v47 = vpop.xlane.xlu1 %4295 }
 0x9f4   : > { %v4316_v49 = vadd.f32 %v4315_v18, %v4293_v56 }
 0x9f6   : > { %v4317_v59 = vadd.f32 %v4316_v49, %v4296_v47 }
 0x9f7   : > { %v4299_v38 = vpop.xlane.xlu0 %4298 }
 0x9f8   : > { %v4318_v21 = vadd.f32 %v4317_v59, %v4299_v38 }
 0x9fb   : > { %v4302_v26 = vpop.xlane.xlu1 %4301  ;;  %v4305_v31 = vpop.xlane.xlu0 %4304 }
 0x9fc   : > { %v4319_v60 = vadd.f32 %v4318_v21, %v4302_v26 }
 0x9fe   : > { %v4320_v11 = vadd.f32 %v4319_v60, %v4305_v31 }
 0xa00   : > { %v4321_v63 = vrot.slane %v4320_v11, 4 }
 0xa02   : > { %v4322_v41 = vadd.f32 %v4321_v63, %v4320_v11 }
 0xa04   : > { %v4323_v32 = vrot.slane %v4322_v41, 2 }
 0xa06   : > { %v4324_v42 = vadd.f32 %v4323_v32, %v4322_v41 }
 0xa08   : > { %v4325_v4 = vrot.slane %v4324_v42, 1 }
 0xa0a   : > { %v4326_v43 = vadd.f32 %v4325_v4, %v4324_v42 }
 0xa0c   : > { %v4327_v9 = vsub.f32 0.0, %v4326_v43 }
 0xa0e   : > { %v4328_v10 = vmul.f32 1.442695, %v4327_v9 }
 0xa10   : > { %5522 = vpow2.f32 %v4328_v10 }
 0xa1a   : > { %v5523_v22 = vpop.eup %5522 }
 0xa1b   : > { %v4330_v34 = vadd.f32 1.0, %v5523_v22 }
 0xa1d   : > { %5524 = vrcp.f32 %v4330_v34 }
 0xa27   : > { %v5525_v17 = vpop.eup %5524 }
 0xa28   : > { %4334 = vst.msk [vmem:[%s382_s19] sm:$0x1] %vm4333_vm0, %v5525_v17 }
 0xa29 PF: > { %s21_s17 = sadd.s32 1, %s5532_s17  }
 0xa2a   : > { %p18_p4 = scmp.ge.s32.totalorder %s21_s17, 4  }
 0xa2c   :  { %20 = sbr.rel (!%p18_p4) target bundleno = 1 (0x1), region = 94 }

</bundles_post_ra>
